<compile_context>
chip_gen: v5e
topology: v5e:2x2
jax: 0.10.0
libtpu: 0.0.40
codegen_flags: <defaults>
</compile_context>

<pallas_src>
import functools

import jax
import jax.numpy as jnp
from jax.experimental import pallas as pl
from jax.experimental.pallas import tpu as pltpu


# Lane padding on each side of the flattened H*W axis of the scratch buffer.
# Multiple of 128 so the interior store is lane-aligned; >= max tap shift.
_PADL = 128


# -----------------------------------------------------------------------------
# Fused kernel: full ResNet forward for one batch image per grid step.
#   x_ref   : (1, C, HW)        preprocessed input (channels zero-padded to C)
#   w_ref   : (L*K*K, C, C)     per layer & tap weights  W[t][cout, cin]
#   b_ref   : (L, C, 1)         per layer bias (zero padded)
#   o_ref   : (1, C, HW)        output (first in_chans channels are valid)
#   pad_ref : (C, HW + 2*_PADL) VMEM scratch: zero-padded activation buffer
# ConvBlock semantics: Identity norm -> optional ReLU -> Conv2d(+bias).
# -----------------------------------------------------------------------------
def _resnet_kernel(x_ref, w_ref, b_ref, o_ref, pad_ref, *,
                   H, W, K, num_resblocks):
    HW = H * W
    C = x_ref.shape[1]
    KK = K * K
    P = (K - 1) // 2

    # Zero the scratch once; only the interior [_PADL, _PADL+HW) is written
    # afterwards, so the margins provide the conv's zero padding for rows.
    pad_ref[...] = jnp.zeros((C, HW + 2 * _PADL), jnp.float32)

    x0 = x_ref[0]                                            # [C, HW]

    # Column index of each flattened pixel; masks (hoisted, computed once)
    # kill taps that would read across a row boundary.
    col = jax.lax.broadcasted_iota(jnp.int32, (1, HW), 1) % W
    col_masks = {dw: (col >= -dw) & (col <= W - 1 - dw)
                 for dw in range(-P, P + 1) if dw != 0}

    def conv(x, layer, relu):
        # ConvBlock: Identity norm -> optional ReLU -> KxK same conv + bias.
        if relu:
            x = jnp.maximum(x, 0.0)          # on [C, HW], not on 9x patches
        pad_ref[:, _PADL:_PADL + HW] = x     # lane-aligned interior store
        acc = jnp.zeros((C, HW), jnp.float32)
        t = 0
        for kh in range(K):
            for kw in range(K):
                dh, dw = kh - P, kw - P
                s = dh * W + dw
                xs = pad_ref[:, _PADL + s:_PADL + s + HW]    # shifted window
                if dw != 0:
                    xs = jnp.where(col_masks[dw], xs, 0.0)
                acc = acc + jnp.dot(w_ref[layer * KK + t], xs,
                                    preferred_element_type=jnp.float32)
                t += 1
        return acc + b_ref[layer]

    # init_layer: act='none'
    h = conv(x0, 0, relu=False)
    # res blocks: h <- conv2(relu(conv1(relu(h)))) + h  (identity shortcut)
    li = 1
    for _ in range(num_resblocks):
        t1 = conv(h, li, relu=True)
        h = conv(t1, li + 1, relu=True) + h
        li += 2
    # final_layer: act='relu', then + preprocessed input
    y = conv(h, li, relu=True) + x0
    o_ref[0] = y                              # lane-dense (HW = 256) store


# -----------------------------------------------------------------------------
# Glue: parameter packing and the pallas_call wrapper.
# -----------------------------------------------------------------------------
def _pack_params(params, C):
    """Pack HWIO conv weights into [L*K*K, C, C] per-tap matrices + biases."""
    def pack(w_hwio, b):
        K = w_hwio.shape[0]
        cin, cout = w_hwio.shape[2], w_hwio.shape[3]
        # per tap t = kh*K + kw : [cout, cin], zero padded to [C, C]
        wt = jnp.transpose(w_hwio, (0, 1, 3, 2)).reshape(K * K, cout, cin)
        wt = jnp.pad(wt, ((0, 0), (0, C - cout), (0, C - cin)))
        bt = jnp.pad(b, (0, C - cout)).reshape(C, 1)
        return wt, bt

    layers = [(params["init_w"], params["init_b"])]
    for (w1, b1, w2, b2) in params["res"]:
        layers.append((w1, b1))
        layers.append((w2, b2))
    layers.append((params["final_w"], params["final_b"]))
    packed = [pack(w, b) for w, b in layers]
    w_all = jnp.concatenate([w for w, _ in packed], axis=0)   # [L*K*K, C, C]
    b_all = jnp.stack([b for _, b in packed], axis=0)         # [L, C, 1]
    return w_all, b_all


@jax.jit
def resnet_forward(x_complex, params):
    """x_complex: [N, Cc, H, W] complex64 (NCHW, like the PyTorch module)."""
    N, Cc, H, W = x_complex.shape
    Cin = 2 * Cc                               # real channels after _preprocess
    K = params["init_w"].shape[0]
    C = params["init_w"].shape[-1]             # chans (widest layer)
    num_resblocks = len(params["res"])
    L = 2 + 2 * num_resblocks
    HW = H * W

    # _preprocess: cat(real, imag) on channels; flatten spatial; zero-pad the
    # channel axis to C so every layer sees a uniform [C, HW] activation.
    x = jnp.concatenate([jnp.real(x_complex), jnp.imag(x_complex)],
                        axis=1).astype(jnp.float32).reshape(N, Cin, HW)
    x = jnp.pad(x, ((0, 0), (0, C - Cin), (0, 0)))

    w_all, b_all = _pack_params(params, C)

    kern = functools.partial(_resnet_kernel, H=H, W=W, K=K,
                             num_resblocks=num_resblocks)

    out = pl.pallas_call(
        kern,
        out_shape=jax.ShapeDtypeStruct((N, C, HW), jnp.float32),
        grid_spec=pltpu.PrefetchScalarGridSpec(
            num_scalar_prefetch=0,
            grid=(N,),
            in_specs=[
                pl.BlockSpec((1, C, HW), lambda n: (n, 0, 0)),
                pl.BlockSpec((L * K * K, C, C), lambda n: (0, 0, 0)),
                pl.BlockSpec((L, C, 1), lambda n: (0, 0, 0)),
            ],
            out_specs=pl.BlockSpec((1, C, HW), lambda n: (n, 0, 0)),
            scratch_shapes=[pltpu.VMEM((C, HW + 2 * _PADL), jnp.float32)],
        ),
        compiler_params=pltpu.CompilerParams(
            dimension_semantics=("parallel",)),
    )(x, w_all, b_all)

    # _postprocess: drop channel padding, split halves -> complex, back to NCHW.
    y = out[:, :Cin].reshape(N, Cin, H, W)
    return jax.lax.complex(y[:, :Cc], y[:, Cc:])


# -----------------------------------------------------------------------------
# Pure-JAX reference (lax.conv) for a correctness check.
# -----------------------------------------------------------------------------
def _ref_conv(x, w_hwio, b, relu):
    if relu:
        x = jnp.maximum(x, 0.0)
    y = jax.lax.conv_general_dilated(
        x, w_hwio, window_strides=(1, 1), padding="SAME",
        dimension_numbers=("NHWC", "HWIO", "NHWC"))
    return y + b.reshape(1, 1, 1, -1)


def resnet_forward_ref(x_complex, params):
    x_nchw = jnp.concatenate(
        [jnp.real(x_complex), jnp.imag(x_complex)], axis=1).astype(jnp.float32)
    x = jnp.transpose(x_nchw, (0, 2, 3, 1))
    h = _ref_conv(x, params["init_w"], params["init_b"], relu=False)
    for (w1, b1, w2, b2) in params["res"]:
        t = _ref_conv(h, w1, b1, relu=True)
        h = _ref_conv(t, w2, b2, relu=True) + h
    y = _ref_conv(h, params["final_w"], params["final_b"], relu=True) + x
    y_nchw = jnp.transpose(y, (0, 3, 1, 2))
    c = y_nchw.shape[1]
    return jax.lax.complex(y_nchw[:, :c // 2], y_nchw[:, c // 2:])


# -----------------------------------------------------------------------------
# Deterministic parameter init (PyTorch Conv2d default: U(-1/sqrt(fan_in), .)).
# -----------------------------------------------------------------------------
def init_params(key, *, num_resblocks, in_chans, chans, kernel_size):
    def conv_init(k, cin, cout, ksz):
        kw, kb = jax.random.split(k)
        fan_in = cin * ksz * ksz
        bound = 1.0 / jnp.sqrt(fan_in)
        w = jax.random.uniform(kw, (ksz, ksz, cin, cout), jnp.float32,
                               -bound, bound)
        b = jax.random.uniform(kb, (cout,), jnp.float32, -bound, bound)
        return w, b

    keys = jax.random.split(key, 2 + 2 * num_resblocks)
    init_w, init_b = conv_init(keys[0], in_chans, chans, kernel_size)
    res = []
    for r in range(num_resblocks):
        w1, b1 = conv_init(keys[1 + 2 * r], chans, chans, kernel_size)
        w2, b2 = conv_init(keys[2 + 2 * r], chans, chans, kernel_size)
        res.append((w1, b1, w2, b2))
    final_w, final_b = conv_init(keys[-1], chans, in_chans, kernel_size)
    return {"init_w": init_w, "init_b": init_b, "res": res,
            "final_w": final_w, "final_b": final_b}


if __name__ == "__main__":
    # TODO(synk): circular_pad / pad_size are defined in __init__ but never
    # used in the PyTorch forward, so they are intentionally not implemented.
    num_resblocks = 2
    in_chans = 4          # real channels after _preprocess (2 complex channels)
    chans = 8
    kernel_size = 3
    N, H, W = 2, 16, 16

    key = jax.random.PRNGKey(0)
    k_params, k_re, k_im = jax.random.split(key, 3)

    params = init_params(k_params, num_resblocks=num_resblocks,
                         in_chans=in_chans, chans=chans,
                         kernel_size=kernel_size)

    x_real = jax.random.normal(k_re, (N, in_chans // 2, H, W), jnp.float32)
    x_imag = jax.random.normal(k_im, (N, in_chans // 2, H, W), jnp.float32)
    x = jax.lax.complex(x_real, x_imag)   # [N, 2, 16, 16] complex64

    out = jax.block_until_ready(resnet_forward(x, params))
    ref = jax.block_until_ready(resnet_forward_ref(x, params))

    assert out.shape == x.shape and out.dtype == jnp.complex64
    assert jnp.allclose(out, ref, atol=1e-4, rtol=1e-4), "mismatch vs reference"

    print("KERNEL_OK")
</pallas_src>

<mosaic_0001>
module attributes {stable_mosaic.version = 11 : i64} {
  func.func @_resnet_kernel(%arg0: i32, %arg1: memref<1x8x256xf32, #tpu.memory_space<vmem>>, %arg2: memref<54x8x8xf32, #tpu.memory_space<vmem>>, %arg3: memref<6x8x1xf32, #tpu.memory_space<vmem>>, %arg4: memref<1x8x256xf32, #tpu.memory_space<vmem>>, %arg5: memref<8x512xf32, #tpu.memory_space<vmem>>) attributes {dimension_semantics = [#tpu.dimension_semantics<parallel>], iteration_bounds = array<i64: 2>, scalar_prefetch = 0 : i64, scratch_operands = 1 : i64, tpu.core_type = #tpu.core_type<tc>, window_params = [{transform_indices = @transform_0, window_bounds = array<i64: 1, 8, 256>}, {pipeline_mode = #tpu.pipeline_mode<synchronous>, transform_indices = @transform_1, window_bounds = array<i64: 54, 8, 8>}, {pipeline_mode = #tpu.pipeline_mode<synchronous>, transform_indices = @transform_2, window_bounds = array<i64: 6, 8, 1>}, {transform_indices = @transform_3, window_bounds = array<i64: 1, 8, 256>}]} {
    %cst = arith.constant 0.000000e+00 : f32
    %0 = vector.broadcast %cst : f32 to vector<8x512xf32>
    %c0 = arith.constant 0 : index
    %c0_0 = arith.constant 0 : index
    %1 = vector.load %arg5[%c0, %c0_0] : memref<8x512xf32, #tpu.memory_space<vmem>>, vector<8x512xf32>
    tpu.vector_store %arg5[%c0, %c0_0], %0 {strides = array<i32>} : memref<8x512xf32, #tpu.memory_space<vmem>>, vector<8x512xf32>,
    %c0_1 = arith.constant 0 : index
    %c0_2 = arith.constant 0 : index
    %c0_3 = arith.constant 0 : index
    %2 = vector.load %arg1[%c0_1, %c0_2, %c0_3] : memref<1x8x256xf32, #tpu.memory_space<vmem>>, vector<1x8x256xf32>
    %3 = vector.shape_cast %2 : vector<1x8x256xf32> to vector<8x256xf32>
    %4 = tpu.iota {dimensions = array<i32: 1>} : vector<1x256xi32>
    %c16_i32 = arith.constant 16 : i32
    %c0_i32 = arith.constant 0 : i32
    %5 = arith.cmpi eq, %c16_i32, %c0_i32 : i32
    %c1_i32 = arith.constant 1 : i32
    %6 = arith.select %5, %c1_i32, %c16_i32 : i32
    %7 = vector.broadcast %6 : i32 to vector<1x256xi32>
    %8 = arith.remsi %4, %7 : vector<1x256xi32>
    %c0_i32_4 = arith.constant 0 : i32
    %9 = vector.broadcast %c0_i32_4 : i32 to vector<1x256xi32>
    %10 = arith.cmpi ne, %8, %9 : vector<1x256xi32>
    %c0_i32_5 = arith.constant 0 : i32
    %11 = vector.broadcast %c0_i32_5 : i32 to vector<1x256xi32>
    %12 = arith.cmpi slt, %8, %11 : vector<1x256xi32>
    %c0_i32_6 = arith.constant 0 : i32
    %13 = arith.cmpi slt, %6, %c0_i32_6 : i32
    %14 = vector.broadcast %13 : i1 to vector<1x256xi1>
    %15 = vector.broadcast %14 : vector<1x256xi1> to vector<1x256xi1>
    %16 = arith.xori %12, %15 : vector<1x256xi1>
    %17 = arith.andi %16, %10 : vector<1x256xi1>
    %18 = vector.broadcast %6 : i32 to vector<1x256xi32>
    %19 = arith.addi %8, %18 : vector<1x256xi32>
    %20 = arith.select %17, %19, %8 : vector<1x256xi1>, vector<1x256xi32>
    %c1_i32_7 = arith.constant 1 : i32
    %21 = vector.broadcast %c1_i32_7 : i32 to vector<1x256xi32>
    %22 = arith.cmpi sge, %20, %21 : vector<1x256xi32>
    %c16_i32_8 = arith.constant 16 : i32
    %23 = vector.broadcast %c16_i32_8 : i32 to vector<1x256xi32>
    %24 = arith.cmpi sle, %20, %23 : vector<1x256xi32>
    %25 = arith.andi %22, %24 : vector<1x256xi1>
    %c-1_i32 = arith.constant -1 : i32
    %26 = vector.broadcast %c-1_i32 : i32 to vector<1x256xi32>
    %27 = arith.cmpi sge, %20, %26 : vector<1x256xi32>
    %c14_i32 = arith.constant 14 : i32
    %28 = vector.broadcast %c14_i32 : i32 to vector<1x256xi32>
    %29 = arith.cmpi sle, %20, %28 : vector<1x256xi32>
    %30 = arith.andi %27, %29 : vector<1x256xi1>
    %c0_9 = arith.constant 0 : index
    %c128 = arith.constant 128 : index
    %31 = vector.load %arg5[%c0_9, %c128] : memref<8x512xf32, #tpu.memory_space<vmem>>, vector<8x256xf32>
    tpu.vector_store %arg5[%c0_9, %c128], %3 {strides = array<i32>} : memref<8x512xf32, #tpu.memory_space<vmem>>, vector<8x256xf32>,
    %cst_10 = arith.constant 0.000000e+00 : f32
    %32 = vector.broadcast %cst_10 : f32 to vector<8x256xf32>
    %c0_11 = arith.constant 0 : index
    %c111 = arith.constant 111 : index
    %33 = vector.load %arg5[%c0_11, %c111] : memref<8x512xf32, #tpu.memory_space<vmem>>, vector<8x256xf32>
    %cst_12 = arith.constant 0.000000e+00 : f32
    %34 = vector.shape_cast %25 : vector<1x256xi1> to vector<1x256xi1>
    %35 = vector.broadcast %34 : vector<1x256xi1> to vector<8x256xi1>
    %36 = vector.broadcast %cst_12 : f32 to vector<8x256xf32>
    %37 = arith.select %35, %33, %36 : vector<8x256xi1>, vector<8x256xf32>
    %c0_13 = arith.constant 0 : index
    %c0_14 = arith.constant 0 : index
    %c0_15 = arith.constant 0 : index
    %38 = vector.load %arg2[%c0_13, %c0_14, %c0_15] : memref<54x8x8xf32, #tpu.memory_space<vmem>>, vector<1x8x8xf32>
    %39 = vector.shape_cast %38 : vector<1x8x8xf32> to vector<8x8xf32>
    %cst_16 = arith.constant dense<0.000000e+00> : vector<8x256xf32>
    %40 = tpu.matmul %39, %37, %cst_16 {dimension_numbers = #tpu.dot_dimension_numbers<[1], [0], [0], [1], [0, 0, 1, 1], [], []>} : vector<8x8xf32>, vector<8x256xf32>, vector<8x256xf32> -> vector<8x256xf32>
    %41 = arith.addf %32, %40 : vector<8x256xf32>
    %c0_17 = arith.constant 0 : index
    %c112 = arith.constant 112 : index
    %42 = vector.load %arg5[%c0_17, %c112] : memref<8x512xf32, #tpu.memory_space<vmem>>, vector<8x256xf32>
    %c1 = arith.constant 1 : index
    %c0_18 = arith.constant 0 : index
    %c0_19 = arith.constant 0 : index
    %43 = vector.load %arg2[%c1, %c0_18, %c0_19] : memref<54x8x8xf32, #tpu.memory_space<vmem>>, vector<1x8x8xf32>
    %44 = vector.shape_cast %43 : vector<1x8x8xf32> to vector<8x8xf32>
    %cst_20 = arith.constant dense<0.000000e+00> : vector<8x256xf32>
    %45 = tpu.matmul %44, %42, %cst_20 {dimension_numbers = #tpu.dot_dimension_numbers<[1], [0], [0], [1], [0, 0, 1, 1], [], []>} : vector<8x8xf32>, vector<8x256xf32>, vector<8x256xf32> -> vector<8x256xf32>
    %46 = arith.addf %41, %45 : vector<8x256xf32>
    %c0_21 = arith.constant 0 : index
    %c113 = arith.constant 113 : index
    %47 = vector.load %arg5[%c0_21, %c113] : memref<8x512xf32, #tpu.memory_space<vmem>>, vector<8x256xf32>
    %cst_22 = arith.constant 0.000000e+00 : f32
    %48 = vector.shape_cast %30 : vector<1x256xi1> to vector<1x256xi1>
    %49 = vector.broadcast %48 : vector<1x256xi1> to vector<8x256xi1>
    %50 = vector.broadcast %cst_22 : f32 to vector<8x256xf32>
    %51 = arith.select %49, %47, %50 : vector<8x256xi1>, vector<8x256xf32>
    %c2 = arith.constant 2 : index
    %c0_23 = arith.constant 0 : index
    %c0_24 = arith.constant 0 : index
    %52 = vector.load %arg2[%c2, %c0_23, %c0_24] : memref<54x8x8xf32, #tpu.memory_space<vmem>>, vector<1x8x8xf32>
    %53 = vector.shape_cast %52 : vector<1x8x8xf32> to vector<8x8xf32>
    %cst_25 = arith.constant dense<0.000000e+00> : vector<8x256xf32>
    %54 = tpu.matmul %53, %51, %cst_25 {dimension_numbers = #tpu.dot_dimension_numbers<[1], [0], [0], [1], [0, 0, 1, 1], [], []>} : vector<8x8xf32>, vector<8x256xf32>, vector<8x256xf32> -> vector<8x256xf32>
    %55 = arith.addf %46, %54 : vector<8x256xf32>
    %c0_26 = arith.constant 0 : index
    %c127 = arith.constant 127 : index
    %56 = vector.load %arg5[%c0_26, %c127] : memref<8x512xf32, #tpu.memory_space<vmem>>, vector<8x256xf32>
    %cst_27 = arith.constant 0.000000e+00 : f32
    %57 = vector.shape_cast %25 : vector<1x256xi1> to vector<1x256xi1>
    %58 = vector.broadcast %57 : vector<1x256xi1> to vector<8x256xi1>
    %59 = vector.broadcast %cst_27 : f32 to vector<8x256xf32>
    %60 = arith.select %58, %56, %59 : vector<8x256xi1>, vector<8x256xf32>
    %c3 = arith.constant 3 : index
    %c0_28 = arith.constant 0 : index
    %c0_29 = arith.constant 0 : index
    %61 = vector.load %arg2[%c3, %c0_28, %c0_29] : memref<54x8x8xf32, #tpu.memory_space<vmem>>, vector<1x8x8xf32>
    %62 = vector.shape_cast %61 : vector<1x8x8xf32> to vector<8x8xf32>
    %cst_30 = arith.constant dense<0.000000e+00> : vector<8x256xf32>
    %63 = tpu.matmul %62, %60, %cst_30 {dimension_numbers = #tpu.dot_dimension_numbers<[1], [0], [0], [1], [0, 0, 1, 1], [], []>} : vector<8x8xf32>, vector<8x256xf32>, vector<8x256xf32> -> vector<8x256xf32>
    %64 = arith.addf %55, %63 : vector<8x256xf32>
    %c0_31 = arith.constant 0 : index
    %c128_32 = arith.constant 128 : index
    %65 = vector.load %arg5[%c0_31, %c128_32] : memref<8x512xf32, #tpu.memory_space<vmem>>, vector<8x256xf32>
    %c4 = arith.constant 4 : index
    %c0_33 = arith.constant 0 : index
    %c0_34 = arith.constant 0 : index
    %66 = vector.load %arg2[%c4, %c0_33, %c0_34] : memref<54x8x8xf32, #tpu.memory_space<vmem>>, vector<1x8x8xf32>
    %67 = vector.shape_cast %66 : vector<1x8x8xf32> to vector<8x8xf32>
    %cst_35 = arith.constant dense<0.000000e+00> : vector<8x256xf32>
    %68 = tpu.matmul %67, %65, %cst_35 {dimension_numbers = #tpu.dot_dimension_numbers<[1], [0], [0], [1], [0, 0, 1, 1], [], []>} : vector<8x8xf32>, vector<8x256xf32>, vector<8x256xf32> -> vector<8x256xf32>
    %69 = arith.addf %64, %68 : vector<8x256xf32>
    %c0_36 = arith.constant 0 : index
    %c129 = arith.constant 129 : index
    %70 = vector.load %arg5[%c0_36, %c129] : memref<8x512xf32, #tpu.memory_space<vmem>>, vector<8x256xf32>
    %cst_37 = arith.constant 0.000000e+00 : f32
    %71 = vector.shape_cast %30 : vector<1x256xi1> to vector<1x256xi1>
    %72 = vector.broadcast %71 : vector<1x256xi1> to vector<8x256xi1>
    %73 = vector.broadcast %cst_37 : f32 to vector<8x256xf32>
    %74 = arith.select %72, %70, %73 : vector<8x256xi1>, vector<8x256xf32>
    %c5 = arith.constant 5 : index
    %c0_38 = arith.constant 0 : index
    %c0_39 = arith.constant 0 : index
    %75 = vector.load %arg2[%c5, %c0_38, %c0_39] : memref<54x8x8xf32, #tpu.memory_space<vmem>>, vector<1x8x8xf32>
    %76 = vector.shape_cast %75 : vector<1x8x8xf32> to vector<8x8xf32>
    %cst_40 = arith.constant dense<0.000000e+00> : vector<8x256xf32>
    %77 = tpu.matmul %76, %74, %cst_40 {dimension_numbers = #tpu.dot_dimension_numbers<[1], [0], [0], [1], [0, 0, 1, 1], [], []>} : vector<8x8xf32>, vector<8x256xf32>, vector<8x256xf32> -> vector<8x256xf32>
    %78 = arith.addf %69, %77 : vector<8x256xf32>
    %c0_41 = arith.constant 0 : index
    %c143 = arith.constant 143 : index
    %79 = vector.load %arg5[%c0_41, %c143] : memref<8x512xf32, #tpu.memory_space<vmem>>, vector<8x256xf32>
    %cst_42 = arith.constant 0.000000e+00 : f32
    %80 = vector.shape_cast %25 : vector<1x256xi1> to vector<1x256xi1>
    %81 = vector.broadcast %80 : vector<1x256xi1> to vector<8x256xi1>
    %82 = vector.broadcast %cst_42 : f32 to vector<8x256xf32>
    %83 = arith.select %81, %79, %82 : vector<8x256xi1>, vector<8x256xf32>
    %c6 = arith.constant 6 : index
    %c0_43 = arith.constant 0 : index
    %c0_44 = arith.constant 0 : index
    %84 = vector.load %arg2[%c6, %c0_43, %c0_44] : memref<54x8x8xf32, #tpu.memory_space<vmem>>, vector<1x8x8xf32>
    %85 = vector.shape_cast %84 : vector<1x8x8xf32> to vector<8x8xf32>
    %cst_45 = arith.constant dense<0.000000e+00> : vector<8x256xf32>
    %86 = tpu.matmul %85, %83, %cst_45 {dimension_numbers = #tpu.dot_dimension_numbers<[1], [0], [0], [1], [0, 0, 1, 1], [], []>} : vector<8x8xf32>, vector<8x256xf32>, vector<8x256xf32> -> vector<8x256xf32>
    %87 = arith.addf %78, %86 : vector<8x256xf32>
    %c0_46 = arith.constant 0 : index
    %c144 = arith.constant 144 : index
    %88 = vector.load %arg5[%c0_46, %c144] : memref<8x512xf32, #tpu.memory_space<vmem>>, vector<8x256xf32>
    %c7 = arith.constant 7 : index
    %c0_47 = arith.constant 0 : index
    %c0_48 = arith.constant 0 : index
    %89 = vector.load %arg2[%c7, %c0_47, %c0_48] : memref<54x8x8xf32, #tpu.memory_space<vmem>>, vector<1x8x8xf32>
    %90 = vector.shape_cast %89 : vector<1x8x8xf32> to vector<8x8xf32>
    %cst_49 = arith.constant dense<0.000000e+00> : vector<8x256xf32>
    %91 = tpu.matmul %90, %88, %cst_49 {dimension_numbers = #tpu.dot_dimension_numbers<[1], [0], [0], [1], [0, 0, 1, 1], [], []>} : vector<8x8xf32>, vector<8x256xf32>, vector<8x256xf32> -> vector<8x256xf32>
    %92 = arith.addf %87, %91 : vector<8x256xf32>
    %c0_50 = arith.constant 0 : index
    %c145 = arith.constant 145 : index
    %93 = vector.load %arg5[%c0_50, %c145] : memref<8x512xf32, #tpu.memory_space<vmem>>, vector<8x256xf32>
    %cst_51 = arith.constant 0.000000e+00 : f32
    %94 = vector.shape_cast %30 : vector<1x256xi1> to vector<1x256xi1>
    %95 = vector.broadcast %94 : vector<1x256xi1> to vector<8x256xi1>
    %96 = vector.broadcast %cst_51 : f32 to vector<8x256xf32>
    %97 = arith.select %95, %93, %96 : vector<8x256xi1>, vector<8x256xf32>
    %c8 = arith.constant 8 : index
    %c0_52 = arith.constant 0 : index
    %c0_53 = arith.constant 0 : index
    %98 = vector.load %arg2[%c8, %c0_52, %c0_53] : memref<54x8x8xf32, #tpu.memory_space<vmem>>, vector<1x8x8xf32>
    %99 = vector.shape_cast %98 : vector<1x8x8xf32> to vector<8x8xf32>
    %cst_54 = arith.constant dense<0.000000e+00> : vector<8x256xf32>
    %100 = tpu.matmul %99, %97, %cst_54 {dimension_numbers = #tpu.dot_dimension_numbers<[1], [0], [0], [1], [0, 0, 1, 1], [], []>} : vector<8x8xf32>, vector<8x256xf32>, vector<8x256xf32> -> vector<8x256xf32>
    %101 = arith.addf %92, %100 : vector<8x256xf32>
    %c0_55 = arith.constant 0 : index
    %c0_56 = arith.constant 0 : index
    %c0_57 = arith.constant 0 : index
    %102 = vector.load %arg3[%c0_55, %c0_56, %c0_57] : memref<6x8x1xf32, #tpu.memory_space<vmem>>, vector<1x8x1xf32>
    %103 = vector.shape_cast %102 : vector<1x8x1xf32> to vector<8x1xf32>
    %104 = vector.broadcast %103 : vector<8x1xf32> to vector<8x256xf32>
    %105 = arith.addf %101, %104 : vector<8x256xf32>
    %cst_58 = arith.constant 0.000000e+00 : f32
    %106 = vector.broadcast %cst_58 : f32 to vector<8x256xf32>
    %107 = arith.maximumf %105, %106 : vector<8x256xf32>
    %c0_59 = arith.constant 0 : index
    %c128_60 = arith.constant 128 : index
    %108 = vector.load %arg5[%c0_59, %c128_60] : memref<8x512xf32, #tpu.memory_space<vmem>>, vector<8x256xf32>
    tpu.vector_store %arg5[%c0_59, %c128_60], %107 {strides = array<i32>} : memref<8x512xf32, #tpu.memory_space<vmem>>, vector<8x256xf32>,
    %cst_61 = arith.constant 0.000000e+00 : f32
    %109 = vector.broadcast %cst_61 : f32 to vector<8x256xf32>
    %c0_62 = arith.constant 0 : index
    %c111_63 = arith.constant 111 : index
    %110 = vector.load %arg5[%c0_62, %c111_63] : memref<8x512xf32, #tpu.memory_space<vmem>>, vector<8x256xf32>
    %cst_64 = arith.constant 0.000000e+00 : f32
    %111 = vector.shape_cast %25 : vector<1x256xi1> to vector<1x256xi1>
    %112 = vector.broadcast %111 : vector<1x256xi1> to vector<8x256xi1>
    %113 = vector.broadcast %cst_64 : f32 to vector<8x256xf32>
    %114 = arith.select %112, %110, %113 : vector<8x256xi1>, vector<8x256xf32>
    %c9 = arith.constant 9 : index
    %c0_65 = arith.constant 0 : index
    %c0_66 = arith.constant 0 : index
    %115 = vector.load %arg2[%c9, %c0_65, %c0_66] : memref<54x8x8xf32, #tpu.memory_space<vmem>>, vector<1x8x8xf32>
    %116 = vector.shape_cast %115 : vector<1x8x8xf32> to vector<8x8xf32>
    %cst_67 = arith.constant dense<0.000000e+00> : vector<8x256xf32>
    %117 = tpu.matmul %116, %114, %cst_67 {dimension_numbers = #tpu.dot_dimension_numbers<[1], [0], [0], [1], [0, 0, 1, 1], [], []>} : vector<8x8xf32>, vector<8x256xf32>, vector<8x256xf32> -> vector<8x256xf32>
    %118 = arith.addf %109, %117 : vector<8x256xf32>
    %c0_68 = arith.constant 0 : index
    %c112_69 = arith.constant 112 : index
    %119 = vector.load %arg5[%c0_68, %c112_69] : memref<8x512xf32, #tpu.memory_space<vmem>>, vector<8x256xf32>
    %c10 = arith.constant 10 : index
    %c0_70 = arith.constant 0 : index
    %c0_71 = arith.constant 0 : index
    %120 = vector.load %arg2[%c10, %c0_70, %c0_71] : memref<54x8x8xf32, #tpu.memory_space<vmem>>, vector<1x8x8xf32>
    %121 = vector.shape_cast %120 : vector<1x8x8xf32> to vector<8x8xf32>
    %cst_72 = arith.constant dense<0.000000e+00> : vector<8x256xf32>
    %122 = tpu.matmul %121, %119, %cst_72 {dimension_numbers = #tpu.dot_dimension_numbers<[1], [0], [0], [1], [0, 0, 1, 1], [], []>} : vector<8x8xf32>, vector<8x256xf32>, vector<8x256xf32> -> vector<8x256xf32>
    %123 = arith.addf %118, %122 : vector<8x256xf32>
    %c0_73 = arith.constant 0 : index
    %c113_74 = arith.constant 113 : index
    %124 = vector.load %arg5[%c0_73, %c113_74] : memref<8x512xf32, #tpu.memory_space<vmem>>, vector<8x256xf32>
    %cst_75 = arith.constant 0.000000e+00 : f32
    %125 = vector.shape_cast %30 : vector<1x256xi1> to vector<1x256xi1>
    %126 = vector.broadcast %125 : vector<1x256xi1> to vector<8x256xi1>
    %127 = vector.broadcast %cst_75 : f32 to vector<8x256xf32>
    %128 = arith.select %126, %124, %127 : vector<8x256xi1>, vector<8x256xf32>
    %c11 = arith.constant 11 : index
    %c0_76 = arith.constant 0 : index
    %c0_77 = arith.constant 0 : index
    %129 = vector.load %arg2[%c11, %c0_76, %c0_77] : memref<54x8x8xf32, #tpu.memory_space<vmem>>, vector<1x8x8xf32>
    %130 = vector.shape_cast %129 : vector<1x8x8xf32> to vector<8x8xf32>
    %cst_78 = arith.constant dense<0.000000e+00> : vector<8x256xf32>
    %131 = tpu.matmul %130, %128, %cst_78 {dimension_numbers = #tpu.dot_dimension_numbers<[1], [0], [0], [1], [0, 0, 1, 1], [], []>} : vector<8x8xf32>, vector<8x256xf32>, vector<8x256xf32> -> vector<8x256xf32>
    %132 = arith.addf %123, %131 : vector<8x256xf32>
    %c0_79 = arith.constant 0 : index
    %c127_80 = arith.constant 127 : index
    %133 = vector.load %arg5[%c0_79, %c127_80] : memref<8x512xf32, #tpu.memory_space<vmem>>, vector<8x256xf32>
    %cst_81 = arith.constant 0.000000e+00 : f32
    %134 = vector.shape_cast %25 : vector<1x256xi1> to vector<1x256xi1>
    %135 = vector.broadcast %134 : vector<1x256xi1> to vector<8x256xi1>
    %136 = vector.broadcast %cst_81 : f32 to vector<8x256xf32>
    %137 = arith.select %135, %133, %136 : vector<8x256xi1>, vector<8x256xf32>
    %c12 = arith.constant 12 : index
    %c0_82 = arith.constant 0 : index
    %c0_83 = arith.constant 0 : index
    %138 = vector.load %arg2[%c12, %c0_82, %c0_83] : memref<54x8x8xf32, #tpu.memory_space<vmem>>, vector<1x8x8xf32>
    %139 = vector.shape_cast %138 : vector<1x8x8xf32> to vector<8x8xf32>
    %cst_84 = arith.constant dense<0.000000e+00> : vector<8x256xf32>
    %140 = tpu.matmul %139, %137, %cst_84 {dimension_numbers = #tpu.dot_dimension_numbers<[1], [0], [0], [1], [0, 0, 1, 1], [], []>} : vector<8x8xf32>, vector<8x256xf32>, vector<8x256xf32> -> vector<8x256xf32>
    %141 = arith.addf %132, %140 : vector<8x256xf32>
    %c0_85 = arith.constant 0 : index
    %c128_86 = arith.constant 128 : index
    %142 = vector.load %arg5[%c0_85, %c128_86] : memref<8x512xf32, #tpu.memory_space<vmem>>, vector<8x256xf32>
    %c13 = arith.constant 13 : index
    %c0_87 = arith.constant 0 : index
    %c0_88 = arith.constant 0 : index
    %143 = vector.load %arg2[%c13, %c0_87, %c0_88] : memref<54x8x8xf32, #tpu.memory_space<vmem>>, vector<1x8x8xf32>
    %144 = vector.shape_cast %143 : vector<1x8x8xf32> to vector<8x8xf32>
    %cst_89 = arith.constant dense<0.000000e+00> : vector<8x256xf32>
    %145 = tpu.matmul %144, %142, %cst_89 {dimension_numbers = #tpu.dot_dimension_numbers<[1], [0], [0], [1], [0, 0, 1, 1], [], []>} : vector<8x8xf32>, vector<8x256xf32>, vector<8x256xf32> -> vector<8x256xf32>
    %146 = arith.addf %141, %145 : vector<8x256xf32>
    %c0_90 = arith.constant 0 : index
    %c129_91 = arith.constant 129 : index
    %147 = vector.load %arg5[%c0_90, %c129_91] : memref<8x512xf32, #tpu.memory_space<vmem>>, vector<8x256xf32>
    %cst_92 = arith.constant 0.000000e+00 : f32
    %148 = vector.shape_cast %30 : vector<1x256xi1> to vector<1x256xi1>
    %149 = vector.broadcast %148 : vector<1x256xi1> to vector<8x256xi1>
    %150 = vector.broadcast %cst_92 : f32 to vector<8x256xf32>
    %151 = arith.select %149, %147, %150 : vector<8x256xi1>, vector<8x256xf32>
    %c14 = arith.constant 14 : index
    %c0_93 = arith.constant 0 : index
    %c0_94 = arith.constant 0 : index
    %152 = vector.load %arg2[%c14, %c0_93, %c0_94] : memref<54x8x8xf32, #tpu.memory_space<vmem>>, vector<1x8x8xf32>
    %153 = vector.shape_cast %152 : vector<1x8x8xf32> to vector<8x8xf32>
    %cst_95 = arith.constant dense<0.000000e+00> : vector<8x256xf32>
    %154 = tpu.matmul %153, %151, %cst_95 {dimension_numbers = #tpu.dot_dimension_numbers<[1], [0], [0], [1], [0, 0, 1, 1], [], []>} : vector<8x8xf32>, vector<8x256xf32>, vector<8x256xf32> -> vector<8x256xf32>
    %155 = arith.addf %146, %154 : vector<8x256xf32>
    %c0_96 = arith.constant 0 : index
    %c143_97 = arith.constant 143 : index
    %156 = vector.load %arg5[%c0_96, %c143_97] : memref<8x512xf32, #tpu.memory_space<vmem>>, vector<8x256xf32>
    %cst_98 = arith.constant 0.000000e+00 : f32
    %157 = vector.shape_cast %25 : vector<1x256xi1> to vector<1x256xi1>
    %158 = vector.broadcast %157 : vector<1x256xi1> to vector<8x256xi1>
    %159 = vector.broadcast %cst_98 : f32 to vector<8x256xf32>
    %160 = arith.select %158, %156, %159 : vector<8x256xi1>, vector<8x256xf32>
    %c15 = arith.constant 15 : index
    %c0_99 = arith.constant 0 : index
    %c0_100 = arith.constant 0 : index
    %161 = vector.load %arg2[%c15, %c0_99, %c0_100] : memref<54x8x8xf32, #tpu.memory_space<vmem>>, vector<1x8x8xf32>
    %162 = vector.shape_cast %161 : vector<1x8x8xf32> to vector<8x8xf32>
    %cst_101 = arith.constant dense<0.000000e+00> : vector<8x256xf32>
    %163 = tpu.matmul %162, %160, %cst_101 {dimension_numbers = #tpu.dot_dimension_numbers<[1], [0], [0], [1], [0, 0, 1, 1], [], []>} : vector<8x8xf32>, vector<8x256xf32>, vector<8x256xf32> -> vector<8x256xf32>
    %164 = arith.addf %155, %163 : vector<8x256xf32>
    %c0_102 = arith.constant 0 : index
    %c144_103 = arith.constant 144 : index
    %165 = vector.load %arg5[%c0_102, %c144_103] : memref<8x512xf32, #tpu.memory_space<vmem>>, vector<8x256xf32>
    %c16 = arith.constant 16 : index
    %c0_104 = arith.constant 0 : index
    %c0_105 = arith.constant 0 : index
    %166 = vector.load %arg2[%c16, %c0_104, %c0_105] : memref<54x8x8xf32, #tpu.memory_space<vmem>>, vector<1x8x8xf32>
    %167 = vector.shape_cast %166 : vector<1x8x8xf32> to vector<8x8xf32>
    %cst_106 = arith.constant dense<0.000000e+00> : vector<8x256xf32>
    %168 = tpu.matmul %167, %165, %cst_106 {dimension_numbers = #tpu.dot_dimension_numbers<[1], [0], [0], [1], [0, 0, 1, 1], [], []>} : vector<8x8xf32>, vector<8x256xf32>, vector<8x256xf32> -> vector<8x256xf32>
    %169 = arith.addf %164, %168 : vector<8x256xf32>
    %c0_107 = arith.constant 0 : index
    %c145_108 = arith.constant 145 : index
    %170 = vector.load %arg5[%c0_107, %c145_108] : memref<8x512xf32, #tpu.memory_space<vmem>>, vector<8x256xf32>
    %cst_109 = arith.constant 0.000000e+00 : f32
    %171 = vector.shape_cast %30 : vector<1x256xi1> to vector<1x256xi1>
    %172 = vector.broadcast %171 : vector<1x256xi1> to vector<8x256xi1>
    %173 = vector.broadcast %cst_109 : f32 to vector<8x256xf32>
    %174 = arith.select %172, %170, %173 : vector<8x256xi1>, vector<8x256xf32>
    %c17 = arith.constant 17 : index
    %c0_110 = arith.constant 0 : index
    %c0_111 = arith.constant 0 : index
    %175 = vector.load %arg2[%c17, %c0_110, %c0_111] : memref<54x8x8xf32, #tpu.memory_space<vmem>>, vector<1x8x8xf32>
    %176 = vector.shape_cast %175 : vector<1x8x8xf32> to vector<8x8xf32>
    %cst_112 = arith.constant dense<0.000000e+00> : vector<8x256xf32>
    %177 = tpu.matmul %176, %174, %cst_112 {dimension_numbers = #tpu.dot_dimension_numbers<[1], [0], [0], [1], [0, 0, 1, 1], [], []>} : vector<8x8xf32>, vector<8x256xf32>, vector<8x256xf32> -> vector<8x256xf32>
    %178 = arith.addf %169, %177 : vector<8x256xf32>
    %c1_113 = arith.constant 1 : index
    %c0_114 = arith.constant 0 : index
    %c0_115 = arith.constant 0 : index
    %179 = vector.load %arg3[%c1_113, %c0_114, %c0_115] : memref<6x8x1xf32, #tpu.memory_space<vmem>>, vector<1x8x1xf32>
    %180 = vector.shape_cast %179 : vector<1x8x1xf32> to vector<8x1xf32>
    %181 = vector.broadcast %180 : vector<8x1xf32> to vector<8x256xf32>
    %182 = arith.addf %178, %181 : vector<8x256xf32>
    %cst_116 = arith.constant 0.000000e+00 : f32
    %183 = vector.broadcast %cst_116 : f32 to vector<8x256xf32>
    %184 = arith.maximumf %182, %183 : vector<8x256xf32>
    %c0_117 = arith.constant 0 : index
    %c128_118 = arith.constant 128 : index
    %185 = vector.load %arg5[%c0_117, %c128_118] : memref<8x512xf32, #tpu.memory_space<vmem>>, vector<8x256xf32>
    tpu.vector_store %arg5[%c0_117, %c128_118], %184 {strides = array<i32>} : memref<8x512xf32, #tpu.memory_space<vmem>>, vector<8x256xf32>,
    %cst_119 = arith.constant 0.000000e+00 : f32
    %186 = vector.broadcast %cst_119 : f32 to vector<8x256xf32>
    %c0_120 = arith.constant 0 : index
    %c111_121 = arith.constant 111 : index
    %187 = vector.load %arg5[%c0_120, %c111_121] : memref<8x512xf32, #tpu.memory_space<vmem>>, vector<8x256xf32>
    %cst_122 = arith.constant 0.000000e+00 : f32
    %188 = vector.shape_cast %25 : vector<1x256xi1> to vector<1x256xi1>
    %189 = vector.broadcast %188 : vector<1x256xi1> to vector<8x256xi1>
    %190 = vector.broadcast %cst_122 : f32 to vector<8x256xf32>
    %191 = arith.select %189, %187, %190 : vector<8x256xi1>, vector<8x256xf32>
    %c18 = arith.constant 18 : index
    %c0_123 = arith.constant 0 : index
    %c0_124 = arith.constant 0 : index
    %192 = vector.load %arg2[%c18, %c0_123, %c0_124] : memref<54x8x8xf32, #tpu.memory_space<vmem>>, vector<1x8x8xf32>
    %193 = vector.shape_cast %192 : vector<1x8x8xf32> to vector<8x8xf32>
    %cst_125 = arith.constant dense<0.000000e+00> : vector<8x256xf32>
    %194 = tpu.matmul %193, %191, %cst_125 {dimension_numbers = #tpu.dot_dimension_numbers<[1], [0], [0], [1], [0, 0, 1, 1], [], []>} : vector<8x8xf32>, vector<8x256xf32>, vector<8x256xf32> -> vector<8x256xf32>
    %195 = arith.addf %186, %194 : vector<8x256xf32>
    %c0_126 = arith.constant 0 : index
    %c112_127 = arith.constant 112 : index
    %196 = vector.load %arg5[%c0_126, %c112_127] : memref<8x512xf32, #tpu.memory_space<vmem>>, vector<8x256xf32>
    %c19 = arith.constant 19 : index
    %c0_128 = arith.constant 0 : index
    %c0_129 = arith.constant 0 : index
    %197 = vector.load %arg2[%c19, %c0_128, %c0_129] : memref<54x8x8xf32, #tpu.memory_space<vmem>>, vector<1x8x8xf32>
    %198 = vector.shape_cast %197 : vector<1x8x8xf32> to vector<8x8xf32>
    %cst_130 = arith.constant dense<0.000000e+00> : vector<8x256xf32>
    %199 = tpu.matmul %198, %196, %cst_130 {dimension_numbers = #tpu.dot_dimension_numbers<[1], [0], [0], [1], [0, 0, 1, 1], [], []>} : vector<8x8xf32>, vector<8x256xf32>, vector<8x256xf32> -> vector<8x256xf32>
    %200 = arith.addf %195, %199 : vector<8x256xf32>
    %c0_131 = arith.constant 0 : index
    %c113_132 = arith.constant 113 : index
    %201 = vector.load %arg5[%c0_131, %c113_132] : memref<8x512xf32, #tpu.memory_space<vmem>>, vector<8x256xf32>
    %cst_133 = arith.constant 0.000000e+00 : f32
    %202 = vector.shape_cast %30 : vector<1x256xi1> to vector<1x256xi1>
    %203 = vector.broadcast %202 : vector<1x256xi1> to vector<8x256xi1>
    %204 = vector.broadcast %cst_133 : f32 to vector<8x256xf32>
    %205 = arith.select %203, %201, %204 : vector<8x256xi1>, vector<8x256xf32>
    %c20 = arith.constant 20 : index
    %c0_134 = arith.constant 0 : index
    %c0_135 = arith.constant 0 : index
    %206 = vector.load %arg2[%c20, %c0_134, %c0_135] : memref<54x8x8xf32, #tpu.memory_space<vmem>>, vector<1x8x8xf32>
    %207 = vector.shape_cast %206 : vector<1x8x8xf32> to vector<8x8xf32>
    %cst_136 = arith.constant dense<0.000000e+00> : vector<8x256xf32>
    %208 = tpu.matmul %207, %205, %cst_136 {dimension_numbers = #tpu.dot_dimension_numbers<[1], [0], [0], [1], [0, 0, 1, 1], [], []>} : vector<8x8xf32>, vector<8x256xf32>, vector<8x256xf32> -> vector<8x256xf32>
    %209 = arith.addf %200, %208 : vector<8x256xf32>
    %c0_137 = arith.constant 0 : index
    %c127_138 = arith.constant 127 : index
    %210 = vector.load %arg5[%c0_137, %c127_138] : memref<8x512xf32, #tpu.memory_space<vmem>>, vector<8x256xf32>
    %cst_139 = arith.constant 0.000000e+00 : f32
    %211 = vector.shape_cast %25 : vector<1x256xi1> to vector<1x256xi1>
    %212 = vector.broadcast %211 : vector<1x256xi1> to vector<8x256xi1>
    %213 = vector.broadcast %cst_139 : f32 to vector<8x256xf32>
    %214 = arith.select %212, %210, %213 : vector<8x256xi1>, vector<8x256xf32>
    %c21 = arith.constant 21 : index
    %c0_140 = arith.constant 0 : index
    %c0_141 = arith.constant 0 : index
    %215 = vector.load %arg2[%c21, %c0_140, %c0_141] : memref<54x8x8xf32, #tpu.memory_space<vmem>>, vector<1x8x8xf32>
    %216 = vector.shape_cast %215 : vector<1x8x8xf32> to vector<8x8xf32>
    %cst_142 = arith.constant dense<0.000000e+00> : vector<8x256xf32>
    %217 = tpu.matmul %216, %214, %cst_142 {dimension_numbers = #tpu.dot_dimension_numbers<[1], [0], [0], [1], [0, 0, 1, 1], [], []>} : vector<8x8xf32>, vector<8x256xf32>, vector<8x256xf32> -> vector<8x256xf32>
    %218 = arith.addf %209, %217 : vector<8x256xf32>
    %c0_143 = arith.constant 0 : index
    %c128_144 = arith.constant 128 : index
    %219 = vector.load %arg5[%c0_143, %c128_144] : memref<8x512xf32, #tpu.memory_space<vmem>>, vector<8x256xf32>
    %c22 = arith.constant 22 : index
    %c0_145 = arith.constant 0 : index
    %c0_146 = arith.constant 0 : index
    %220 = vector.load %arg2[%c22, %c0_145, %c0_146] : memref<54x8x8xf32, #tpu.memory_space<vmem>>, vector<1x8x8xf32>
    %221 = vector.shape_cast %220 : vector<1x8x8xf32> to vector<8x8xf32>
    %cst_147 = arith.constant dense<0.000000e+00> : vector<8x256xf32>
    %222 = tpu.matmul %221, %219, %cst_147 {dimension_numbers = #tpu.dot_dimension_numbers<[1], [0], [0], [1], [0, 0, 1, 1], [], []>} : vector<8x8xf32>, vector<8x256xf32>, vector<8x256xf32> -> vector<8x256xf32>
    %223 = arith.addf %218, %222 : vector<8x256xf32>
    %c0_148 = arith.constant 0 : index
    %c129_149 = arith.constant 129 : index
    %224 = vector.load %arg5[%c0_148, %c129_149] : memref<8x512xf32, #tpu.memory_space<vmem>>, vector<8x256xf32>
    %cst_150 = arith.constant 0.000000e+00 : f32
    %225 = vector.shape_cast %30 : vector<1x256xi1> to vector<1x256xi1>
    %226 = vector.broadcast %225 : vector<1x256xi1> to vector<8x256xi1>
    %227 = vector.broadcast %cst_150 : f32 to vector<8x256xf32>
    %228 = arith.select %226, %224, %227 : vector<8x256xi1>, vector<8x256xf32>
    %c23 = arith.constant 23 : index
    %c0_151 = arith.constant 0 : index
    %c0_152 = arith.constant 0 : index
    %229 = vector.load %arg2[%c23, %c0_151, %c0_152] : memref<54x8x8xf32, #tpu.memory_space<vmem>>, vector<1x8x8xf32>
    %230 = vector.shape_cast %229 : vector<1x8x8xf32> to vector<8x8xf32>
    %cst_153 = arith.constant dense<0.000000e+00> : vector<8x256xf32>
    %231 = tpu.matmul %230, %228, %cst_153 {dimension_numbers = #tpu.dot_dimension_numbers<[1], [0], [0], [1], [0, 0, 1, 1], [], []>} : vector<8x8xf32>, vector<8x256xf32>, vector<8x256xf32> -> vector<8x256xf32>
    %232 = arith.addf %223, %231 : vector<8x256xf32>
    %c0_154 = arith.constant 0 : index
    %c143_155 = arith.constant 143 : index
    %233 = vector.load %arg5[%c0_154, %c143_155] : memref<8x512xf32, #tpu.memory_space<vmem>>, vector<8x256xf32>
    %cst_156 = arith.constant 0.000000e+00 : f32
    %234 = vector.shape_cast %25 : vector<1x256xi1> to vector<1x256xi1>
    %235 = vector.broadcast %234 : vector<1x256xi1> to vector<8x256xi1>
    %236 = vector.broadcast %cst_156 : f32 to vector<8x256xf32>
    %237 = arith.select %235, %233, %236 : vector<8x256xi1>, vector<8x256xf32>
    %c24 = arith.constant 24 : index
    %c0_157 = arith.constant 0 : index
    %c0_158 = arith.constant 0 : index
    %238 = vector.load %arg2[%c24, %c0_157, %c0_158] : memref<54x8x8xf32, #tpu.memory_space<vmem>>, vector<1x8x8xf32>
    %239 = vector.shape_cast %238 : vector<1x8x8xf32> to vector<8x8xf32>
    %cst_159 = arith.constant dense<0.000000e+00> : vector<8x256xf32>
    %240 = tpu.matmul %239, %237, %cst_159 {dimension_numbers = #tpu.dot_dimension_numbers<[1], [0], [0], [1], [0, 0, 1, 1], [], []>} : vector<8x8xf32>, vector<8x256xf32>, vector<8x256xf32> -> vector<8x256xf32>
    %241 = arith.addf %232, %240 : vector<8x256xf32>
    %c0_160 = arith.constant 0 : index
    %c144_161 = arith.constant 144 : index
    %242 = vector.load %arg5[%c0_160, %c144_161] : memref<8x512xf32, #tpu.memory_space<vmem>>, vector<8x256xf32>
    %c25 = arith.constant 25 : index
    %c0_162 = arith.constant 0 : index
    %c0_163 = arith.constant 0 : index
    %243 = vector.load %arg2[%c25, %c0_162, %c0_163] : memref<54x8x8xf32, #tpu.memory_space<vmem>>, vector<1x8x8xf32>
    %244 = vector.shape_cast %243 : vector<1x8x8xf32> to vector<8x8xf32>
    %cst_164 = arith.constant dense<0.000000e+00> : vector<8x256xf32>
    %245 = tpu.matmul %244, %242, %cst_164 {dimension_numbers = #tpu.dot_dimension_numbers<[1], [0], [0], [1], [0, 0, 1, 1], [], []>} : vector<8x8xf32>, vector<8x256xf32>, vector<8x256xf32> -> vector<8x256xf32>
    %246 = arith.addf %241, %245 : vector<8x256xf32>
    %c0_165 = arith.constant 0 : index
    %c145_166 = arith.constant 145 : index
    %247 = vector.load %arg5[%c0_165, %c145_166] : memref<8x512xf32, #tpu.memory_space<vmem>>, vector<8x256xf32>
    %cst_167 = arith.constant 0.000000e+00 : f32
    %248 = vector.shape_cast %30 : vector<1x256xi1> to vector<1x256xi1>
    %249 = vector.broadcast %248 : vector<1x256xi1> to vector<8x256xi1>
    %250 = vector.broadcast %cst_167 : f32 to vector<8x256xf32>
    %251 = arith.select %249, %247, %250 : vector<8x256xi1>, vector<8x256xf32>
    %c26 = arith.constant 26 : index
    %c0_168 = arith.constant 0 : index
    %c0_169 = arith.constant 0 : index
    %252 = vector.load %arg2[%c26, %c0_168, %c0_169] : memref<54x8x8xf32, #tpu.memory_space<vmem>>, vector<1x8x8xf32>
    %253 = vector.shape_cast %252 : vector<1x8x8xf32> to vector<8x8xf32>
    %cst_170 = arith.constant dense<0.000000e+00> : vector<8x256xf32>
    %254 = tpu.matmul %253, %251, %cst_170 {dimension_numbers = #tpu.dot_dimension_numbers<[1], [0], [0], [1], [0, 0, 1, 1], [], []>} : vector<8x8xf32>, vector<8x256xf32>, vector<8x256xf32> -> vector<8x256xf32>
    %255 = arith.addf %246, %254 : vector<8x256xf32>
    %c2_171 = arith.constant 2 : index
    %c0_172 = arith.constant 0 : index
    %c0_173 = arith.constant 0 : index
    %256 = vector.load %arg3[%c2_171, %c0_172, %c0_173] : memref<6x8x1xf32, #tpu.memory_space<vmem>>, vector<1x8x1xf32>
    %257 = vector.shape_cast %256 : vector<1x8x1xf32> to vector<8x1xf32>
    %258 = vector.broadcast %257 : vector<8x1xf32> to vector<8x256xf32>
    %259 = arith.addf %255, %258 : vector<8x256xf32>
    %260 = arith.addf %259, %105 : vector<8x256xf32>
    %cst_174 = arith.constant 0.000000e+00 : f32
    %261 = vector.broadcast %cst_174 : f32 to vector<8x256xf32>
    %262 = arith.maximumf %260, %261 : vector<8x256xf32>
    %c0_175 = arith.constant 0 : index
    %c128_176 = arith.constant 128 : index
    %263 = vector.load %arg5[%c0_175, %c128_176] : memref<8x512xf32, #tpu.memory_space<vmem>>, vector<8x256xf32>
    tpu.vector_store %arg5[%c0_175, %c128_176], %262 {strides = array<i32>} : memref<8x512xf32, #tpu.memory_space<vmem>>, vector<8x256xf32>,
    %cst_177 = arith.constant 0.000000e+00 : f32
    %264 = vector.broadcast %cst_177 : f32 to vector<8x256xf32>
    %c0_178 = arith.constant 0 : index
    %c111_179 = arith.constant 111 : index
    %265 = vector.load %arg5[%c0_178, %c111_179] : memref<8x512xf32, #tpu.memory_space<vmem>>, vector<8x256xf32>
    %cst_180 = arith.constant 0.000000e+00 : f32
    %266 = vector.shape_cast %25 : vector<1x256xi1> to vector<1x256xi1>
    %267 = vector.broadcast %266 : vector<1x256xi1> to vector<8x256xi1>
    %268 = vector.broadcast %cst_180 : f32 to vector<8x256xf32>
    %269 = arith.select %267, %265, %268 : vector<8x256xi1>, vector<8x256xf32>
    %c27 = arith.constant 27 : index
    %c0_181 = arith.constant 0 : index
    %c0_182 = arith.constant 0 : index
    %270 = vector.load %arg2[%c27, %c0_181, %c0_182] : memref<54x8x8xf32, #tpu.memory_space<vmem>>, vector<1x8x8xf32>
    %271 = vector.shape_cast %270 : vector<1x8x8xf32> to vector<8x8xf32>
    %cst_183 = arith.constant dense<0.000000e+00> : vector<8x256xf32>
    %272 = tpu.matmul %271, %269, %cst_183 {dimension_numbers = #tpu.dot_dimension_numbers<[1], [0], [0], [1], [0, 0, 1, 1], [], []>} : vector<8x8xf32>, vector<8x256xf32>, vector<8x256xf32> -> vector<8x256xf32>
    %273 = arith.addf %264, %272 : vector<8x256xf32>
    %c0_184 = arith.constant 0 : index
    %c112_185 = arith.constant 112 : index
    %274 = vector.load %arg5[%c0_184, %c112_185] : memref<8x512xf32, #tpu.memory_space<vmem>>, vector<8x256xf32>
    %c28 = arith.constant 28 : index
    %c0_186 = arith.constant 0 : index
    %c0_187 = arith.constant 0 : index
    %275 = vector.load %arg2[%c28, %c0_186, %c0_187] : memref<54x8x8xf32, #tpu.memory_space<vmem>>, vector<1x8x8xf32>
    %276 = vector.shape_cast %275 : vector<1x8x8xf32> to vector<8x8xf32>
    %cst_188 = arith.constant dense<0.000000e+00> : vector<8x256xf32>
    %277 = tpu.matmul %276, %274, %cst_188 {dimension_numbers = #tpu.dot_dimension_numbers<[1], [0], [0], [1], [0, 0, 1, 1], [], []>} : vector<8x8xf32>, vector<8x256xf32>, vector<8x256xf32> -> vector<8x256xf32>
    %278 = arith.addf %273, %277 : vector<8x256xf32>
    %c0_189 = arith.constant 0 : index
    %c113_190 = arith.constant 113 : index
    %279 = vector.load %arg5[%c0_189, %c113_190] : memref<8x512xf32, #tpu.memory_space<vmem>>, vector<8x256xf32>
    %cst_191 = arith.constant 0.000000e+00 : f32
    %280 = vector.shape_cast %30 : vector<1x256xi1> to vector<1x256xi1>
    %281 = vector.broadcast %280 : vector<1x256xi1> to vector<8x256xi1>
    %282 = vector.broadcast %cst_191 : f32 to vector<8x256xf32>
    %283 = arith.select %281, %279, %282 : vector<8x256xi1>, vector<8x256xf32>
    %c29 = arith.constant 29 : index
    %c0_192 = arith.constant 0 : index
    %c0_193 = arith.constant 0 : index
    %284 = vector.load %arg2[%c29, %c0_192, %c0_193] : memref<54x8x8xf32, #tpu.memory_space<vmem>>, vector<1x8x8xf32>
    %285 = vector.shape_cast %284 : vector<1x8x8xf32> to vector<8x8xf32>
    %cst_194 = arith.constant dense<0.000000e+00> : vector<8x256xf32>
    %286 = tpu.matmul %285, %283, %cst_194 {dimension_numbers = #tpu.dot_dimension_numbers<[1], [0], [0], [1], [0, 0, 1, 1], [], []>} : vector<8x8xf32>, vector<8x256xf32>, vector<8x256xf32> -> vector<8x256xf32>
    %287 = arith.addf %278, %286 : vector<8x256xf32>
    %c0_195 = arith.constant 0 : index
    %c127_196 = arith.constant 127 : index
    %288 = vector.load %arg5[%c0_195, %c127_196] : memref<8x512xf32, #tpu.memory_space<vmem>>, vector<8x256xf32>
    %cst_197 = arith.constant 0.000000e+00 : f32
    %289 = vector.shape_cast %25 : vector<1x256xi1> to vector<1x256xi1>
    %290 = vector.broadcast %289 : vector<1x256xi1> to vector<8x256xi1>
    %291 = vector.broadcast %cst_197 : f32 to vector<8x256xf32>
    %292 = arith.select %290, %288, %291 : vector<8x256xi1>, vector<8x256xf32>
    %c30 = arith.constant 30 : index
    %c0_198 = arith.constant 0 : index
    %c0_199 = arith.constant 0 : index
    %293 = vector.load %arg2[%c30, %c0_198, %c0_199] : memref<54x8x8xf32, #tpu.memory_space<vmem>>, vector<1x8x8xf32>
    %294 = vector.shape_cast %293 : vector<1x8x8xf32> to vector<8x8xf32>
    %cst_200 = arith.constant dense<0.000000e+00> : vector<8x256xf32>
    %295 = tpu.matmul %294, %292, %cst_200 {dimension_numbers = #tpu.dot_dimension_numbers<[1], [0], [0], [1], [0, 0, 1, 1], [], []>} : vector<8x8xf32>, vector<8x256xf32>, vector<8x256xf32> -> vector<8x256xf32>
    %296 = arith.addf %287, %295 : vector<8x256xf32>
    %c0_201 = arith.constant 0 : index
    %c128_202 = arith.constant 128 : index
    %297 = vector.load %arg5[%c0_201, %c128_202] : memref<8x512xf32, #tpu.memory_space<vmem>>, vector<8x256xf32>
    %c31 = arith.constant 31 : index
    %c0_203 = arith.constant 0 : index
    %c0_204 = arith.constant 0 : index
    %298 = vector.load %arg2[%c31, %c0_203, %c0_204] : memref<54x8x8xf32, #tpu.memory_space<vmem>>, vector<1x8x8xf32>
    %299 = vector.shape_cast %298 : vector<1x8x8xf32> to vector<8x8xf32>
    %cst_205 = arith.constant dense<0.000000e+00> : vector<8x256xf32>
    %300 = tpu.matmul %299, %297, %cst_205 {dimension_numbers = #tpu.dot_dimension_numbers<[1], [0], [0], [1], [0, 0, 1, 1], [], []>} : vector<8x8xf32>, vector<8x256xf32>, vector<8x256xf32> -> vector<8x256xf32>
    %301 = arith.addf %296, %300 : vector<8x256xf32>
    %c0_206 = arith.constant 0 : index
    %c129_207 = arith.constant 129 : index
    %302 = vector.load %arg5[%c0_206, %c129_207] : memref<8x512xf32, #tpu.memory_space<vmem>>, vector<8x256xf32>
    %cst_208 = arith.constant 0.000000e+00 : f32
    %303 = vector.shape_cast %30 : vector<1x256xi1> to vector<1x256xi1>
    %304 = vector.broadcast %303 : vector<1x256xi1> to vector<8x256xi1>
    %305 = vector.broadcast %cst_208 : f32 to vector<8x256xf32>
    %306 = arith.select %304, %302, %305 : vector<8x256xi1>, vector<8x256xf32>
    %c32 = arith.constant 32 : index
    %c0_209 = arith.constant 0 : index
    %c0_210 = arith.constant 0 : index
    %307 = vector.load %arg2[%c32, %c0_209, %c0_210] : memref<54x8x8xf32, #tpu.memory_space<vmem>>, vector<1x8x8xf32>
    %308 = vector.shape_cast %307 : vector<1x8x8xf32> to vector<8x8xf32>
    %cst_211 = arith.constant dense<0.000000e+00> : vector<8x256xf32>
    %309 = tpu.matmul %308, %306, %cst_211 {dimension_numbers = #tpu.dot_dimension_numbers<[1], [0], [0], [1], [0, 0, 1, 1], [], []>} : vector<8x8xf32>, vector<8x256xf32>, vector<8x256xf32> -> vector<8x256xf32>
    %310 = arith.addf %301, %309 : vector<8x256xf32>
    %c0_212 = arith.constant 0 : index
    %c143_213 = arith.constant 143 : index
    %311 = vector.load %arg5[%c0_212, %c143_213] : memref<8x512xf32, #tpu.memory_space<vmem>>, vector<8x256xf32>
    %cst_214 = arith.constant 0.000000e+00 : f32
    %312 = vector.shape_cast %25 : vector<1x256xi1> to vector<1x256xi1>
    %313 = vector.broadcast %312 : vector<1x256xi1> to vector<8x256xi1>
    %314 = vector.broadcast %cst_214 : f32 to vector<8x256xf32>
    %315 = arith.select %313, %311, %314 : vector<8x256xi1>, vector<8x256xf32>
    %c33 = arith.constant 33 : index
    %c0_215 = arith.constant 0 : index
    %c0_216 = arith.constant 0 : index
    %316 = vector.load %arg2[%c33, %c0_215, %c0_216] : memref<54x8x8xf32, #tpu.memory_space<vmem>>, vector<1x8x8xf32>
    %317 = vector.shape_cast %316 : vector<1x8x8xf32> to vector<8x8xf32>
    %cst_217 = arith.constant dense<0.000000e+00> : vector<8x256xf32>
    %318 = tpu.matmul %317, %315, %cst_217 {dimension_numbers = #tpu.dot_dimension_numbers<[1], [0], [0], [1], [0, 0, 1, 1], [], []>} : vector<8x8xf32>, vector<8x256xf32>, vector<8x256xf32> -> vector<8x256xf32>
    %319 = arith.addf %310, %318 : vector<8x256xf32>
    %c0_218 = arith.constant 0 : index
    %c144_219 = arith.constant 144 : index
    %320 = vector.load %arg5[%c0_218, %c144_219] : memref<8x512xf32, #tpu.memory_space<vmem>>, vector<8x256xf32>
    %c34 = arith.constant 34 : index
    %c0_220 = arith.constant 0 : index
    %c0_221 = arith.constant 0 : index
    %321 = vector.load %arg2[%c34, %c0_220, %c0_221] : memref<54x8x8xf32, #tpu.memory_space<vmem>>, vector<1x8x8xf32>
    %322 = vector.shape_cast %321 : vector<1x8x8xf32> to vector<8x8xf32>
    %cst_222 = arith.constant dense<0.000000e+00> : vector<8x256xf32>
    %323 = tpu.matmul %322, %320, %cst_222 {dimension_numbers = #tpu.dot_dimension_numbers<[1], [0], [0], [1], [0, 0, 1, 1], [], []>} : vector<8x8xf32>, vector<8x256xf32>, vector<8x256xf32> -> vector<8x256xf32>
    %324 = arith.addf %319, %323 : vector<8x256xf32>
    %c0_223 = arith.constant 0 : index
    %c145_224 = arith.constant 145 : index
    %325 = vector.load %arg5[%c0_223, %c145_224] : memref<8x512xf32, #tpu.memory_space<vmem>>, vector<8x256xf32>
    %cst_225 = arith.constant 0.000000e+00 : f32
    %326 = vector.shape_cast %30 : vector<1x256xi1> to vector<1x256xi1>
    %327 = vector.broadcast %326 : vector<1x256xi1> to vector<8x256xi1>
    %328 = vector.broadcast %cst_225 : f32 to vector<8x256xf32>
    %329 = arith.select %327, %325, %328 : vector<8x256xi1>, vector<8x256xf32>
    %c35 = arith.constant 35 : index
    %c0_226 = arith.constant 0 : index
    %c0_227 = arith.constant 0 : index
    %330 = vector.load %arg2[%c35, %c0_226, %c0_227] : memref<54x8x8xf32, #tpu.memory_space<vmem>>, vector<1x8x8xf32>
    %331 = vector.shape_cast %330 : vector<1x8x8xf32> to vector<8x8xf32>
    %cst_228 = arith.constant dense<0.000000e+00> : vector<8x256xf32>
    %332 = tpu.matmul %331, %329, %cst_228 {dimension_numbers = #tpu.dot_dimension_numbers<[1], [0], [0], [1], [0, 0, 1, 1], [], []>} : vector<8x8xf32>, vector<8x256xf32>, vector<8x256xf32> -> vector<8x256xf32>
    %333 = arith.addf %324, %332 : vector<8x256xf32>
    %c3_229 = arith.constant 3 : index
    %c0_230 = arith.constant 0 : index
    %c0_231 = arith.constant 0 : index
    %334 = vector.load %arg3[%c3_229, %c0_230, %c0_231] : memref<6x8x1xf32, #tpu.memory_space<vmem>>, vector<1x8x1xf32>
    %335 = vector.shape_cast %334 : vector<1x8x1xf32> to vector<8x1xf32>
    %336 = vector.broadcast %335 : vector<8x1xf32> to vector<8x256xf32>
    %337 = arith.addf %333, %336 : vector<8x256xf32>
    %cst_232 = arith.constant 0.000000e+00 : f32
    %338 = vector.broadcast %cst_232 : f32 to vector<8x256xf32>
    %339 = arith.maximumf %337, %338 : vector<8x256xf32>
    %c0_233 = arith.constant 0 : index
    %c128_234 = arith.constant 128 : index
    %340 = vector.load %arg5[%c0_233, %c128_234] : memref<8x512xf32, #tpu.memory_space<vmem>>, vector<8x256xf32>
    tpu.vector_store %arg5[%c0_233, %c128_234], %339 {strides = array<i32>} : memref<8x512xf32, #tpu.memory_space<vmem>>, vector<8x256xf32>,
    %cst_235 = arith.constant 0.000000e+00 : f32
    %341 = vector.broadcast %cst_235 : f32 to vector<8x256xf32>
    %c0_236 = arith.constant 0 : index
    %c111_237 = arith.constant 111 : index
    %342 = vector.load %arg5[%c0_236, %c111_237] : memref<8x512xf32, #tpu.memory_space<vmem>>, vector<8x256xf32>
    %cst_238 = arith.constant 0.000000e+00 : f32
    %343 = vector.shape_cast %25 : vector<1x256xi1> to vector<1x256xi1>
    %344 = vector.broadcast %343 : vector<1x256xi1> to vector<8x256xi1>
    %345 = vector.broadcast %cst_238 : f32 to vector<8x256xf32>
    %346 = arith.select %344, %342, %345 : vector<8x256xi1>, vector<8x256xf32>
    %c36 = arith.constant 36 : index
    %c0_239 = arith.constant 0 : index
    %c0_240 = arith.constant 0 : index
    %347 = vector.load %arg2[%c36, %c0_239, %c0_240] : memref<54x8x8xf32, #tpu.memory_space<vmem>>, vector<1x8x8xf32>
    %348 = vector.shape_cast %347 : vector<1x8x8xf32> to vector<8x8xf32>
    %cst_241 = arith.constant dense<0.000000e+00> : vector<8x256xf32>
    %349 = tpu.matmul %348, %346, %cst_241 {dimension_numbers = #tpu.dot_dimension_numbers<[1], [0], [0], [1], [0, 0, 1, 1], [], []>} : vector<8x8xf32>, vector<8x256xf32>, vector<8x256xf32> -> vector<8x256xf32>
    %350 = arith.addf %341, %349 : vector<8x256xf32>
    %c0_242 = arith.constant 0 : index
    %c112_243 = arith.constant 112 : index
    %351 = vector.load %arg5[%c0_242, %c112_243] : memref<8x512xf32, #tpu.memory_space<vmem>>, vector<8x256xf32>
    %c37 = arith.constant 37 : index
    %c0_244 = arith.constant 0 : index
    %c0_245 = arith.constant 0 : index
    %352 = vector.load %arg2[%c37, %c0_244, %c0_245] : memref<54x8x8xf32, #tpu.memory_space<vmem>>, vector<1x8x8xf32>
    %353 = vector.shape_cast %352 : vector<1x8x8xf32> to vector<8x8xf32>
    %cst_246 = arith.constant dense<0.000000e+00> : vector<8x256xf32>
    %354 = tpu.matmul %353, %351, %cst_246 {dimension_numbers = #tpu.dot_dimension_numbers<[1], [0], [0], [1], [0, 0, 1, 1], [], []>} : vector<8x8xf32>, vector<8x256xf32>, vector<8x256xf32> -> vector<8x256xf32>
    %355 = arith.addf %350, %354 : vector<8x256xf32>
    %c0_247 = arith.constant 0 : index
    %c113_248 = arith.constant 113 : index
    %356 = vector.load %arg5[%c0_247, %c113_248] : memref<8x512xf32, #tpu.memory_space<vmem>>, vector<8x256xf32>
    %cst_249 = arith.constant 0.000000e+00 : f32
    %357 = vector.shape_cast %30 : vector<1x256xi1> to vector<1x256xi1>
    %358 = vector.broadcast %357 : vector<1x256xi1> to vector<8x256xi1>
    %359 = vector.broadcast %cst_249 : f32 to vector<8x256xf32>
    %360 = arith.select %358, %356, %359 : vector<8x256xi1>, vector<8x256xf32>
    %c38 = arith.constant 38 : index
    %c0_250 = arith.constant 0 : index
    %c0_251 = arith.constant 0 : index
    %361 = vector.load %arg2[%c38, %c0_250, %c0_251] : memref<54x8x8xf32, #tpu.memory_space<vmem>>, vector<1x8x8xf32>
    %362 = vector.shape_cast %361 : vector<1x8x8xf32> to vector<8x8xf32>
    %cst_252 = arith.constant dense<0.000000e+00> : vector<8x256xf32>
    %363 = tpu.matmul %362, %360, %cst_252 {dimension_numbers = #tpu.dot_dimension_numbers<[1], [0], [0], [1], [0, 0, 1, 1], [], []>} : vector<8x8xf32>, vector<8x256xf32>, vector<8x256xf32> -> vector<8x256xf32>
    %364 = arith.addf %355, %363 : vector<8x256xf32>
    %c0_253 = arith.constant 0 : index
    %c127_254 = arith.constant 127 : index
    %365 = vector.load %arg5[%c0_253, %c127_254] : memref<8x512xf32, #tpu.memory_space<vmem>>, vector<8x256xf32>
    %cst_255 = arith.constant 0.000000e+00 : f32
    %366 = vector.shape_cast %25 : vector<1x256xi1> to vector<1x256xi1>
    %367 = vector.broadcast %366 : vector<1x256xi1> to vector<8x256xi1>
    %368 = vector.broadcast %cst_255 : f32 to vector<8x256xf32>
    %369 = arith.select %367, %365, %368 : vector<8x256xi1>, vector<8x256xf32>
    %c39 = arith.constant 39 : index
    %c0_256 = arith.constant 0 : index
    %c0_257 = arith.constant 0 : index
    %370 = vector.load %arg2[%c39, %c0_256, %c0_257] : memref<54x8x8xf32, #tpu.memory_space<vmem>>, vector<1x8x8xf32>
    %371 = vector.shape_cast %370 : vector<1x8x8xf32> to vector<8x8xf32>
    %cst_258 = arith.constant dense<0.000000e+00> : vector<8x256xf32>
    %372 = tpu.matmul %371, %369, %cst_258 {dimension_numbers = #tpu.dot_dimension_numbers<[1], [0], [0], [1], [0, 0, 1, 1], [], []>} : vector<8x8xf32>, vector<8x256xf32>, vector<8x256xf32> -> vector<8x256xf32>
    %373 = arith.addf %364, %372 : vector<8x256xf32>
    %c0_259 = arith.constant 0 : index
    %c128_260 = arith.constant 128 : index
    %374 = vector.load %arg5[%c0_259, %c128_260] : memref<8x512xf32, #tpu.memory_space<vmem>>, vector<8x256xf32>
    %c40 = arith.constant 40 : index
    %c0_261 = arith.constant 0 : index
    %c0_262 = arith.constant 0 : index
    %375 = vector.load %arg2[%c40, %c0_261, %c0_262] : memref<54x8x8xf32, #tpu.memory_space<vmem>>, vector<1x8x8xf32>
    %376 = vector.shape_cast %375 : vector<1x8x8xf32> to vector<8x8xf32>
    %cst_263 = arith.constant dense<0.000000e+00> : vector<8x256xf32>
    %377 = tpu.matmul %376, %374, %cst_263 {dimension_numbers = #tpu.dot_dimension_numbers<[1], [0], [0], [1], [0, 0, 1, 1], [], []>} : vector<8x8xf32>, vector<8x256xf32>, vector<8x256xf32> -> vector<8x256xf32>
    %378 = arith.addf %373, %377 : vector<8x256xf32>
    %c0_264 = arith.constant 0 : index
    %c129_265 = arith.constant 129 : index
    %379 = vector.load %arg5[%c0_264, %c129_265] : memref<8x512xf32, #tpu.memory_space<vmem>>, vector<8x256xf32>
    %cst_266 = arith.constant 0.000000e+00 : f32
    %380 = vector.shape_cast %30 : vector<1x256xi1> to vector<1x256xi1>
    %381 = vector.broadcast %380 : vector<1x256xi1> to vector<8x256xi1>
    %382 = vector.broadcast %cst_266 : f32 to vector<8x256xf32>
    %383 = arith.select %381, %379, %382 : vector<8x256xi1>, vector<8x256xf32>
    %c41 = arith.constant 41 : index
    %c0_267 = arith.constant 0 : index
    %c0_268 = arith.constant 0 : index
    %384 = vector.load %arg2[%c41, %c0_267, %c0_268] : memref<54x8x8xf32, #tpu.memory_space<vmem>>, vector<1x8x8xf32>
    %385 = vector.shape_cast %384 : vector<1x8x8xf32> to vector<8x8xf32>
    %cst_269 = arith.constant dense<0.000000e+00> : vector<8x256xf32>
    %386 = tpu.matmul %385, %383, %cst_269 {dimension_numbers = #tpu.dot_dimension_numbers<[1], [0], [0], [1], [0, 0, 1, 1], [], []>} : vector<8x8xf32>, vector<8x256xf32>, vector<8x256xf32> -> vector<8x256xf32>
    %387 = arith.addf %378, %386 : vector<8x256xf32>
    %c0_270 = arith.constant 0 : index
    %c143_271 = arith.constant 143 : index
    %388 = vector.load %arg5[%c0_270, %c143_271] : memref<8x512xf32, #tpu.memory_space<vmem>>, vector<8x256xf32>
    %cst_272 = arith.constant 0.000000e+00 : f32
    %389 = vector.shape_cast %25 : vector<1x256xi1> to vector<1x256xi1>
    %390 = vector.broadcast %389 : vector<1x256xi1> to vector<8x256xi1>
    %391 = vector.broadcast %cst_272 : f32 to vector<8x256xf32>
    %392 = arith.select %390, %388, %391 : vector<8x256xi1>, vector<8x256xf32>
    %c42 = arith.constant 42 : index
    %c0_273 = arith.constant 0 : index
    %c0_274 = arith.constant 0 : index
    %393 = vector.load %arg2[%c42, %c0_273, %c0_274] : memref<54x8x8xf32, #tpu.memory_space<vmem>>, vector<1x8x8xf32>
    %394 = vector.shape_cast %393 : vector<1x8x8xf32> to vector<8x8xf32>
    %cst_275 = arith.constant dense<0.000000e+00> : vector<8x256xf32>
    %395 = tpu.matmul %394, %392, %cst_275 {dimension_numbers = #tpu.dot_dimension_numbers<[1], [0], [0], [1], [0, 0, 1, 1], [], []>} : vector<8x8xf32>, vector<8x256xf32>, vector<8x256xf32> -> vector<8x256xf32>
    %396 = arith.addf %387, %395 : vector<8x256xf32>
    %c0_276 = arith.constant 0 : index
    %c144_277 = arith.constant 144 : index
    %397 = vector.load %arg5[%c0_276, %c144_277] : memref<8x512xf32, #tpu.memory_space<vmem>>, vector<8x256xf32>
    %c43 = arith.constant 43 : index
    %c0_278 = arith.constant 0 : index
    %c0_279 = arith.constant 0 : index
    %398 = vector.load %arg2[%c43, %c0_278, %c0_279] : memref<54x8x8xf32, #tpu.memory_space<vmem>>, vector<1x8x8xf32>
    %399 = vector.shape_cast %398 : vector<1x8x8xf32> to vector<8x8xf32>
    %cst_280 = arith.constant dense<0.000000e+00> : vector<8x256xf32>
    %400 = tpu.matmul %399, %397, %cst_280 {dimension_numbers = #tpu.dot_dimension_numbers<[1], [0], [0], [1], [0, 0, 1, 1], [], []>} : vector<8x8xf32>, vector<8x256xf32>, vector<8x256xf32> -> vector<8x256xf32>
    %401 = arith.addf %396, %400 : vector<8x256xf32>
    %c0_281 = arith.constant 0 : index
    %c145_282 = arith.constant 145 : index
    %402 = vector.load %arg5[%c0_281, %c145_282] : memref<8x512xf32, #tpu.memory_space<vmem>>, vector<8x256xf32>
    %cst_283 = arith.constant 0.000000e+00 : f32
    %403 = vector.shape_cast %30 : vector<1x256xi1> to vector<1x256xi1>
    %404 = vector.broadcast %403 : vector<1x256xi1> to vector<8x256xi1>
    %405 = vector.broadcast %cst_283 : f32 to vector<8x256xf32>
    %406 = arith.select %404, %402, %405 : vector<8x256xi1>, vector<8x256xf32>
    %c44 = arith.constant 44 : index
    %c0_284 = arith.constant 0 : index
    %c0_285 = arith.constant 0 : index
    %407 = vector.load %arg2[%c44, %c0_284, %c0_285] : memref<54x8x8xf32, #tpu.memory_space<vmem>>, vector<1x8x8xf32>
    %408 = vector.shape_cast %407 : vector<1x8x8xf32> to vector<8x8xf32>
    %cst_286 = arith.constant dense<0.000000e+00> : vector<8x256xf32>
    %409 = tpu.matmul %408, %406, %cst_286 {dimension_numbers = #tpu.dot_dimension_numbers<[1], [0], [0], [1], [0, 0, 1, 1], [], []>} : vector<8x8xf32>, vector<8x256xf32>, vector<8x256xf32> -> vector<8x256xf32>
    %410 = arith.addf %401, %409 : vector<8x256xf32>
    %c4_287 = arith.constant 4 : index
    %c0_288 = arith.constant 0 : index
    %c0_289 = arith.constant 0 : index
    %411 = vector.load %arg3[%c4_287, %c0_288, %c0_289] : memref<6x8x1xf32, #tpu.memory_space<vmem>>, vector<1x8x1xf32>
    %412 = vector.shape_cast %411 : vector<1x8x1xf32> to vector<8x1xf32>
    %413 = vector.broadcast %412 : vector<8x1xf32> to vector<8x256xf32>
    %414 = arith.addf %410, %413 : vector<8x256xf32>
    %415 = arith.addf %414, %260 : vector<8x256xf32>
    %cst_290 = arith.constant 0.000000e+00 : f32
    %416 = vector.broadcast %cst_290 : f32 to vector<8x256xf32>
    %417 = arith.maximumf %415, %416 : vector<8x256xf32>
    %c0_291 = arith.constant 0 : index
    %c128_292 = arith.constant 128 : index
    %418 = vector.load %arg5[%c0_291, %c128_292] : memref<8x512xf32, #tpu.memory_space<vmem>>, vector<8x256xf32>
    tpu.vector_store %arg5[%c0_291, %c128_292], %417 {strides = array<i32>} : memref<8x512xf32, #tpu.memory_space<vmem>>, vector<8x256xf32>,
    %cst_293 = arith.constant 0.000000e+00 : f32
    %419 = vector.broadcast %cst_293 : f32 to vector<8x256xf32>
    %c0_294 = arith.constant 0 : index
    %c111_295 = arith.constant 111 : index
    %420 = vector.load %arg5[%c0_294, %c111_295] : memref<8x512xf32, #tpu.memory_space<vmem>>, vector<8x256xf32>
    %cst_296 = arith.constant 0.000000e+00 : f32
    %421 = vector.shape_cast %25 : vector<1x256xi1> to vector<1x256xi1>
    %422 = vector.broadcast %421 : vector<1x256xi1> to vector<8x256xi1>
    %423 = vector.broadcast %cst_296 : f32 to vector<8x256xf32>
    %424 = arith.select %422, %420, %423 : vector<8x256xi1>, vector<8x256xf32>
    %c45 = arith.constant 45 : index
    %c0_297 = arith.constant 0 : index
    %c0_298 = arith.constant 0 : index
    %425 = vector.load %arg2[%c45, %c0_297, %c0_298] : memref<54x8x8xf32, #tpu.memory_space<vmem>>, vector<1x8x8xf32>
    %426 = vector.shape_cast %425 : vector<1x8x8xf32> to vector<8x8xf32>
    %cst_299 = arith.constant dense<0.000000e+00> : vector<8x256xf32>
    %427 = tpu.matmul %426, %424, %cst_299 {dimension_numbers = #tpu.dot_dimension_numbers<[1], [0], [0], [1], [0, 0, 1, 1], [], []>} : vector<8x8xf32>, vector<8x256xf32>, vector<8x256xf32> -> vector<8x256xf32>
    %428 = arith.addf %419, %427 : vector<8x256xf32>
    %c0_300 = arith.constant 0 : index
    %c112_301 = arith.constant 112 : index
    %429 = vector.load %arg5[%c0_300, %c112_301] : memref<8x512xf32, #tpu.memory_space<vmem>>, vector<8x256xf32>
    %c46 = arith.constant 46 : index
    %c0_302 = arith.constant 0 : index
    %c0_303 = arith.constant 0 : index
    %430 = vector.load %arg2[%c46, %c0_302, %c0_303] : memref<54x8x8xf32, #tpu.memory_space<vmem>>, vector<1x8x8xf32>
    %431 = vector.shape_cast %430 : vector<1x8x8xf32> to vector<8x8xf32>
    %cst_304 = arith.constant dense<0.000000e+00> : vector<8x256xf32>
    %432 = tpu.matmul %431, %429, %cst_304 {dimension_numbers = #tpu.dot_dimension_numbers<[1], [0], [0], [1], [0, 0, 1, 1], [], []>} : vector<8x8xf32>, vector<8x256xf32>, vector<8x256xf32> -> vector<8x256xf32>
    %433 = arith.addf %428, %432 : vector<8x256xf32>
    %c0_305 = arith.constant 0 : index
    %c113_306 = arith.constant 113 : index
    %434 = vector.load %arg5[%c0_305, %c113_306] : memref<8x512xf32, #tpu.memory_space<vmem>>, vector<8x256xf32>
    %cst_307 = arith.constant 0.000000e+00 : f32
    %435 = vector.shape_cast %30 : vector<1x256xi1> to vector<1x256xi1>
    %436 = vector.broadcast %435 : vector<1x256xi1> to vector<8x256xi1>
    %437 = vector.broadcast %cst_307 : f32 to vector<8x256xf32>
    %438 = arith.select %436, %434, %437 : vector<8x256xi1>, vector<8x256xf32>
    %c47 = arith.constant 47 : index
    %c0_308 = arith.constant 0 : index
    %c0_309 = arith.constant 0 : index
    %439 = vector.load %arg2[%c47, %c0_308, %c0_309] : memref<54x8x8xf32, #tpu.memory_space<vmem>>, vector<1x8x8xf32>
    %440 = vector.shape_cast %439 : vector<1x8x8xf32> to vector<8x8xf32>
    %cst_310 = arith.constant dense<0.000000e+00> : vector<8x256xf32>
    %441 = tpu.matmul %440, %438, %cst_310 {dimension_numbers = #tpu.dot_dimension_numbers<[1], [0], [0], [1], [0, 0, 1, 1], [], []>} : vector<8x8xf32>, vector<8x256xf32>, vector<8x256xf32> -> vector<8x256xf32>
    %442 = arith.addf %433, %441 : vector<8x256xf32>
    %c0_311 = arith.constant 0 : index
    %c127_312 = arith.constant 127 : index
    %443 = vector.load %arg5[%c0_311, %c127_312] : memref<8x512xf32, #tpu.memory_space<vmem>>, vector<8x256xf32>
    %cst_313 = arith.constant 0.000000e+00 : f32
    %444 = vector.shape_cast %25 : vector<1x256xi1> to vector<1x256xi1>
    %445 = vector.broadcast %444 : vector<1x256xi1> to vector<8x256xi1>
    %446 = vector.broadcast %cst_313 : f32 to vector<8x256xf32>
    %447 = arith.select %445, %443, %446 : vector<8x256xi1>, vector<8x256xf32>
    %c48 = arith.constant 48 : index
    %c0_314 = arith.constant 0 : index
    %c0_315 = arith.constant 0 : index
    %448 = vector.load %arg2[%c48, %c0_314, %c0_315] : memref<54x8x8xf32, #tpu.memory_space<vmem>>, vector<1x8x8xf32>
    %449 = vector.shape_cast %448 : vector<1x8x8xf32> to vector<8x8xf32>
    %cst_316 = arith.constant dense<0.000000e+00> : vector<8x256xf32>
    %450 = tpu.matmul %449, %447, %cst_316 {dimension_numbers = #tpu.dot_dimension_numbers<[1], [0], [0], [1], [0, 0, 1, 1], [], []>} : vector<8x8xf32>, vector<8x256xf32>, vector<8x256xf32> -> vector<8x256xf32>
    %451 = arith.addf %442, %450 : vector<8x256xf32>
    %c0_317 = arith.constant 0 : index
    %c128_318 = arith.constant 128 : index
    %452 = vector.load %arg5[%c0_317, %c128_318] : memref<8x512xf32, #tpu.memory_space<vmem>>, vector<8x256xf32>
    %c49 = arith.constant 49 : index
    %c0_319 = arith.constant 0 : index
    %c0_320 = arith.constant 0 : index
    %453 = vector.load %arg2[%c49, %c0_319, %c0_320] : memref<54x8x8xf32, #tpu.memory_space<vmem>>, vector<1x8x8xf32>
    %454 = vector.shape_cast %453 : vector<1x8x8xf32> to vector<8x8xf32>
    %cst_321 = arith.constant dense<0.000000e+00> : vector<8x256xf32>
    %455 = tpu.matmul %454, %452, %cst_321 {dimension_numbers = #tpu.dot_dimension_numbers<[1], [0], [0], [1], [0, 0, 1, 1], [], []>} : vector<8x8xf32>, vector<8x256xf32>, vector<8x256xf32> -> vector<8x256xf32>
    %456 = arith.addf %451, %455 : vector<8x256xf32>
    %c0_322 = arith.constant 0 : index
    %c129_323 = arith.constant 129 : index
    %457 = vector.load %arg5[%c0_322, %c129_323] : memref<8x512xf32, #tpu.memory_space<vmem>>, vector<8x256xf32>
    %cst_324 = arith.constant 0.000000e+00 : f32
    %458 = vector.shape_cast %30 : vector<1x256xi1> to vector<1x256xi1>
    %459 = vector.broadcast %458 : vector<1x256xi1> to vector<8x256xi1>
    %460 = vector.broadcast %cst_324 : f32 to vector<8x256xf32>
    %461 = arith.select %459, %457, %460 : vector<8x256xi1>, vector<8x256xf32>
    %c50 = arith.constant 50 : index
    %c0_325 = arith.constant 0 : index
    %c0_326 = arith.constant 0 : index
    %462 = vector.load %arg2[%c50, %c0_325, %c0_326] : memref<54x8x8xf32, #tpu.memory_space<vmem>>, vector<1x8x8xf32>
    %463 = vector.shape_cast %462 : vector<1x8x8xf32> to vector<8x8xf32>
    %cst_327 = arith.constant dense<0.000000e+00> : vector<8x256xf32>
    %464 = tpu.matmul %463, %461, %cst_327 {dimension_numbers = #tpu.dot_dimension_numbers<[1], [0], [0], [1], [0, 0, 1, 1], [], []>} : vector<8x8xf32>, vector<8x256xf32>, vector<8x256xf32> -> vector<8x256xf32>
    %465 = arith.addf %456, %464 : vector<8x256xf32>
    %c0_328 = arith.constant 0 : index
    %c143_329 = arith.constant 143 : index
    %466 = vector.load %arg5[%c0_328, %c143_329] : memref<8x512xf32, #tpu.memory_space<vmem>>, vector<8x256xf32>
    %cst_330 = arith.constant 0.000000e+00 : f32
    %467 = vector.shape_cast %25 : vector<1x256xi1> to vector<1x256xi1>
    %468 = vector.broadcast %467 : vector<1x256xi1> to vector<8x256xi1>
    %469 = vector.broadcast %cst_330 : f32 to vector<8x256xf32>
    %470 = arith.select %468, %466, %469 : vector<8x256xi1>, vector<8x256xf32>
    %c51 = arith.constant 51 : index
    %c0_331 = arith.constant 0 : index
    %c0_332 = arith.constant 0 : index
    %471 = vector.load %arg2[%c51, %c0_331, %c0_332] : memref<54x8x8xf32, #tpu.memory_space<vmem>>, vector<1x8x8xf32>
    %472 = vector.shape_cast %471 : vector<1x8x8xf32> to vector<8x8xf32>
    %cst_333 = arith.constant dense<0.000000e+00> : vector<8x256xf32>
    %473 = tpu.matmul %472, %470, %cst_333 {dimension_numbers = #tpu.dot_dimension_numbers<[1], [0], [0], [1], [0, 0, 1, 1], [], []>} : vector<8x8xf32>, vector<8x256xf32>, vector<8x256xf32> -> vector<8x256xf32>
    %474 = arith.addf %465, %473 : vector<8x256xf32>
    %c0_334 = arith.constant 0 : index
    %c144_335 = arith.constant 144 : index
    %475 = vector.load %arg5[%c0_334, %c144_335] : memref<8x512xf32, #tpu.memory_space<vmem>>, vector<8x256xf32>
    %c52 = arith.constant 52 : index
    %c0_336 = arith.constant 0 : index
    %c0_337 = arith.constant 0 : index
    %476 = vector.load %arg2[%c52, %c0_336, %c0_337] : memref<54x8x8xf32, #tpu.memory_space<vmem>>, vector<1x8x8xf32>
    %477 = vector.shape_cast %476 : vector<1x8x8xf32> to vector<8x8xf32>
    %cst_338 = arith.constant dense<0.000000e+00> : vector<8x256xf32>
    %478 = tpu.matmul %477, %475, %cst_338 {dimension_numbers = #tpu.dot_dimension_numbers<[1], [0], [0], [1], [0, 0, 1, 1], [], []>} : vector<8x8xf32>, vector<8x256xf32>, vector<8x256xf32> -> vector<8x256xf32>
    %479 = arith.addf %474, %478 : vector<8x256xf32>
    %c0_339 = arith.constant 0 : index
    %c145_340 = arith.constant 145 : index
    %480 = vector.load %arg5[%c0_339, %c145_340] : memref<8x512xf32, #tpu.memory_space<vmem>>, vector<8x256xf32>
    %cst_341 = arith.constant 0.000000e+00 : f32
    %481 = vector.shape_cast %30 : vector<1x256xi1> to vector<1x256xi1>
    %482 = vector.broadcast %481 : vector<1x256xi1> to vector<8x256xi1>
    %483 = vector.broadcast %cst_341 : f32 to vector<8x256xf32>
    %484 = arith.select %482, %480, %483 : vector<8x256xi1>, vector<8x256xf32>
    %c53 = arith.constant 53 : index
    %c0_342 = arith.constant 0 : index
    %c0_343 = arith.constant 0 : index
    %485 = vector.load %arg2[%c53, %c0_342, %c0_343] : memref<54x8x8xf32, #tpu.memory_space<vmem>>, vector<1x8x8xf32>
    %486 = vector.shape_cast %485 : vector<1x8x8xf32> to vector<8x8xf32>
    %cst_344 = arith.constant dense<0.000000e+00> : vector<8x256xf32>
    %487 = tpu.matmul %486, %484, %cst_344 {dimension_numbers = #tpu.dot_dimension_numbers<[1], [0], [0], [1], [0, 0, 1, 1], [], []>} : vector<8x8xf32>, vector<8x256xf32>, vector<8x256xf32> -> vector<8x256xf32>
    %488 = arith.addf %479, %487 : vector<8x256xf32>
    %c5_345 = arith.constant 5 : index
    %c0_346 = arith.constant 0 : index
    %c0_347 = arith.constant 0 : index
    %489 = vector.load %arg3[%c5_345, %c0_346, %c0_347] : memref<6x8x1xf32, #tpu.memory_space<vmem>>, vector<1x8x1xf32>
    %490 = vector.shape_cast %489 : vector<1x8x1xf32> to vector<8x1xf32>
    %491 = vector.broadcast %490 : vector<8x1xf32> to vector<8x256xf32>
    %492 = arith.addf %488, %491 : vector<8x256xf32>
    %493 = arith.addf %492, %3 : vector<8x256xf32>
    %c0_348 = arith.constant 0 : index
    %c0_349 = arith.constant 0 : index
    %c0_350 = arith.constant 0 : index
    %494 = vector.load %arg4[%c0_348, %c0_349, %c0_350] : memref<1x8x256xf32, #tpu.memory_space<vmem>>, vector<1x8x256xf32>
    %495 = vector.shape_cast %494 : vector<1x8x256xf32> to vector<8x256xf32>
    %496 = vector.shape_cast %493 : vector<8x256xf32> to vector<1x8x256xf32>
    tpu.vector_store %arg4[%c0_348, %c0_349, %c0_350], %496 {strides = array<i32>} : memref<1x8x256xf32, #tpu.memory_space<vmem>>, vector<1x8x256xf32>,
    return
  }
  func.func @transform_0(%arg0: i32) -> (i32, i32, i32) {
    %c0_i32 = arith.constant 0 : i32
    %c0_i32_0 = arith.constant 0 : i32
    %c0_i32_1 = arith.constant 0 : i32
    return %arg0, %c0_i32, %c0_i32_0 : i32, i32, i32
  }
  func.func @transform_1(%arg0: i32) -> (i32, i32, i32) {
    %c0_i32 = arith.constant 0 : i32
    %c0_i32_0 = arith.constant 0 : i32
    %c0_i32_1 = arith.constant 0 : i32
    %c0_i32_2 = arith.constant 0 : i32
    return %c0_i32, %c0_i32_0, %c0_i32_1 : i32, i32, i32
  }
  func.func @transform_2(%arg0: i32) -> (i32, i32, i32) {
    %c0_i32 = arith.constant 0 : i32
    %c0_i32_0 = arith.constant 0 : i32
    %c0_i32_1 = arith.constant 0 : i32
    %c0_i32_2 = arith.constant 0 : i32
    return %c0_i32, %c0_i32_0, %c0_i32_1 : i32, i32, i32
  }
  func.func @transform_3(%arg0: i32) -> (i32, i32, i32) {
    %c0_i32 = arith.constant 0 : i32
    %c0_i32_0 = arith.constant 0 : i32
    %c0_i32_1 = arith.constant 0 : i32
    return %arg0, %c0_i32, %c0_i32_0 : i32, i32, i32
  }
}

</mosaic_0001>

<bundles_post_ra>
// kernel: custom-call
= control target key start
LH: loop header
LB: loop body
LE: loop exit
PB: predicated region body
PF: predicated region fallthrough
CT: control target
= control target key end

     0   :  { %2 = vsyncpa [#allocation0], 0  ;;  %s55_s0 = inlined_call_operand.hbm [shape: c64[2,2,16,16], index: 0, kind: input, shape index: {}]   ;;  %s56_s1 = inlined_call_operand.vmem [shape: f32[2,2,16,16], index: 1, kind: output, shape index: {}]  }
   0x1   :  { %s4_s8 = sshll.u32 %s55_s0, 4  ;;  %s6_s11 = sshll.u32 %s56_s1, 4  ;;  %s5_s8 = int_to_ptr.hbm [resolvable:$true] %s4_s8  ;;  %s7_s11 = int_to_ptr.vmem [resolvable:$true] %s6_s11 }
   0x2   :  { %9 = dma.hbm_to_vmem [thread:$0]  %s5_s8, 1024, %s7_s11, [#allocation0] }
   0x3   :  { %37 = dma.done.wait [#allocation0], 1024  }
   0x4   :  { %38 = vsyncadd [#allocation0], 4294966272 }
   0x5   :  { %12 = vsyncpa [#allocation0], 1 }

// kernel: custom-call.1
= control target key start
LH: loop header
LB: loop body
LE: loop exit
PB: predicated region body
PF: predicated region fallthrough
CT: control target
= control target key end

     0   :  { %s56_s0 = inlined_call_operand.hbm [shape: c64[2,2,16,16], index: 0, kind: input, shape index: {}]   ;;  %s57_s1 = inlined_call_operand.vmem [shape: f32[2,2,16,16], index: 1, kind: output, shape index: {}]  }
   0x1   :  { %s2_s8 = scalar_lea.hbm %s56_s0, 64 }
   0x2   :  { %3 = vsyncpa [#allocation0], 0  ;;  %s5_s9 = sshll.u32 %s2_s8, 4  ;;  %s7_s12 = sshll.u32 %s57_s1, 4  ;;  %s6_s9 = int_to_ptr.hbm [resolvable:$true] %s5_s9  ;;  %s8_s12 = int_to_ptr.vmem [resolvable:$true] %s7_s12 }
   0x3   :  { %10 = dma.hbm_to_vmem [thread:$0]  %s6_s9, 1024, %s8_s12, [#allocation0] }
   0x4   :  { %38 = dma.done.wait [#allocation0], 1024  }
   0x5   :  { %39 = vsyncadd [#allocation0], 4294966272 }
   0x6   :  { %13 = vsyncpa [#allocation0], 1 }

// kernel: custom-call.2
= control target key start
LH: loop header
LB: loop body
LE: loop exit
PB: predicated region body
PF: predicated region fallthrough
CT: control target
= control target key end

     0   :  { %s105_s0 = inlined_call_operand.vmem [shape: f32[2,2,16,16], index: 0, kind: input, shape index: {}]   ;;  %s106_s1 = inlined_call_operand.vmem [shape: f32[2,2,16,16], index: 1, kind: input, shape index: {}]   ;;  %s107_s2 = inlined_call_operand.hbm [shape: c64[2,2,16,16], index: 2, kind: output, shape index: {}]  }
   0x1   :  { %s3_s11 = scalar_lea.hbm %s107_s2, 64 }
   0x2   :  { %4 = vsyncpa [#allocation0], 0  ;;  %s6_s14 = sshll.u32 %s105_s0, 4  ;;  %s8_s17 = sshll.u32 %s107_s2, 4  ;;  %s7_s14 = int_to_ptr.vmem [resolvable:$true] %s6_s14  ;;  %s9_s17 = int_to_ptr.hbm [resolvable:$true] %s8_s17 }
   0x3   :  { %11 = dma.vmem_to_hbm [thread:$0]  %s7_s14, 1024, %s9_s17, [#allocation0] }
   0x4   :  { %74 = dma.done.wait [#allocation0], 1024  }
   0x5   :  { %75 = vsyncadd [#allocation0], 4294966272 }
   0x6   :  { %14 = vsyncpa [#allocation0], 1 }
   0x7   :  { %15 = vsyncpa [#allocation1], 0  ;;  %s17_s20 = sshll.u32 %s106_s1, 4  ;;  %s19_s21 = sshll.u32 %s3_s11, 4  ;;  %s18_s20 = int_to_ptr.vmem [resolvable:$true] %s17_s20  ;;  %s20_s21 = int_to_ptr.hbm [resolvable:$true] %s19_s21 }
   0x8   :  { %22 = dma.vmem_to_hbm [thread:$0]  %s18_s20, 1024, %s20_s21, [#allocation1] }
   0x9   :  { %76 = dma.done.wait [#allocation1], 1024  }
   0xa   :  { %77 = vsyncadd [#allocation1], 4294966272 }
   0xb   :  { %25 = vsyncpa [#allocation1], 1 }

// kernel: resnet_forward.1
= control target key start
LH: loop header
LB: loop body
LE: loop exit
PB: predicated region body
PF: predicated region fallthrough
CT: control target
= control target key end

     0   :  { %s3880_s12 = smov 0   ;;  %s4705_s0 = inlined_call_operand.vmem [shape: f32[2,8,256], index: 0, kind: input, shape index: {}]   ;;  %s4706_s1 = inlined_call_operand.vmem [shape: f32[54,8,8], index: 1, kind: input, shape index: {}]   ;;  %s4707_s2 = inlined_call_operand.vmem [shape: f32[6,8,1], index: 2, kind: input, shape index: {}]   ;;  %s4708_s3 = inlined_call_operand.vmem [shape: f32[2,8,256], index: 3, kind: output, shape index: {}]  }
   0x1 LB: > { %s3508_s13 = sadd.s32 4294967295, %s3848_s12   ;;  %p3512_p0 = scmp.ge.s32.totalorder %s3848_s12, 1  ;;  %s3848_s12 = sphi %s3880_s12, %s13_s12  }
   0x2   : > { %p137_p1 = scmp.lt.s32.totalorder %s3848_s12, 3 }
   0x4   : > { %p138_p2 = pnand %p3512_p0, %p137_p1 }
   0x5   : > { %p161_p3 = scmp.lt.s32.totalorder (!%p138_p2), %s3508_s13, 1  ;;  %s3851_s14 = smov (!%p138_p2), 17  }
   0x6   : > { %141 = sbr.rel (%p138_p2) target bundleno = 1806 (0x70e), region = 32  ;;  %s3852_s19 = smov (!%p138_p2), 16  }
   0x7   : > { %s3853_s20 = smov (!%p138_p2), 15   ;;  %s3854_s21 = smov (!%p138_p2), 1  }
   0x8   : > { %s3855_s22 = smov (!%p138_p2), 127   ;;  %s3856_s23 = smov (!%p138_p2), 113  }
   0x9   : > { %s3857_s24 = smov (!%p138_p2), 112   ;;  %s3858_s25 = smov (!%p138_p2), 111  }
   0xb   : > { %v3850_v0 = vmov 0.0   ;;  %s4718_s13 = smov (!%p161_p3, %s3508_s13), 1  ;;  %v177_v7 = vlaneseq  ;;  %vm234_vm0 = vcmask 138240   ;;  %v241_v19 = vld [vmem:[%s4706_s1] sm:$0xff]  ;;  %vm255_vm3 = vcmask 64512   ;;  %v3517_v27 = vld [vmem:[%s4706_s1 + $0x8] sm:$0xff] }
   0xc   : > { %228 = vrot.lane.b32.xlu0 %v3850_v0, %s3851_s14  ;;  %s3757_s15 = sshll.u32 %s4718_s13, 4  ;;  %vm250_vm4 = vcmask 130048   ;;  %vm352_vm5 = vcmask 121856   ;;  %vm412_vm8 = vcmask 7168   ;;  %v3529_v36 = vld [vmem:[%s4706_s1 + $0x18] sm:$0xff]  ;;  %v3524_v37 = vld [vmem:[%s4706_s1 + $0x10] sm:$0xff] }
   0xd   : > { %s3898_s18 = scalar_lea.vmem %s4705_s0, %s3757_s15  ;;  %v178_v8 = vand.u32 127, %v177_v7  ;;  %v757_v40 = vld [vmem:[%s4707_s2] sm:$0xff]  ;;  %v3859_v41 = vmov 0   ;;  %vm525_vm9 = vcmask 1039360   ;;  %vm647_vm10 = vcmask 916480   ;;  %v3537_v47 = vld [vmem:[%s4706_s1 + $0x28] sm:$0xff]  ;;  %s170_s8 = scalar_lea.vmem %s4708_s3, %s3757_s15 }
   0xe   : > { %v3901_v1 = vld [vmem:[%s3898_s18 + $0x8] sm:$0xff]  ;;  %v3904_v2 = vld [vmem:[%s3898_s18] sm:$0xff]  ;;  %3787 = vset.pattern.permute.xlu1 %v3859_v41  ;;  %3798 = vset.pattern.permute.xlu0 %v3859_v41  ;;  %vm585_vm11 = vcmask 924672   ;;  %v3547_v54 = vld [vmem:[%s4706_s1 + $0x38] sm:$0xff]  ;;  %vm703_vm12 = vcmask 908288  }
   0xf   : > { %232 = vrot.lane.b32.xlu1 %v3901_v1, %s3851_s14  ;;  %248 = vrot.lane.b32.xlu2 %v3901_v1, %s3852_s19  ;;  %v3777_v3 = vpack.i.bf16 %v3904_v2, %v3850_v0  ;;  %v3782_v4 = vpack.i.bf16 %v3901_v1, %v3904_v2  ;;  %v179_v10 = vadd.s32 128, %v178_v8  ;;  %v184_v12 = vand.u32 15, %v178_v8  ;;  %v3534_v49 = vld [vmem:[%s4706_s1 + $0x20] sm:$0xff]  ;;  %v3542_v56 = vld [vmem:[%s4706_s1 + $0x30] sm:$0xff] }
  0x10   : > { %3819 = vset.pattern.permute.xlu2 %v3859_v41  ;;  %v3550_v63 = vld [vmem:[%s4706_s1 + $0x40] sm:$0xff] }
  0x11   : > { %v191_v13 = vand.u32 15, %v179_v10  ;;  %vm3952_vm1 = vcmp.ge.s32.totalorder %v184_v12, 1  ;;  %vm3971_vm6 = vcmp.le.s32.totalorder %v184_v12, 14 }
  0x13   : > { %vm3956_vm2 = vcmp.ge.s32.totalorder %v191_v13, 1  ;;  %vm3985_vm7 = vcmp.le.s32.totalorder %v191_v13, 14 }
  0x14   : > { %230 = vrot.lane.b32.xlu0 %v3904_v2, %s3851_s14 }
  0x17   : > { %3778 = vrot.lane.b32.xlu1 %v3777_v3, %s3852_s19  ;;  %346 = vrot.lane.b32.xlu2 %v3850_v0, %s3853_s20 }
  0x1c   : > { %348 = vrot.lane.b32.xlu0 %v3904_v2, %s3853_s20 }
  0x1f   : > { %350 = vrot.lane.b32.xlu1 %v3901_v1, %s3853_s20  ;;  %406 = vrot.lane.b32.xlu2 %v3850_v0, %s3854_s21 }
  0x24   : > { %408 = vrot.lane.b32.xlu0 %v3904_v2, %s3854_s21 }
  0x27   : > { %410 = vrot.lane.b32.xlu1 %v3901_v1, %s3854_s21  ;;  %519 = vrot.lane.b32.xlu2 %v3904_v2, %s3855_s22 }
  0x2c   : > { %521 = vrot.lane.b32.xlu0 %v3901_v1, %s3855_s22 }
  0x2f   : > { %523 = vrot.lane.b32.xlu1 %v3850_v0, %s3855_s22  ;;  %579 = vrot.lane.b32.xlu2 %v3904_v2, %s3856_s23 }
  0x34   : > { %581 = vrot.lane.b32.xlu0 %v3901_v1, %s3856_s23 }
  0x37   : > { %583 = vrot.lane.b32.xlu1 %v3850_v0, %s3856_s23  ;;  %3783 = vrot.lane.b32.xlu2 %v3782_v4, %s3857_s24 }
  0x3c   : > { %645 = vrot.lane.b32.xlu0 %v3850_v0, %s3857_s24 }
  0x3f   : > { %697 = vrot.lane.b32.xlu1 %v3904_v2, %s3858_s25  ;;  %699 = vrot.lane.b32.xlu2 %v3901_v1, %s3858_s25 }
  0x44   : > { %701 = vrot.lane.b32.xlu0 %v3850_v0, %s3858_s25 }
  0x47   : > { %760 = vperm.xlu1 %3787, %v757_v40  }
  0x4c   : > { %1121 = vrot.lane.b32.xlu0 %v3850_v0, %s3856_s23 }
  0x4f   : > { %887 = vrot.lane.b32.xlu1 %v3850_v0, %s3853_s20 }
  0x57   : > { %775 = vrot.lane.b32.xlu1 %v3850_v0, %s3851_s14 }
  0x5f   : > { %946 = vrot.lane.b32.xlu1 %v3850_v0, %s3854_s21 }
  0x69   : > { %v249_v5 = vpop.permute.xlu2 %248 }
  0x71   : > { %v347_v6 = vpop.permute.xlu2 %346 }
  0x79   : > { %v407_v9 = vpop.permute.xlu2 %406 }
  0x7e   : > { %v229_v11 = vpop.permute.xlu0 %228 }
  0x81   : > { %v233_v14 = vpop.permute.xlu1 %232  ;;  %v520_v15 = vpop.permute.xlu2 %519 }
  0x86   : > { %v231_v18 = vpop.permute.xlu0 %230 }
  0x87   : > { %v235_v20 = vsel %vm234_vm0, %v229_v11, %v231_v18  ;;  %v236_v21 = vsel %vm234_vm0, %v231_v18, %v233_v14 }
  0x88   : > { %3520 = vmatpush.msk.msra.mxu2 %vm3952_vm1, %v235_v20  ;;  %3522 = vmatpush.msk.msra.mxu3 %vm3956_vm2, %v236_v21 }
  0x89   : > { %3521 = vmatmul.msk.f32.vlgmr.msra.gmra.mxu2 %vm255_vm3, %v241_v19  ;;  %3523 = vmatmul.msk.f32.vlgmr.msra.gmra.mxu3 %vm255_vm3, %v241_v19  ;;  %v3779_v22 = vpop.permute.xlu1 %3778  ;;  %v580_v28 = vpop.permute.xlu2 %579 }
  0x8a   : > { %v3781_v23 = vunpack.i.h.bf16 %v3779_v22  ;;  %v3780_v24 = vunpack.i.l.bf16 %v3779_v22 }
  0x8c   : > { %v251_v29 = vsel %vm250_vm4, %v3780_v24, %v3781_v23  ;;  %v252_v30 = vsel %vm250_vm4, %v3781_v23, %v249_v5 }
  0x8d   : > { %274 = vmatpush.msra.mxu0 %v251_v29  ;;  %294 = vmatpush.msra.mxu1 %v252_v30 }
  0x8e   : > { %v349_v25 = vpop.permute.xlu0 %348  ;;  %3519 = vmatmul.msk.f32.vlgmr.msra.gmra.mxu1 %vm255_vm3, %v3517_v27  ;;  %3518 = vmatmul.msk.f32.vlgmr.msra.gmra.mxu0 %vm255_vm3, %v3517_v27 }
  0x8f   : > { %v353_v31 = vsel %vm352_vm5, %v347_v6, %v349_v25 }
  0x90   : > { %3525 = vmatpush.msk.msrb.mxu0 %vm3971_vm6, %v353_v31 }
  0x91   : > { %v351_v33 = vpop.permute.xlu1 %350  ;;  %v3784_v39 = vpop.permute.xlu2 %3783 }
  0x92   : > { %486 = vmatpush.msra.mxu0 %v3904_v2  ;;  %v354_v34 = vsel %vm352_vm5, %v349_v25, %v351_v33  ;;  %v3786_v42 = vunpack.i.h.bf16 %v3784_v39  ;;  %v3785_v43 = vunpack.i.l.bf16 %v3784_v39 }
  0x93   : > { %3527 = vmatpush.msk.msrb.mxu1 %vm3985_vm7, %v354_v34 }
  0x94   : > { %v648_v50 = vsel %vm647_vm10, %v3785_v43, %v3786_v42 }
  0x95   : > { %506 = vmatpush.msra.mxu1 %v3901_v1 }
  0x96   : > { %v409_v35 = vpop.permute.xlu0 %408  ;;  %3528 = vmatmul.msk.f32.vlgmr.msrb.gmra.mxu1 %vm255_vm3, %v3524_v37  ;;  %3526 = vmatmul.msk.f32.vlgmr.msrb.gmra.mxu0 %vm255_vm3, %v3524_v37 }
  0x97   : > { %v413_v38 = vsel %vm412_vm8, %v407_v9, %v409_v35 }
  0x98   : > { %3530 = vmatpush.msk.msrb.mxu2 %vm3952_vm1, %v413_v38 }
  0x99   : > { %3531 = vmatmul.msk.f32.vlgmr.msrb.gmra.mxu2 %vm255_vm3, %v3529_v36  ;;  %v411_v44 = vpop.permute.xlu1 %410  ;;  %v700_v61 = vpop.permute.xlu2 %699 }
  0x9a   : > { %v414_v45 = vsel %vm412_vm8, %v409_v35, %v411_v44 }
  0x9b   : > { %3532 = vmatpush.msk.msrb.mxu3 %vm3956_vm2, %v414_v45 }
  0x9c   : > { %3533 = vmatmul.msk.f32.vlgmr.msrb.gmra.mxu3 %vm255_vm3, %v3529_v36 }
  0x9e   : > { %v522_v46 = vpop.permute.xlu0 %521  ;;  %3536 = vmatmul.msk.f32.vlgmr.msra.gmra.mxu1 %vm255_vm3, %v3534_v49  ;;  %3535 = vmatmul.msk.f32.vlgmr.msra.gmra.mxu0 %vm255_vm3, %v3534_v49 }
  0x9f   : > { %v526_v48 = vsel %vm525_vm9, %v520_v15, %v522_v46 }
  0xa0   : > { %3538 = vmatpush.msk.msra.mxu2 %vm3971_vm6, %v526_v48 }
  0xa1   : > { %3539 = vmatmul.msk.f32.vlgmr.msra.gmra.mxu2 %vm255_vm3, %v3537_v47  ;;  %v524_v51 = vpop.permute.xlu1 %523 }
  0xa2   : > { %670 = vmatpush.msrb.mxu2 %v648_v50  ;;  %v527_v52 = vsel %vm525_vm9, %v522_v46, %v524_v51 }
  0xa3   : > { %3540 = vmatpush.msk.msra.mxu3 %vm3985_vm7, %v527_v52 }
  0xa4   : > { %3541 = vmatmul.msk.f32.vlgmr.msra.gmra.mxu3 %vm255_vm3, %v3537_v47 }
  0xa6   : > { %v582_v53 = vpop.permute.xlu0 %581 }
  0xa7   : > { %v586_v55 = vsel %vm585_vm11, %v580_v28, %v582_v53 }
  0xa8   : > { %3543 = vmatpush.msk.msrb.mxu0 %vm3952_vm1, %v586_v55 }
  0xa9   : > { %3548 = vmatmul.msk.f32.vlgmr.msrb.gmra.mxu2 %vm255_vm3, %v3547_v54  ;;  %3544 = vmatmul.msk.f32.vlgmr.msrb.gmra.mxu0 %vm255_vm3, %v3542_v56  ;;  %v584_v57 = vpop.permute.xlu1 %583 }
  0xaa   : > { %v587_v58 = vsel %vm585_vm11, %v582_v53, %v584_v57 }
  0xab   : > { %3545 = vmatpush.msk.msrb.mxu1 %vm3956_vm2, %v587_v58  ;;  %v3563_v58 = vld [vmem:[%s4706_s1 + $0x58] sm:$0xff] }
  0xac   : > { %3546 = vmatmul.msk.f32.vlgmr.msrb.gmra.mxu1 %vm255_vm3, %v3542_v56 }
  0xae   : > { %v646_v59 = vpop.permute.xlu0 %645 }
  0xaf   : > { %v649_v60 = vsel %vm647_vm10, %v3786_v42, %v646_v59 }
  0xb0   : > { %690 = vmatpush.msrb.mxu3 %v649_v60 }
  0xb1   : > { %3549 = vmatmul.msk.f32.vlgmr.msrb.gmra.mxu3 %vm255_vm3, %v3547_v54  ;;  %v698_v62 = vpop.permute.xlu1 %697  ;;  %v3556_v54 = vld [vmem:[%s4706_s1 + $0x50] sm:$0xff] }
  0xb2   : > { %v704_v1 = vsel %vm703_vm12, %v698_v62, %v700_v61  ;;  %v3555_v62 = vld [vmem:[%s4706_s1 + $0x48] sm:$0xff] }
  0xb3   : > { %3551 = vmatpush.msk.msra.mxu0 %vm3971_vm6, %v704_v1  ;;  %v3573_v1 = vld [vmem:[%s4706_s1 + $0x68] sm:$0xff] }
  0xb4   : > { %3552 = vmatmul.msk.f32.vlgmr.msra.gmra.mxu0 %vm255_vm3, %v3550_v63 }
  0xb6   : > { %v702_v2 = vpop.permute.xlu0 %701 }
  0xb7   : > { %v705_v3 = vsel %vm703_vm12, %v700_v61, %v702_v2 }
  0xb8   : > { %3553 = vmatpush.msk.msra.mxu1 %vm3985_vm7, %v705_v3 }
  0xb9   : > { %3554 = vmatmul.msk.f32.vlgmr.msra.gmra.mxu1 %vm255_vm3, %v3550_v63  ;;  %v761_v36 = vpop.permute.xlu1 %760 }
  0xbe   : > { %v1122_v60 = vpop.permute.xlu0 %1121 }
  0xc1   : > { %v888_v49 = vpop.permute.xlu1 %887 }
  0xc9   : > { %v776_v53 = vpop.permute.xlu1 %775 }
  0xd1   : > { %v947_v59 = vpop.permute.xlu1 %946 }
 0x10b   : > { %v276_v4 = vpop.f32.mrf.mxu0  ;;  %v296_v5 = vpop.f32.mrf.mxu1 }
 0x10c   : > { %v319_v6 = vpop.f32.mrf.mxu2  ;;  %v339_v8 = vpop.f32.mrf.mxu3 }
 0x10d   : > { %v320_v9 = vadd.f32 %v319_v6, %v276_v4  ;;  %v340_v15 = vadd.f32 %v339_v8, %v296_v5  ;;  %v3568_v5 = vld [vmem:[%s4706_s1 + $0x60] sm:$0xff] }
 0x113   : > { %v381_v7 = vpop.f32.mrf.mxu0  ;;  %v401_v10 = vpop.f32.mrf.mxu1 }
 0x114   : > { %v404_v12 = vadd.f32 %v381_v7, %v320_v9  ;;  %v405_v21 = vadd.f32 %v401_v10, %v340_v15 }
 0x11b   : > { %v488_v14 = vpop.f32.mrf.mxu0  ;;  %v508_v19 = vpop.f32.mrf.mxu1 }
 0x11c   : > { %v441_v11 = vpop.f32.mrf.mxu2 }
 0x11d   : > { %v464_v18 = vadd.f32 %v441_v11, %v404_v12  ;;  %v3581_v11 = vld [vmem:[%s4706_s1 + $0x78] sm:$0xff] }
 0x11f   : > { %v461_v13 = vpop.f32.mrf.mxu3  ;;  %v511_v22 = vadd.f32 %v488_v14, %v464_v18  ;;  %v3594_v14 = vld [vmem:[%s4707_s2 + $0x8] sm:$0xff] }
 0x120   : > { %v465_v23 = vadd.f32 %v461_v13, %v405_v21  ;;  %v3576_v21 = vld [vmem:[%s4706_s1 + $0x70] sm:$0xff] }
 0x122   : > { %v512_v28 = vadd.f32 %v508_v19, %v465_v23 }
 0x124   : > { %v554_v20 = vpop.f32.mrf.mxu2 }
 0x125   : > { %v577_v24 = vadd.f32 %v554_v20, %v511_v22 }
 0x126   : > { %v614_v27 = vpop.f32.mrf.mxu0 }
 0x127   : > { %v574_v25 = vpop.f32.mrf.mxu3  ;;  %v637_v31 = vadd.f32 %v614_v27, %v577_v24 }
 0x128   : > { %v578_v30 = vadd.f32 %v574_v25, %v512_v28 }
 0x129   : > { %v634_v29 = vpop.f32.mrf.mxu1 }
 0x12a   : > { %v638_v34 = vadd.f32 %v634_v29, %v578_v30 }
 0x12c   : > { %v672_v33 = vpop.f32.mrf.mxu2 }
 0x12d   : > { %v695_v35 = vadd.f32 %v672_v33, %v637_v31 }
 0x131   : > { %v732_v38 = vpop.f32.mrf.mxu0 }
 0x132   : > { %v755_v40 = vadd.f32 %v732_v38, %v695_v35  ;;  %v3586_v35 = vld [vmem:[%s4706_s1 + $0x80] sm:$0xff] }
 0x134   : > { %v692_v37 = vpop.f32.mrf.mxu3  ;;  %v4064_v42 = vadd.f32 %v761_v36, %v755_v40 }
 0x135   : > { %v696_v39 = vadd.f32 %v692_v37, %v638_v34  ;;  %v3589_v34 = vld [vmem:[%s4706_s1 + $0x88] sm:$0xff] }
 0x136   : > { %v752_v41 = vpop.f32.mrf.mxu1  ;;  %v765_v44 = vmax.f32 %v4064_v42, 0.0 }
 0x137   : > { %v756_v43 = vadd.f32 %v752_v41, %v696_v39 }
 0x138   : > { %1117 = vrot.lane.b32.xlu1 %v765_v44, %s3856_s23  ;;  %v3788_v47 = vpack.i.bf16 %v765_v44, %v3850_v0 }
 0x139   : > { %v4067_v45 = vadd.f32 %v761_v36, %v756_v43 }
 0x13a   : > { %3789 = vrot.lane.b32.xlu2 %v3788_v47, %s3852_s19 }
 0x13b   : > { %v4070_v46 = vmax.f32 %v4067_v45, 0.0 }
 0x13d   : > { %795 = vrot.lane.b32.xlu0 %v4070_v46, %s3852_s19  ;;  %v3793_v48 = vpack.i.bf16 %v4070_v46, %v765_v44 }
 0x140   : > { %1058 = vrot.lane.b32.xlu1 %v765_v44, %s3855_s22 }
 0x142   : > { %889 = vrot.lane.b32.xlu2 %v765_v44, %s3853_s20 }
 0x145   : > { %891 = vrot.lane.b32.xlu0 %v4070_v46, %s3853_s20 }
 0x148   : > { %1233 = vrot.lane.b32.xlu1 %v765_v44, %s3858_s25 }
 0x14a   : > { %777 = vrot.lane.b32.xlu2 %v765_v44, %s3851_s14 }
 0x14d   : > { %779 = vrot.lane.b32.xlu0 %v4070_v46, %s3851_s14 }
 0x150   : > { %3794 = vrot.lane.b32.xlu1 %v3793_v48, %s3857_s24 }
 0x152   : > { %948 = vrot.lane.b32.xlu2 %v765_v44, %s3854_s21 }
 0x155   : > { %950 = vrot.lane.b32.xlu0 %v4070_v46, %s3854_s21 }
 0x158   : > { %1311 = vrot.lane.b32.xlu1 %v3850_v0, %s3851_s14 }
 0x15a   : > { %1119 = vrot.lane.b32.xlu2 %v4070_v46, %s3856_s23 }
 0x15d   : > { %1062 = vrot.lane.b32.xlu0 %v3850_v0, %s3855_s22 }
 0x160   : > { %1423 = vrot.lane.b32.xlu1 %v3850_v0, %s3853_s20 }
 0x162   : > { %1060 = vrot.lane.b32.xlu2 %v4070_v46, %s3855_s22 }
 0x165   : > { %1237 = vrot.lane.b32.xlu0 %v3850_v0, %s3858_s25 }
 0x168   : > { %1482 = vrot.lane.b32.xlu1 %v3850_v0, %s3854_s21 }
 0x16a   : > { %1235 = vrot.lane.b32.xlu2 %v4070_v46, %s3858_s25 }
 0x16d   : > { %1296 = vperm.xlu0 %3798, %v3594_v14  }
 0x172   : > { %1182 = vrot.lane.b32.xlu2 %v3850_v0, %s3857_s24 }
 0x194   : > { %v3790_v50 = vpop.permute.xlu2 %3789 }
 0x195   : > { %v3792_v51 = vunpack.i.h.bf16 %v3790_v50  ;;  %v3791_v52 = vunpack.i.l.bf16 %v3790_v50 }
 0x197   : > { %v797_v55 = vsel %vm250_vm4, %v3791_v52, %v3792_v51 }
 0x198   : > { %819 = vmatpush.msra.mxu2 %v797_v55 }
 0x199   : > { %3557 = vmatmul.msk.f32.vlgmr.msra.gmra.mxu2 %vm255_vm3, %v3556_v54 }
 0x19c   : > { %v890_v56 = vpop.permute.xlu2 %889 }
 0x19d   : > { %v893_v57 = vsel %vm352_vm5, %v888_v49, %v890_v56 }
 0x19e   : > { %3564 = vmatpush.msk.msrb.mxu2 %vm3971_vm6, %v893_v57 }
 0x1a0   : > { %1025 = vmatpush.msra.mxu2 %v765_v44 }
 0x1a1   : > { %3565 = vmatmul.msk.f32.vlgmr.msrb.gmra.mxu2 %vm255_vm3, %v3563_v58 }
 0x1a4   : > { %v778_v61 = vpop.permute.xlu2 %777 }
 0x1a5   : > { %v781_v63 = vsel %vm234_vm0, %v776_v53, %v778_v61 }
 0x1a6   : > { %3559 = vmatpush.msk.msrb.mxu0 %vm3952_vm1, %v781_v63 }
 0x1a7   : > { %3560 = vmatmul.msk.f32.vlgmr.msrb.gmra.mxu0 %vm255_vm3, %v3555_v62 }
 0x1a9   : > { %3574 = vmatmul.msk.f32.vlgmr.msra.gmra.mxu2 %vm255_vm3, %v3573_v1 }
 0x1aa   : > { %v1118_v2 = vpop.permute.xlu1 %1117 }
 0x1ac   : > { %v949_v3 = vpop.permute.xlu2 %948 }
 0x1ad   : > { %v952_v6 = vsel %vm412_vm8, %v947_v59, %v949_v3 }
 0x1ae   : > { %3569 = vmatpush.msk.msra.mxu0 %vm3952_vm1, %v952_v6 }
 0x1af   : > { %v796_v4 = vpop.permute.xlu0 %795  ;;  %3570 = vmatmul.msk.f32.vlgmr.msra.gmra.mxu0 %vm255_vm3, %v3568_v5 }
 0x1b0   : > { %v798_v7 = vsel %vm250_vm4, %v3792_v51, %v796_v4 }
 0x1b1   : > { %839 = vmatpush.msra.mxu3 %v798_v7 }
 0x1b2   : > { %3558 = vmatmul.msk.f32.vlgmr.msra.gmra.mxu3 %vm255_vm3, %v3556_v54  ;;  %v1059_v8 = vpop.permute.xlu1 %1058 }
 0x1b4   : > { %v1120_v9 = vpop.permute.xlu2 %1119 }
 0x1b5   : > { %v1123_v12 = vsel %vm585_vm11, %v1118_v2, %v1120_v9  ;;  %v1124_v15 = vsel %vm585_vm11, %v1120_v9, %v1122_v60 }
 0x1b6   : > { %3582 = vmatpush.msk.msrb.mxu2 %vm3952_vm1, %v1123_v12 }
 0x1b7   : > { %v892_v10 = vpop.permute.xlu0 %891  ;;  %3583 = vmatmul.msk.f32.vlgmr.msrb.gmra.mxu2 %vm255_vm3, %v3581_v11 }
 0x1b8   : > { %v894_v13 = vsel %vm352_vm5, %v890_v56, %v892_v10 }
 0x1b9   : > { %3566 = vmatpush.msk.msrb.mxu3 %vm3985_vm7, %v894_v13 }
 0x1ba   : > { %3567 = vmatmul.msk.f32.vlgmr.msrb.gmra.mxu3 %vm255_vm3, %v3563_v58  ;;  %v1234_v18 = vpop.permute.xlu1 %1233 }
 0x1bb   : > { %1045 = vmatpush.msra.mxu3 %v4070_v46 }
 0x1bc   : > { %v1061_v19 = vpop.permute.xlu2 %1060 }
 0x1bd   : > { %3584 = vmatpush.msk.msrb.mxu3 %vm3956_vm2, %v1124_v15  ;;  %v1064_v22 = vsel %vm525_vm9, %v1059_v8, %v1061_v19 }
 0x1be   : > { %3577 = vmatpush.msk.msrb.mxu0 %vm3971_vm6, %v1064_v22 }
 0x1bf   : > { %v780_v20 = vpop.permute.xlu0 %779  ;;  %3578 = vmatmul.msk.f32.vlgmr.msrb.gmra.mxu0 %vm255_vm3, %v3576_v21 }
 0x1c0   : > { %v782_v23 = vsel %vm234_vm0, %v778_v61, %v780_v20 }
 0x1c1   : > { %3561 = vmatpush.msk.msrb.mxu1 %vm3956_vm2, %v782_v23 }
 0x1c2   : > { %3562 = vmatmul.msk.f32.vlgmr.msrb.gmra.mxu1 %vm255_vm3, %v3555_v62  ;;  %3575 = vmatmul.msk.f32.vlgmr.msra.gmra.mxu3 %vm255_vm3, %v3573_v1  ;;  %v3795_v24 = vpop.permute.xlu1 %3794 }
 0x1c3   : > { %v3797_v25 = vunpack.i.h.bf16 %v3795_v24  ;;  %v3796_v27 = vunpack.i.l.bf16 %v3795_v24  ;;  %v3634_v24 = vld [vmem:[%s4707_s2 + $0x10] sm:$0xff] }
 0x1c4   : > { %v1236_v28 = vpop.permute.xlu2 %1235 }
 0x1c5   : > { %v1239_v30 = vsel %vm703_vm12, %v1234_v18, %v1236_v28  ;;  %v1184_v33 = vsel %vm647_vm10, %v3796_v27, %v3797_v25 }
 0x1c6   : > { %1206 = vmatpush.msra.mxu0 %v1184_v33  ;;  %3590 = vmatpush.msk.msra.mxu2 %vm3971_vm6, %v1239_v30 }
 0x1c7   : > { %v951_v29 = vpop.permute.xlu0 %950  ;;  %3591 = vmatmul.msk.f32.vlgmr.msra.gmra.mxu2 %vm255_vm3, %v3589_v34  ;;  %3587 = vmatmul.msk.f32.vlgmr.msra.gmra.mxu0 %vm255_vm3, %v3586_v35 }
 0x1c8   : > { %v953_v31 = vsel %vm412_vm8, %v949_v3, %v951_v29 }
 0x1c9   : > { %3571 = vmatpush.msk.msra.mxu1 %vm3956_vm2, %v953_v31 }
 0x1ca   : > { %3572 = vmatmul.msk.f32.vlgmr.msra.gmra.mxu1 %vm255_vm3, %v3568_v5  ;;  %3585 = vmatmul.msk.f32.vlgmr.msrb.gmra.mxu3 %vm255_vm3, %v3581_v11 }
 0x1cc   : > { %v1183_v36 = vpop.permute.xlu2 %1182 }
 0x1cd   : > { %v1185_v38 = vsel %vm647_vm10, %v3797_v25, %v1183_v36  ;;  %v1312_v25 = vpop.permute.xlu1 %1311 }
 0x1cf   : > { %v1063_v37 = vpop.permute.xlu0 %1062 }
 0x1d0   : > { %v1065_v39 = vsel %vm525_vm9, %v1061_v19, %v1063_v37 }
 0x1d1   : > { %3579 = vmatpush.msk.msrb.mxu1 %vm3985_vm7, %v1065_v39  ;;  %v3603_v39 = vld [vmem:[%s4706_s1 + $0xa0] sm:$0xff] }
 0x1d2   : > { %3580 = vmatmul.msk.f32.vlgmr.msrb.gmra.mxu1 %vm255_vm3, %v3576_v21 }
 0x1d3   : > { %1226 = vmatpush.msra.mxu1 %v1185_v38 }
 0x1d5   : > { %v1424_v36 = vpop.permute.xlu1 %1423 }
 0x1d7   : > { %v1238_v40 = vpop.permute.xlu0 %1237 }
 0x1d8   : > { %v1240_v41 = vsel %vm703_vm12, %v1236_v28, %v1238_v40  ;;  %v3595_v28 = vld [vmem:[%s4706_s1 + $0x90] sm:$0xff] }
 0x1d9   : > { %3592 = vmatpush.msk.msra.mxu3 %vm3985_vm7, %v1240_v41 }
 0x1da   : > { %3588 = vmatmul.msk.f32.vlgmr.msra.gmra.mxu1 %vm255_vm3, %v3586_v35  ;;  %3593 = vmatmul.msk.f32.vlgmr.msra.gmra.mxu3 %vm255_vm3, %v3589_v34  ;;  %v3596_v34 = vld [vmem:[%s4706_s1 + $0x98] sm:$0xff] }
 0x1dd   : > { %v1483_v40 = vpop.permute.xlu1 %1482 }
 0x1df   : > { %v1297_v4 = vpop.permute.xlu0 %1296 }
 0x21c   : > { %v821_v43 = vpop.f32.mrf.mxu2 }
 0x224   : > { %v864_v44 = vpop.f32.mrf.mxu0  ;;  %v921_v46 = vpop.f32.mrf.mxu2 }
 0x225   : > { %v865_v47 = vadd.f32 %v864_v44, %v821_v43  ;;  %v3608_v43 = vld [vmem:[%s4706_s1 + $0xa8] sm:$0xff] }
 0x227   : > { %v944_v49 = vadd.f32 %v921_v46, %v865_v47  ;;  %v3613_v46 = vld [vmem:[%s4706_s1 + $0xb0] sm:$0xff] }
 0x22c   : > { %v980_v48 = vpop.f32.mrf.mxu0  ;;  %v1027_v51 = vpop.f32.mrf.mxu2 }
 0x22d   : > { %v1003_v52 = vadd.f32 %v980_v48, %v944_v49 }
 0x22f   : > { %v1050_v53 = vadd.f32 %v1027_v51, %v1003_v52 }
 0x235   : > { %v841_v50 = vpop.f32.mrf.mxu3 }
 0x23a   : > { %v1151_v58 = vpop.f32.mrf.mxu2 }
 0x23c   : > { %v1092_v55 = vpop.f32.mrf.mxu0 }
 0x23d   : > { %v941_v56 = vpop.f32.mrf.mxu3  ;;  %v1115_v57 = vadd.f32 %v1092_v55, %v1050_v53  ;;  %v3616_v55 = vld [vmem:[%s4706_s1 + $0xb8] sm:$0xff] }
 0x23f   : > { %v884_v54 = vpop.f32.mrf.mxu1  ;;  %v1174_v59 = vadd.f32 %v1151_v58, %v1115_v57 }
 0x240   : > { %v885_v62 = vadd.f32 %v884_v54, %v841_v50 }
 0x242   : > { %v945_v2 = vadd.f32 %v941_v56, %v885_v62 }
 0x244   : > { %v1208_v61 = vpop.f32.mrf.mxu0 }
 0x245   : > { %v1047_v63 = vpop.f32.mrf.mxu3  ;;  %v1231_v1 = vadd.f32 %v1208_v61, %v1174_v59  ;;  %v3621_v61 = vld [vmem:[%s4706_s1 + $0xc0] sm:$0xff] }
 0x247   : > { %v1000_v60 = vpop.f32.mrf.mxu1 }
 0x248   : > { %v1004_v7 = vadd.f32 %v1000_v60, %v945_v2 }
 0x24a   : > { %v1267_v3 = vpop.f32.mrf.mxu2  ;;  %v1051_v10 = vadd.f32 %v1047_v63, %v1004_v7 }
 0x24b   : > { %v1290_v5 = vadd.f32 %v1267_v3, %v1231_v1 }
 0x24d   : > { %v1299_v8 = vadd.f32 %v1297_v4, %v1290_v5  ;;  %v1171_v11 = vpop.f32.mrf.mxu3 }
 0x24f   : > { %v1112_v6 = vpop.f32.mrf.mxu1  ;;  %v1301_v9 = vmax.f32 %v1299_v8, 0.0 }
 0x250   : > { %v1116_v12 = vadd.f32 %v1112_v6, %v1051_v10  ;;  %v3626_v6 = vld [vmem:[%s4706_s1 + $0xc8] sm:$0xff] }
 0x251   : > { %1313 = vrot.lane.b32.xlu2 %v1301_v9, %s3851_s14  ;;  %v3799_v14 = vpack.i.bf16 %v1301_v9, %v3850_v0 }
 0x252   : > { %v1175_v15 = vadd.f32 %v1171_v11, %v1116_v12 }
 0x257   : > { %v1228_v13 = vpop.f32.mrf.mxu1 }
 0x258   : > { %v1232_v18 = vadd.f32 %v1228_v13, %v1175_v15  ;;  %v3629_v15 = vld [vmem:[%s4706_s1 + $0xd0] sm:$0xff] }
 0x259   : > { %3800 = vrot.lane.b32.xlu2 %v3799_v14, %s3852_s19 }
 0x25d   : > { %v1287_v19 = vpop.f32.mrf.mxu3 }
 0x25e   : > { %v1291_v20 = vadd.f32 %v1287_v19, %v1232_v18 }
 0x260   : > { %v1300_v21 = vadd.f32 %v1297_v4, %v1291_v20 }
 0x261   : > { %1425 = vrot.lane.b32.xlu2 %v1301_v9, %s3853_s20 }
 0x262   : > { %v4200_v22 = vmax.f32 %v1300_v21, 0.0 }
 0x264   : > { %1331 = vrot.lane.b32.xlu0 %v4200_v22, %s3852_s19  ;;  %1315 = vrot.lane.b32.xlu1 %v4200_v22, %s3851_s14  ;;  %v3804_v23 = vpack.i.bf16 %v4200_v22, %v1301_v9 }
 0x269   : > { %1484 = vrot.lane.b32.xlu2 %v1301_v9, %s3854_s21 }
 0x26c   : > { %1427 = vrot.lane.b32.xlu0 %v4200_v22, %s3853_s20  ;;  %1594 = vrot.lane.b32.xlu1 %v1301_v9, %s3855_s22 }
 0x271   : > { %1718 = vrot.lane.b32.xlu2 %v3850_v0, %s3857_s24 }
 0x274   : > { %1486 = vrot.lane.b32.xlu0 %v4200_v22, %s3854_s21  ;;  %1653 = vrot.lane.b32.xlu1 %v1301_v9, %s3856_s23 }
 0x279   : > { %1596 = vrot.lane.b32.xlu2 %v4200_v22, %s3855_s22 }
 0x27c   : > { %1598 = vrot.lane.b32.xlu0 %v3850_v0, %s3855_s22  ;;  %3805 = vrot.lane.b32.xlu1 %v3804_v23, %s3857_s24 }
 0x281   : > { %1655 = vrot.lane.b32.xlu2 %v4200_v22, %s3856_s23 }
 0x284   : > { %1657 = vrot.lane.b32.xlu0 %v3850_v0, %s3856_s23  ;;  %1771 = vrot.lane.b32.xlu1 %v4200_v22, %s3858_s25 }
 0x289   : > { %1773 = vrot.lane.b32.xlu2 %v3850_v0, %s3858_s25 }
 0x28c   : > { %1769 = vrot.lane.b32.xlu0 %v1301_v9, %s3858_s25 }
 0x291   : > { %2195 = vrot.lane.b32.xlu2 %v3850_v0, %s3856_s23 }
 0x294   : > { %1832 = vperm.xlu0 %3798, %v3634_v24  }
 0x29c   : > { %1961 = vrot.lane.b32.xlu0 %v3850_v0, %s3853_s20 }
 0x2a4   : > { %1849 = vrot.lane.b32.xlu0 %v3850_v0, %s3851_s14 }
 0x2ab   : > { %v1314_v27 = vpop.permute.xlu2 %1313 }
 0x2ac   : > { %2020 = vrot.lane.b32.xlu0 %v3850_v0, %s3854_s21  ;;  %v1317_v29 = vsel %vm234_vm0, %v1312_v25, %v1314_v27 }
 0x2ad   : > { %3599 = vmatpush.msk.msrb.mxu2 %vm3952_vm1, %v1317_v29 }
 0x2ae   : > { %3600 = vmatmul.msk.f32.vlgmr.msrb.gmra.mxu2 %vm255_vm3, %v3595_v28 }
 0x2b3   : > { %v3801_v30 = vpop.permute.xlu2 %3800 }
 0x2b4   : > { %v3803_v31 = vunpack.i.h.bf16 %v3801_v30  ;;  %v3802_v33 = vunpack.i.l.bf16 %v3801_v30 }
 0x2b6   : > { %v1333_v35 = vsel %vm250_vm4, %v3802_v33, %v3803_v31 }
 0x2b7   : > { %1355 = vmatpush.msrb.mxu0 %v1333_v35 }
 0x2b8   : > { %3597 = vmatmul.msk.f32.vlgmr.msrb.gmra.mxu0 %vm255_vm3, %v3596_v34 }
 0x2bb   : > { %v1426_v37 = vpop.permute.xlu2 %1425 }
 0x2bc   : > { %v1429_v38 = vsel %vm352_vm5, %v1424_v36, %v1426_v37 }
 0x2bd   : > { %3604 = vmatpush.msk.msra.mxu0 %vm3971_vm6, %v1429_v38 }
 0x2bf   : > { %1561 = vmatpush.msrb.mxu0 %v1301_v9 }
 0x2c0   : > { %3605 = vmatmul.msk.f32.vlgmr.msra.gmra.mxu0 %vm255_vm3, %v3603_v39 }
 0x2c3   : > { %v1485_v41 = vpop.permute.xlu2 %1484 }
 0x2c4   : > { %v1488_v44 = vsel %vm412_vm8, %v1483_v40, %v1485_v41 }
 0x2c5   : > { %3609 = vmatpush.msk.msra.mxu2 %vm3952_vm1, %v1488_v44 }
 0x2c6   : > { %3610 = vmatmul.msk.f32.vlgmr.msra.gmra.mxu2 %vm255_vm3, %v3608_v43 }
 0x2c8   : > { %3614 = vmatmul.msk.f32.vlgmr.msrb.gmra.mxu0 %vm255_vm3, %v3613_v46 }
 0x2cb   : > { %v1719_v47 = vpop.permute.xlu2 %1718 }
 0x2d3   : > { %v1597_v52 = vpop.permute.xlu2 %1596 }
 0x2d6   : > { %v1332_v48 = vpop.permute.xlu0 %1331  ;;  %v1316_v49 = vpop.permute.xlu1 %1315 }
 0x2d7   : > { %v1334_v50 = vsel %vm250_vm4, %v3803_v31, %v1332_v48  ;;  %v1318_v51 = vsel %vm234_vm0, %v1314_v27, %v1316_v49 }
 0x2d8   : > { %1375 = vmatpush.msrb.mxu1 %v1334_v50  ;;  %3601 = vmatpush.msk.msrb.mxu3 %vm3956_vm2, %v1318_v51 }
 0x2d9   : > { %3598 = vmatmul.msk.f32.vlgmr.msrb.gmra.mxu1 %vm255_vm3, %v3596_v34  ;;  %3602 = vmatmul.msk.f32.vlgmr.msrb.gmra.mxu3 %vm255_vm3, %v3595_v28 }
 0x2db   : > { %v1656_v58 = vpop.permute.xlu2 %1655 }
 0x2de   : > { %v1428_v53 = vpop.permute.xlu0 %1427  ;;  %v1595_v54 = vpop.permute.xlu1 %1594 }
 0x2df   : > { %v1430_v56 = vsel %vm352_vm5, %v1426_v37, %v1428_v53  ;;  %v1600_v57 = vsel %vm525_vm9, %v1595_v54, %v1597_v52 }
 0x2e0   : > { %3606 = vmatpush.msk.msra.mxu1 %vm3985_vm7, %v1430_v56  ;;  %3617 = vmatpush.msk.msrb.mxu2 %vm3971_vm6, %v1600_v57 }
 0x2e1   : > { %3618 = vmatmul.msk.f32.vlgmr.msrb.gmra.mxu2 %vm255_vm3, %v3616_v55  ;;  %3607 = vmatmul.msk.f32.vlgmr.msra.gmra.mxu1 %vm255_vm3, %v3603_v39 }
 0x2e2   : > { %1581 = vmatpush.msrb.mxu1 %v4200_v22 }
 0x2e3   : > { %v1774_v9 = vpop.permute.xlu2 %1773 }
 0x2e6   : > { %v1487_v59 = vpop.permute.xlu0 %1486  ;;  %v1654_v60 = vpop.permute.xlu1 %1653 }
 0x2e7   : > { %v1489_v62 = vsel %vm412_vm8, %v1485_v41, %v1487_v59  ;;  %v1659_v63 = vsel %vm585_vm11, %v1654_v60, %v1656_v58 }
 0x2e8   : > { %3611 = vmatpush.msk.msra.mxu3 %vm3956_vm2, %v1489_v62  ;;  %3622 = vmatpush.msk.msra.mxu0 %vm3952_vm1, %v1659_v63 }
 0x2e9   : > { %3612 = vmatmul.msk.f32.vlgmr.msra.gmra.mxu3 %vm255_vm3, %v3608_v43  ;;  %3623 = vmatmul.msk.f32.vlgmr.msra.gmra.mxu0 %vm255_vm3, %v3621_v61 }
 0x2ea   : > { %3615 = vmatmul.msk.f32.vlgmr.msrb.gmra.mxu1 %vm255_vm3, %v3613_v46 }
 0x2ee   : > { %v1599_v1 = vpop.permute.xlu0 %1598  ;;  %v3806_v2 = vpop.permute.xlu1 %3805 }
 0x2ef   : > { %v1601_v3 = vsel %vm525_vm9, %v1597_v52, %v1599_v1  ;;  %v3808_v4 = vunpack.i.h.bf16 %v3806_v2  ;;  %v3807_v5 = vunpack.i.l.bf16 %v3806_v2  ;;  %v2196_v2 = vpop.permute.xlu2 %2195 }
 0x2f0   : > { %3619 = vmatpush.msk.msrb.mxu3 %vm3985_vm7, %v1601_v3 }
 0x2f1   : > { %3620 = vmatmul.msk.f32.vlgmr.msrb.gmra.mxu3 %vm255_vm3, %v3616_v55  ;;  %v1720_v7 = vsel %vm647_vm10, %v3807_v5, %v3808_v4  ;;  %v1721_v8 = vsel %vm647_vm10, %v3808_v4, %v1719_v47 }
 0x2f2   : > { %1742 = vmatpush.msra.mxu2 %v1720_v7  ;;  %1762 = vmatpush.msra.mxu3 %v1721_v8 }
 0x2f3   : > { %3627 = vmatmul.msk.f32.vlgmr.msra.gmra.mxu2 %vm255_vm3, %v3626_v6 }
 0x2f6   : > { %v1658_v10 = vpop.permute.xlu0 %1657  ;;  %v1772_v11 = vpop.permute.xlu1 %1771 }
 0x2f7   : > { %v1660_v12 = vsel %vm585_vm11, %v1656_v58, %v1658_v10  ;;  %v1776_v13 = vsel %vm703_vm12, %v1772_v11, %v1774_v9  ;;  %v3636_v9 = vld [vmem:[%s4706_s1 + $0xe0] sm:$0xff] }
 0x2f8   : > { %3624 = vmatpush.msk.msra.mxu1 %vm3956_vm2, %v1660_v12 }
 0x2f9   : > { %3625 = vmatmul.msk.f32.vlgmr.msra.gmra.mxu1 %vm255_vm3, %v3621_v61  ;;  %3628 = vmatmul.msk.f32.vlgmr.msra.gmra.mxu3 %vm255_vm3, %v3626_v6 }
 0x2fa   : > { %3632 = vmatpush.msk.msrb.mxu1 %vm3985_vm7, %v1776_v13 }
 0x2fe   : > { %v1770_v14 = vpop.permute.xlu0 %1769 }
 0x2ff   : > { %v1775_v18 = vsel %vm703_vm12, %v1770_v14, %v1772_v11 }
 0x300   : > { %3630 = vmatpush.msk.msrb.mxu0 %vm3971_vm6, %v1775_v18 }
 0x301   : > { %3631 = vmatmul.msk.f32.vlgmr.msrb.gmra.mxu0 %vm255_vm3, %v3629_v15  ;;  %3633 = vmatmul.msk.f32.vlgmr.msrb.gmra.mxu1 %vm255_vm3, %v3629_v15 }
 0x306   : > { %v1833_v57 = vpop.permute.xlu0 %1832 }
 0x331   : > { %v1400_v21 = vpop.f32.mrf.mxu2 }
 0x335   : > { %v1357_v19 = vpop.f32.mrf.mxu0 }
 0x336   : > { %v1401_v27 = vadd.f32 %v1400_v21, %v1357_v19  ;;  %v3643_v19 = vld [vmem:[%s4706_s1 + $0xe8] sm:$0xff] }
 0x33d   : > { %v1457_v22 = vpop.f32.mrf.mxu0 }
 0x33e   : > { %v1480_v30 = vadd.f32 %v1457_v22, %v1401_v27  ;;  %v3653_v27 = vld [vmem:[%s4706_s1 + $0xf8] sm:$0xff] }
 0x345   : > { %v1563_v31 = vpop.f32.mrf.mxu0 }
 0x349   : > { %v1516_v28 = vpop.f32.mrf.mxu2 }
 0x34a   : > { %v1539_v36 = vadd.f32 %v1516_v28, %v1480_v30  ;;  %v3648_v30 = vld [vmem:[%s4706_s1 + $0xf0] sm:$0xff] }
 0x34c   : > { %v1586_v39 = vadd.f32 %v1563_v31, %v1539_v36 }
 0x356   : > { %v1377_v20 = vpop.f32.mrf.mxu1 }
 0x35c   : > { %v1420_v23 = vpop.f32.mrf.mxu3 }
 0x35d   : > { %v1421_v25 = vadd.f32 %v1420_v23, %v1377_v20  ;;  %v3635_v23 = vld [vmem:[%s4706_s1 + $0xd8] sm:$0xff] }
 0x35e   : > { %v1477_v24 = vpop.f32.mrf.mxu1 }
 0x35f   : > { %v1481_v29 = vadd.f32 %v1477_v24, %v1421_v25 }
 0x364   : > { %v1628_v38 = vpop.f32.mrf.mxu2 }
 0x365   : > { %v1651_v46 = vadd.f32 %v1628_v38, %v1586_v39 }
 0x366   : > { %v1687_v43 = vpop.f32.mrf.mxu0 }
 0x367   : > { %v1583_v34 = vpop.f32.mrf.mxu1  ;;  %v1710_v49 = vadd.f32 %v1687_v43, %v1651_v46 }
 0x36c   : > { %v1536_v33 = vpop.f32.mrf.mxu3 }
 0x36d   : > { %v1540_v35 = vadd.f32 %v1536_v33, %v1481_v29 }
 0x36f   : > { %v1587_v37 = vadd.f32 %v1583_v34, %v1540_v35  ;;  %v3674_v35 = vld [vmem:[%s4707_s2 + $0x18] sm:$0xff] }
 0x374   : > { %v1648_v40 = vpop.f32.mrf.mxu3 }
 0x375   : > { %v1652_v41 = vadd.f32 %v1648_v40, %v1587_v37  ;;  %v3661_v37 = vld [vmem:[%s4706_s1 + $0x108] sm:$0xff] }
 0x376   : > { %v1707_v44 = vpop.f32.mrf.mxu1  ;;  %v1744_v48 = vpop.f32.mrf.mxu2 }
 0x377   : > { %v1711_v47 = vadd.f32 %v1707_v44, %v1652_v41  ;;  %v1767_v51 = vadd.f32 %v1744_v48, %v1710_v49 }
 0x37c   : > { %v1764_v50 = vpop.f32.mrf.mxu3 }
 0x37d   : > { %v1768_v52 = vadd.f32 %v1764_v50, %v1711_v47  ;;  %v3656_v47 = vld [vmem:[%s4706_s1 + $0x100] sm:$0xff] }
 0x37e   : > { %v1803_v53 = vpop.f32.mrf.mxu0  ;;  %v1823_v54 = vpop.f32.mrf.mxu1 }
 0x37f   : > { %v1826_v55 = vadd.f32 %v1803_v53, %v1767_v51  ;;  %v1827_v56 = vadd.f32 %v1823_v54, %v1768_v52  ;;  %v3666_v53 = vld [vmem:[%s4706_s1 + $0x110] sm:$0xff]  ;;  %v3669_v54 = vld [vmem:[%s4706_s1 + $0x118] sm:$0xff] }
 0x381   : > { %v1835_v58 = vadd.f32 %v1833_v57, %v1826_v55  ;;  %v1836_v59 = vadd.f32 %v1833_v57, %v1827_v56 }
 0x383   : > { %v4329_v60 = vadd.f32 %v1835_v58, %v4064_v42  ;;  %v4332_v61 = vadd.f32 %v1836_v59, %v4067_v45  ;;  %v1962_v45 = vpop.permute.xlu0 %1961 }
 0x385   : > { %v1839_v62 = vmax.f32 %v4329_v60, 0.0  ;;  %v1840_v63 = vmax.f32 %v4332_v61, 0.0 }
 0x387   : > { %1869 = vrot.lane.b32.xlu2 %v1840_v63, %s3852_s19  ;;  %2191 = vrot.lane.b32.xlu0 %v1839_v62, %s3856_s23  ;;  %v3809_v1 = vpack.i.bf16 %v1839_v62, %v3850_v0  ;;  %v3814_v42 = vpack.i.bf16 %v1840_v63, %v1839_v62 }
 0x389   : > { %3810 = vrot.lane.b32.xlu1 %v3809_v1, %s3852_s19 }
 0x38b   : > { %v1850_v3 = vpop.permute.xlu0 %1849 }
 0x38f   : > { %1965 = vrot.lane.b32.xlu2 %v1840_v63, %s3853_s20  ;;  %2132 = vrot.lane.b32.xlu0 %v1839_v62, %s3855_s22 }
 0x391   : > { %1963 = vrot.lane.b32.xlu1 %v1839_v62, %s3853_s20 }
 0x393   : > { %v2021_v5 = vpop.permute.xlu0 %2020 }
 0x397   : > { %1853 = vrot.lane.b32.xlu2 %v1840_v63, %s3851_s14  ;;  %2307 = vrot.lane.b32.xlu0 %v1839_v62, %s3858_s25 }
 0x399   : > { %1851 = vrot.lane.b32.xlu1 %v1839_v62, %s3851_s14 }
 0x39f   : > { %2024 = vrot.lane.b32.xlu2 %v1840_v63, %s3854_s21  ;;  %3815 = vrot.lane.b32.xlu0 %v3814_v42, %s3857_s24 }
 0x3a1   : > { %2022 = vrot.lane.b32.xlu1 %v1839_v62, %s3854_s21 }
 0x3a7   : > { %2136 = vrot.lane.b32.xlu2 %v3850_v0, %s3855_s22  ;;  %2385 = vrot.lane.b32.xlu0 %v3850_v0, %s3851_s14 }
 0x3a9   : > { %2193 = vrot.lane.b32.xlu1 %v1840_v63, %s3856_s23 }
 0x3af   : > { %2311 = vrot.lane.b32.xlu2 %v3850_v0, %s3858_s25 }
 0x3b1   : > { %2134 = vrot.lane.b32.xlu1 %v1840_v63, %s3855_s22 }
 0x3b7   : > { %2370 = vperm.xlu2 %3819, %v3674_v35  }
 0x3b9   : > { %2309 = vrot.lane.b32.xlu1 %v1840_v63, %s3858_s25 }
 0x3bf   : > { %2497 = vrot.lane.b32.xlu2 %v3850_v0, %s3853_s20 }
 0x3c1   : > { %2256 = vrot.lane.b32.xlu1 %v3850_v0, %s3857_s24 }
 0x3c7   : > { %2556 = vrot.lane.b32.xlu2 %v3850_v0, %s3854_s21 }
 0x3e1   : > { %v1870_v4 = vpop.permute.xlu2 %1869 }
 0x3e9   : > { %v1966_v12 = vpop.permute.xlu2 %1965 }
 0x3f1   : > { %v1854_v20 = vpop.permute.xlu2 %1853 }
 0x3f9   : > { %v2192_v13 = vpop.permute.xlu0 %2191  ;;  %v2025_v28 = vpop.permute.xlu2 %2024 }
 0x3fb   : > { %v3811_v6 = vpop.permute.xlu1 %3810 }
 0x3fc   : > { %v3813_v7 = vunpack.i.h.bf16 %v3811_v6  ;;  %v3812_v8 = vunpack.i.l.bf16 %v3811_v6 }
 0x3fe   : > { %v1871_v10 = vsel %vm250_vm4, %v3812_v8, %v3813_v7  ;;  %v1872_v11 = vsel %vm250_vm4, %v3813_v7, %v1870_v4 }
 0x3ff   : > { %1893 = vmatpush.msrb.mxu2 %v1871_v10  ;;  %1913 = vmatpush.msrb.mxu3 %v1872_v11 }
 0x400   : > { %3637 = vmatmul.msk.f32.vlgmr.msrb.gmra.mxu2 %vm255_vm3, %v3636_v9  ;;  %3638 = vmatmul.msk.f32.vlgmr.msrb.gmra.mxu3 %vm255_vm3, %v3636_v9 }
 0x401   : > { %v2133_v21 = vpop.permute.xlu0 %2132  ;;  %v2137_v41 = vpop.permute.xlu2 %2136 }
 0x403   : > { %v1964_v14 = vpop.permute.xlu1 %1963 }
 0x404   : > { %v1967_v15 = vsel %vm352_vm5, %v1962_v45, %v1964_v14  ;;  %v1968_v18 = vsel %vm352_vm5, %v1964_v14, %v1966_v12 }
 0x405   : > { %3644 = vmatpush.msk.msra.mxu2 %vm3971_vm6, %v1967_v15  ;;  %3646 = vmatpush.msk.msra.mxu3 %vm3985_vm7, %v1968_v18 }
 0x407   : > { %2099 = vmatpush.msrb.mxu2 %v1839_v62  ;;  %2119 = vmatpush.msrb.mxu3 %v1840_v63 }
 0x408   : > { %3645 = vmatmul.msk.f32.vlgmr.msra.gmra.mxu2 %vm255_vm3, %v3643_v19  ;;  %3647 = vmatmul.msk.f32.vlgmr.msra.gmra.mxu3 %vm255_vm3, %v3643_v19 }
 0x409   : > { %v2308_v34 = vpop.permute.xlu0 %2307  ;;  %v2312_v51 = vpop.permute.xlu2 %2311 }
 0x40b   : > { %v1852_v22 = vpop.permute.xlu1 %1851 }
 0x40c   : > { %v1855_v24 = vsel %vm234_vm0, %v1850_v3, %v1852_v22  ;;  %v1856_v25 = vsel %vm234_vm0, %v1852_v22, %v1854_v20 }
 0x40d   : > { %3639 = vmatpush.msk.msra.mxu0 %vm3952_vm1, %v1855_v24  ;;  %3641 = vmatpush.msk.msra.mxu1 %vm3956_vm2, %v1856_v25 }
 0x40e   : > { %3640 = vmatmul.msk.f32.vlgmr.msra.gmra.mxu0 %vm255_vm3, %v3635_v23  ;;  %3642 = vmatmul.msk.f32.vlgmr.msra.gmra.mxu1 %vm255_vm3, %v3635_v23 }
 0x410   : > { %3654 = vmatmul.msk.f32.vlgmr.msrb.gmra.mxu2 %vm255_vm3, %v3653_v27  ;;  %3655 = vmatmul.msk.f32.vlgmr.msrb.gmra.mxu3 %vm255_vm3, %v3653_v27 }
 0x411   : > { %v3816_v40 = vpop.permute.xlu0 %3815  ;;  %v2371_v27 = vpop.permute.xlu2 %2370 }
 0x412   : > { %v3818_v43 = vunpack.i.h.bf16 %v3816_v40  ;;  %v3817_v44 = vunpack.i.l.bf16 %v3816_v40 }
 0x413   : > { %v2023_v29 = vpop.permute.xlu1 %2022 }
 0x414   : > { %v2026_v31 = vsel %vm412_vm8, %v2021_v5, %v2023_v29  ;;  %v2027_v33 = vsel %vm412_vm8, %v2023_v29, %v2025_v28  ;;  %v2258_v50 = vsel %vm647_vm10, %v3817_v44, %v3818_v43 }
 0x415   : > { %3649 = vmatpush.msk.msrb.mxu0 %vm3952_vm1, %v2026_v31  ;;  %3651 = vmatpush.msk.msrb.mxu1 %vm3956_vm2, %v2027_v33 }
 0x416   : > { %3650 = vmatmul.msk.f32.vlgmr.msrb.gmra.mxu0 %vm255_vm3, %v3648_v30  ;;  %3652 = vmatmul.msk.f32.vlgmr.msrb.gmra.mxu1 %vm255_vm3, %v3648_v30 }
 0x41b   : > { %v2194_v36 = vpop.permute.xlu1 %2193 }
 0x41c   : > { %v2197_v38 = vsel %vm585_vm11, %v2192_v13, %v2194_v36  ;;  %v2198_v39 = vsel %vm585_vm11, %v2194_v36, %v2196_v2 }
 0x41d   : > { %3662 = vmatpush.msk.msra.mxu2 %vm3952_vm1, %v2197_v38  ;;  %3664 = vmatpush.msk.msra.mxu3 %vm3956_vm2, %v2198_v39 }
 0x41e   : > { %3663 = vmatmul.msk.f32.vlgmr.msra.gmra.mxu2 %vm255_vm3, %v3661_v37  ;;  %3665 = vmatmul.msk.f32.vlgmr.msra.gmra.mxu3 %vm255_vm3, %v3661_v37 }
 0x423   : > { %v2135_v46 = vpop.permute.xlu1 %2134 }
 0x424   : > { %v2138_v48 = vsel %vm525_vm9, %v2133_v21, %v2135_v46  ;;  %v2139_v49 = vsel %vm525_vm9, %v2135_v46, %v2137_v41  ;;  %v3714_v41 = vld [vmem:[%s4707_s2 + $0x20] sm:$0xff]  ;;  %v2386_v46 = vpop.permute.xlu0 %2385 }
 0x425   : > { %3657 = vmatpush.msk.msra.mxu0 %vm3971_vm6, %v2138_v48  ;;  %3659 = vmatpush.msk.msra.mxu1 %vm3985_vm7, %v2139_v49  ;;  %v3675_v49 = vld [vmem:[%s4706_s1 + $0x120] sm:$0xff] }
 0x426   : > { %3658 = vmatmul.msk.f32.vlgmr.msra.gmra.mxu0 %vm255_vm3, %v3656_v47  ;;  %3660 = vmatmul.msk.f32.vlgmr.msra.gmra.mxu1 %vm255_vm3, %v3656_v47 }
 0x427   : > { %2280 = vmatpush.msrb.mxu0 %v2258_v50 }
 0x42b   : > { %v2310_v52 = vpop.permute.xlu1 %2309 }
 0x42c   : > { %v2313_v55 = vsel %vm703_vm12, %v2308_v34, %v2310_v52  ;;  %v2314_v56 = vsel %vm703_vm12, %v2310_v52, %v2312_v51 }
 0x42d   : > { %3670 = vmatpush.msk.msrb.mxu2 %vm3971_vm6, %v2313_v55  ;;  %3672 = vmatpush.msk.msrb.mxu3 %vm3985_vm7, %v2314_v56  ;;  %v3676_v55 = vld [vmem:[%s4706_s1 + $0x128] sm:$0xff] }
 0x42e   : > { %3667 = vmatmul.msk.f32.vlgmr.msrb.gmra.mxu0 %vm255_vm3, %v3666_v53  ;;  %3671 = vmatmul.msk.f32.vlgmr.msrb.gmra.mxu2 %vm255_vm3, %v3669_v54 }
 0x42f   : > { %3673 = vmatmul.msk.f32.vlgmr.msrb.gmra.mxu3 %vm255_vm3, %v3669_v54 }
 0x433   : > { %v2257_v57 = vpop.permute.xlu1 %2256 }
 0x434   : > { %v2259_v58 = vsel %vm647_vm10, %v3818_v43, %v2257_v57  ;;  %v2498_v43 = vpop.permute.xlu2 %2497 }
 0x435   : > { %2300 = vmatpush.msrb.mxu1 %v2259_v58 }
 0x436   : > { %3668 = vmatmul.msk.f32.vlgmr.msrb.gmra.mxu1 %vm255_vm3, %v3666_v53 }
 0x43c   : > { %v2557_v44 = vpop.permute.xlu2 %2556 }
 0x483   : > { %v1895_v59 = vpop.f32.mrf.mxu2  ;;  %v1915_v62 = vpop.f32.mrf.mxu3 }
 0x48b   : > { %v1938_v63 = vpop.f32.mrf.mxu0  ;;  %v1995_v1 = vpop.f32.mrf.mxu2 }
 0x48c   : > { %v1958_v42 = vpop.f32.mrf.mxu1  ;;  %v2015_v45 = vpop.f32.mrf.mxu3  ;;  %v1939_v3 = vadd.f32 %v1938_v63, %v1895_v59 }
 0x48d   : > { %v1959_v4 = vadd.f32 %v1958_v42, %v1915_v62 }
 0x48e   : > { %v2018_v5 = vadd.f32 %v1995_v1, %v1939_v3  ;;  %v3683_v1 = vld [vmem:[%s4706_s1 + $0x130] sm:$0xff] }
 0x48f   : > { %v2019_v9 = vadd.f32 %v2015_v45, %v1959_v4 }
 0x493   : > { %v2054_v2 = vpop.f32.mrf.mxu0  ;;  %v2101_v6 = vpop.f32.mrf.mxu2 }
 0x494   : > { %v2074_v7 = vpop.f32.mrf.mxu1  ;;  %v2121_v8 = vpop.f32.mrf.mxu3  ;;  %v2077_v11 = vadd.f32 %v2054_v2, %v2018_v5  ;;  %v3688_v5 = vld [vmem:[%s4706_s1 + $0x138] sm:$0xff] }
 0x495   : > { %v2078_v12 = vadd.f32 %v2074_v7, %v2019_v9 }
 0x496   : > { %v2124_v13 = vadd.f32 %v2101_v6, %v2077_v11  ;;  %v3693_v6 = vld [vmem:[%s4706_s1 + $0x140] sm:$0xff] }
 0x497   : > { %v2125_v15 = vadd.f32 %v2121_v8, %v2078_v12 }
 0x4a1   : > { %v2225_v14 = vpop.f32.mrf.mxu2  ;;  %v2245_v20 = vpop.f32.mrf.mxu3 }
 0x4a3   : > { %v2166_v10 = vpop.f32.mrf.mxu0  ;;  %v2186_v19 = vpop.f32.mrf.mxu1 }
 0x4a4   : > { %v2189_v18 = vadd.f32 %v2166_v10, %v2124_v13  ;;  %v2190_v22 = vadd.f32 %v2186_v19, %v2125_v15  ;;  %v3696_v15 = vld [vmem:[%s4706_s1 + $0x148] sm:$0xff] }
 0x4a6   : > { %v2248_v23 = vadd.f32 %v2225_v14, %v2189_v18  ;;  %v2249_v28 = vadd.f32 %v2245_v20, %v2190_v22 }
 0x4ab   : > { %v2282_v21 = vpop.f32.mrf.mxu0 }
 0x4ac   : > { %v2305_v24 = vadd.f32 %v2282_v21, %v2248_v23 }
 0x4b1   : > { %v2341_v25 = vpop.f32.mrf.mxu2 }
 0x4b2   : > { %v2364_v29 = vadd.f32 %v2341_v25, %v2305_v24  ;;  %v2361_v31 = vpop.f32.mrf.mxu3  ;;  %v3701_v24 = vld [vmem:[%s4706_s1 + $0x150] sm:$0xff] }
 0x4b3   : > { %v2302_v30 = vpop.f32.mrf.mxu1 }
 0x4b4   : > { %v2373_v33 = vadd.f32 %v2371_v27, %v2364_v29  ;;  %v2306_v34 = vadd.f32 %v2302_v30, %v2249_v28  ;;  %v3706_v28 = vld [vmem:[%s4706_s1 + $0x158] sm:$0xff] }
 0x4b6   : > { %v2375_v35 = vmax.f32 %v2373_v33, 0.0  ;;  %v2365_v36 = vadd.f32 %v2361_v31, %v2306_v34  ;;  %v3709_v34 = vld [vmem:[%s4706_s1 + $0x160] sm:$0xff] }
 0x4b8   : > { %v2374_v37 = vadd.f32 %v2371_v27, %v2365_v36  ;;  %2387 = vrot.lane.b32.xlu1 %v2375_v35, %s3851_s14  ;;  %v3820_v38 = vpack.i.bf16 %v2375_v35, %v3850_v0 }
 0x4ba   : > { %v2376_v39 = vmax.f32 %v2374_v37, 0.0  ;;  %3821 = vrot.lane.b32.xlu0 %v3820_v38, %s3852_s19 }
 0x4bc   : > { %2389 = vrot.lane.b32.xlu2 %v2376_v39, %s3851_s14  ;;  %v3825_v40 = vpack.i.bf16 %v2376_v39, %v2375_v35 }
 0x4c0   : > { %2405 = vrot.lane.b32.xlu1 %v2376_v39, %s3852_s19 }
 0x4c2   : > { %2499 = vrot.lane.b32.xlu0 %v2375_v35, %s3853_s20 }
 0x4c4   : > { %2668 = vrot.lane.b32.xlu2 %v2375_v35, %s3855_s22 }
 0x4c8   : > { %2501 = vrot.lane.b32.xlu1 %v2376_v39, %s3853_s20 }
 0x4ca   : > { %2558 = vrot.lane.b32.xlu0 %v2375_v35, %s3854_s21 }
 0x4cc   : > { %2727 = vrot.lane.b32.xlu2 %v2375_v35, %s3856_s23 }
 0x4d0   : > { %2560 = vrot.lane.b32.xlu1 %v2376_v39, %s3854_s21 }
 0x4d2   : > { %2792 = vrot.lane.b32.xlu0 %v3850_v0, %s3857_s24 }
 0x4d4   : > { %3826 = vrot.lane.b32.xlu2 %v3825_v40, %s3857_s24 }
 0x4d8   : > { %2672 = vrot.lane.b32.xlu1 %v3850_v0, %s3855_s22 }
 0x4da   : > { %2670 = vrot.lane.b32.xlu0 %v2376_v39, %s3855_s22 }
 0x4dc   : > { %2845 = vrot.lane.b32.xlu2 %v2376_v39, %s3858_s25 }
 0x4e0   : > { %2731 = vrot.lane.b32.xlu1 %v3850_v0, %s3856_s23 }
 0x4e2   : > { %2729 = vrot.lane.b32.xlu0 %v2376_v39, %s3856_s23 }
 0x4e8   : > { %2843 = vrot.lane.b32.xlu1 %v2375_v35, %s3858_s25 }
 0x4ea   : > { %2847 = vrot.lane.b32.xlu0 %v3850_v0, %s3858_s25 }
 0x4f0   : > { %2906 = vperm.xlu1 %3787, %v3714_v41  }
 0x4f2   : > { %3269 = vrot.lane.b32.xlu0 %v3850_v0, %s3856_s23 }
 0x4f8   : > { %3035 = vrot.lane.b32.xlu1 %v3850_v0, %s3853_s20 }
 0x500   : > { %2923 = vrot.lane.b32.xlu1 %v3850_v0, %s3851_s14 }
 0x508   : > { %3094 = vrot.lane.b32.xlu1 %v3850_v0, %s3854_s21 }
 0x516   : > { %v2390_v47 = vpop.permute.xlu2 %2389 }
 0x51e   : > { %v2669_v59 = vpop.permute.xlu2 %2668 }
 0x526   : > { %v2728_v4 = vpop.permute.xlu2 %2727 }
 0x52a   : > { %v2388_v48 = vpop.permute.xlu1 %2387 }
 0x52b   : > { %v2391_v50 = vsel %vm234_vm0, %v2386_v46, %v2388_v48  ;;  %v2392_v51 = vsel %vm234_vm0, %v2388_v48, %v2390_v47 }
 0x52c   : > { %v3822_v52 = vpop.permute.xlu0 %3821  ;;  %3679 = vmatpush.msk.msra.mxu2 %vm3952_vm1, %v2391_v50  ;;  %3681 = vmatpush.msk.msra.mxu3 %vm3956_vm2, %v2392_v51 }
 0x52d   : > { %v3824_v53 = vunpack.i.h.bf16 %v3822_v52  ;;  %v3823_v54 = vunpack.i.l.bf16 %v3822_v52  ;;  %3682 = vmatmul.msk.f32.vlgmr.msra.gmra.mxu3 %vm255_vm3, %v3675_v49  ;;  %3680 = vmatmul.msk.f32.vlgmr.msra.gmra.mxu2 %vm255_vm3, %v3675_v49 }
 0x52e   : > { %v3827_v10 = vpop.permute.xlu2 %3826 }
 0x52f   : > { %v2407_v56 = vsel %vm250_vm4, %v3823_v54, %v3824_v53  ;;  %v3829_v12 = vunpack.i.h.bf16 %v3827_v10  ;;  %v3828_v13 = vunpack.i.l.bf16 %v3827_v10 }
 0x530   : > { %2429 = vmatpush.msra.mxu0 %v2407_v56 }
 0x531   : > { %3677 = vmatmul.msk.f32.vlgmr.msra.gmra.mxu0 %vm255_vm3, %v3676_v55  ;;  %v2794_v21 = vsel %vm647_vm10, %v3828_v13, %v3829_v12 }
 0x532   : > { %v2406_v57 = vpop.permute.xlu1 %2405 }
 0x533   : > { %v2408_v58 = vsel %vm250_vm4, %v3824_v53, %v2406_v57 }
 0x534   : > { %v2500_v62 = vpop.permute.xlu0 %2499  ;;  %2449 = vmatpush.msra.mxu1 %v2408_v58 }
 0x535   : > { %v2503_v63 = vsel %vm352_vm5, %v2498_v43, %v2500_v62  ;;  %3678 = vmatmul.msk.f32.vlgmr.msra.gmra.mxu1 %vm255_vm3, %v3676_v55 }
 0x536   : > { %3684 = vmatpush.msk.msrb.mxu0 %vm3971_vm6, %v2503_v63  ;;  %v2846_v29 = vpop.permute.xlu2 %2845 }
 0x538   : > { %2635 = vmatpush.msra.mxu0 %v2375_v35 }
 0x539   : > { %3685 = vmatmul.msk.f32.vlgmr.msrb.gmra.mxu0 %vm255_vm3, %v3683_v1 }
 0x53a   : > { %v2502_v42 = vpop.permute.xlu1 %2501 }
 0x53b   : > { %v2504_v45 = vsel %vm352_vm5, %v2500_v62, %v2502_v42 }
 0x53c   : > { %v2559_v2 = vpop.permute.xlu0 %2558  ;;  %3686 = vmatpush.msk.msrb.mxu1 %vm3985_vm7, %v2504_v45 }
 0x53d   : > { %v2562_v3 = vsel %vm412_vm8, %v2557_v44, %v2559_v2  ;;  %3687 = vmatmul.msk.f32.vlgmr.msrb.gmra.mxu1 %vm255_vm3, %v3683_v1 }
 0x53e   : > { %2655 = vmatpush.msra.mxu1 %v2376_v39  ;;  %3689 = vmatpush.msk.msrb.mxu2 %vm3952_vm1, %v2562_v3 }
 0x53f   : > { %3690 = vmatmul.msk.f32.vlgmr.msrb.gmra.mxu2 %vm255_vm3, %v3688_v5 }
 0x541   : > { %3694 = vmatmul.msk.f32.vlgmr.msra.gmra.mxu0 %vm255_vm3, %v3693_v6 }
 0x542   : > { %v2561_v7 = vpop.permute.xlu1 %2560 }
 0x543   : > { %v2563_v8 = vsel %vm412_vm8, %v2559_v2, %v2561_v7 }
 0x544   : > { %v2793_v9 = vpop.permute.xlu0 %2792  ;;  %3691 = vmatpush.msk.msrb.mxu3 %vm3956_vm2, %v2563_v8 }
 0x545   : > { %3692 = vmatmul.msk.f32.vlgmr.msrb.gmra.mxu3 %vm255_vm3, %v3688_v5  ;;  %3695 = vmatmul.msk.f32.vlgmr.msra.gmra.mxu1 %vm255_vm3, %v3693_v6  ;;  %v2795_v20 = vsel %vm647_vm10, %v3829_v12, %v2793_v9 }
 0x54a   : > { %v2673_v11 = vpop.permute.xlu1 %2672 }
 0x54c   : > { %v2671_v14 = vpop.permute.xlu0 %2670 }
 0x54d   : > { %v2674_v18 = vsel %vm525_vm9, %v2669_v59, %v2671_v14  ;;  %v2675_v19 = vsel %vm525_vm9, %v2671_v14, %v2673_v11 }
 0x54e   : > { %3697 = vmatpush.msk.msra.mxu2 %vm3971_vm6, %v2674_v18  ;;  %3699 = vmatpush.msk.msra.mxu3 %vm3985_vm7, %v2675_v19 }
 0x54f   : > { %3698 = vmatmul.msk.f32.vlgmr.msra.gmra.mxu2 %vm255_vm3, %v3696_v15  ;;  %3700 = vmatmul.msk.f32.vlgmr.msra.gmra.mxu3 %vm255_vm3, %v3696_v15 }
 0x550   : > { %2816 = vmatpush.msrb.mxu2 %v2794_v21  ;;  %2836 = vmatpush.msrb.mxu3 %v2795_v20 }
 0x552   : > { %v2732_v22 = vpop.permute.xlu1 %2731 }
 0x554   : > { %v2730_v23 = vpop.permute.xlu0 %2729 }
 0x555   : > { %v2733_v25 = vsel %vm585_vm11, %v2728_v4, %v2730_v23  ;;  %v2734_v27 = vsel %vm585_vm11, %v2730_v23, %v2732_v22 }
 0x556   : > { %3702 = vmatpush.msk.msrb.mxu0 %vm3952_vm1, %v2733_v25  ;;  %3704 = vmatpush.msk.msrb.mxu1 %vm3956_vm2, %v2734_v27 }
 0x557   : > { %3703 = vmatmul.msk.f32.vlgmr.msrb.gmra.mxu0 %vm255_vm3, %v3701_v24  ;;  %3705 = vmatmul.msk.f32.vlgmr.msrb.gmra.mxu1 %vm255_vm3, %v3701_v24  ;;  %v3716_v24 = vld [vmem:[%s4706_s1 + $0x170] sm:$0xff] }
 0x558   : > { %3707 = vmatmul.msk.f32.vlgmr.msrb.gmra.mxu2 %vm255_vm3, %v3706_v28  ;;  %3708 = vmatmul.msk.f32.vlgmr.msrb.gmra.mxu3 %vm255_vm3, %v3706_v28 }
 0x55a   : > { %v2844_v30 = vpop.permute.xlu1 %2843 }
 0x55b   : > { %v2849_v31 = vsel %vm703_vm12, %v2844_v30, %v2846_v29 }
 0x55c   : > { %v2848_v33 = vpop.permute.xlu0 %2847  ;;  %3710 = vmatpush.msk.msra.mxu0 %vm3971_vm6, %v2849_v31 }
 0x55d   : > { %v2850_v35 = vsel %vm703_vm12, %v2846_v29, %v2848_v33  ;;  %v3715_v33 = vld [vmem:[%s4706_s1 + $0x168] sm:$0xff] }
 0x55e   : > { %3712 = vmatpush.msk.msra.mxu1 %vm3985_vm7, %v2850_v35  ;;  %v3733_v35 = vld [vmem:[%s4706_s1 + $0x188] sm:$0xff] }
 0x55f   : > { %3711 = vmatmul.msk.f32.vlgmr.msra.gmra.mxu0 %vm255_vm3, %v3709_v34  ;;  %3713 = vmatmul.msk.f32.vlgmr.msra.gmra.mxu1 %vm255_vm3, %v3709_v34 }
 0x562   : > { %v2907_v9 = vpop.permute.xlu1 %2906 }
 0x564   : > { %v3270_v29 = vpop.permute.xlu0 %3269 }
 0x56a   : > { %v3036_v19 = vpop.permute.xlu1 %3035 }
 0x572   : > { %v2924_v23 = vpop.permute.xlu1 %2923 }
 0x57a   : > { %v3095_v30 = vpop.permute.xlu1 %3094 }
 0x5ae   : > { %v2431_v36 = vpop.f32.mrf.mxu0 }
 0x5b0   : > { %v2474_v38 = vpop.f32.mrf.mxu2  ;;  %v2494_v40 = vpop.f32.mrf.mxu3 }
 0x5b1   : > { %v2475_v43 = vadd.f32 %v2474_v38, %v2431_v36 }
 0x5b2   : > { %v2451_v37 = vpop.f32.mrf.mxu1 }
 0x5b3   : > { %v2495_v46 = vadd.f32 %v2494_v40, %v2451_v37  ;;  %v3728_v40 = vld [vmem:[%s4706_s1 + $0x180] sm:$0xff] }
 0x5b6   : > { %v2531_v39 = vpop.f32.mrf.mxu0 }
 0x5b7   : > { %v2554_v49 = vadd.f32 %v2531_v39, %v2475_v43 }
 0x5ba   : > { %v2551_v41 = vpop.f32.mrf.mxu1 }
 0x5bb   : > { %v2555_v51 = vadd.f32 %v2551_v41, %v2495_v46 }
 0x5be   : > { %v2637_v48 = vpop.f32.mrf.mxu0 }
 0x5c2   : > { %v2590_v44 = vpop.f32.mrf.mxu2  ;;  %v2657_v50 = vpop.f32.mrf.mxu1 }
 0x5c3   : > { %v2613_v53 = vadd.f32 %v2590_v44, %v2554_v49 }
 0x5c5   : > { %v2660_v57 = vadd.f32 %v2637_v48, %v2613_v53  ;;  %v3741_v48 = vld [vmem:[%s4706_s1 + $0x198] sm:$0xff] }
 0x5c8   : > { %v2610_v47 = vpop.f32.mrf.mxu3 }
 0x5c9   : > { %v2614_v52 = vadd.f32 %v2610_v47, %v2555_v51 }
 0x5cb   : > { %v2661_v56 = vadd.f32 %v2657_v50, %v2614_v52 }
 0x5d2   : > { %v2702_v54 = vpop.f32.mrf.mxu2  ;;  %v2722_v55 = vpop.f32.mrf.mxu3 }
 0x5d3   : > { %v2725_v62 = vadd.f32 %v2702_v54, %v2660_v57  ;;  %v2726_v63 = vadd.f32 %v2722_v55, %v2661_v56  ;;  %v3736_v55 = vld [vmem:[%s4706_s1 + $0x190] sm:$0xff] }
 0x5d4   : > { %v2761_v58 = vpop.f32.mrf.mxu0  ;;  %v2781_v59 = vpop.f32.mrf.mxu1 }
 0x5d5   : > { %v2784_v1 = vadd.f32 %v2761_v58, %v2725_v62  ;;  %v2785_v42 = vadd.f32 %v2781_v59, %v2726_v63 }
 0x5db   : > { %v2818_v45 = vpop.f32.mrf.mxu2  ;;  %v2838_v2 = vpop.f32.mrf.mxu3 }
 0x5dc   : > { %v2841_v3 = vadd.f32 %v2818_v45, %v2784_v1  ;;  %v2842_v4 = vadd.f32 %v2838_v2, %v2785_v42  ;;  %v2877_v5 = vpop.f32.mrf.mxu0  ;;  %v2897_v6 = vpop.f32.mrf.mxu1  ;;  %v3749_v1 = vld [vmem:[%s4706_s1 + $0x1a8] sm:$0xff]  ;;  %v3746_v2 = vld [vmem:[%s4706_s1 + $0x1a0] sm:$0xff] }
 0x5de   : > { %v2900_v7 = vadd.f32 %v2877_v5, %v2841_v3  ;;  %v2901_v8 = vadd.f32 %v2897_v6, %v2842_v4 }
 0x5e0   : > { %v2909_v10 = vadd.f32 %v2907_v9, %v2900_v7  ;;  %v2910_v11 = vadd.f32 %v2907_v9, %v2901_v8 }
 0x5e2   : > { %v2911_v12 = vadd.f32 %v2909_v10, %v4329_v60  ;;  %v2912_v13 = vadd.f32 %v2910_v11, %v4332_v61  ;;  %v3754_v61 = vld [vmem:[%s4707_s2 + $0x28] sm:$0xff] }
 0x5e4   : > { %v2913_v14 = vmax.f32 %v2911_v12, 0.0  ;;  %v4574_v15 = vmax.f32 %v2912_v13, 0.0 }
 0x5e6   : > { %2943 = vrot.lane.b32.xlu0 %v4574_v15, %s3852_s19  ;;  %3265 = vrot.lane.b32.xlu1 %v2913_v14, %s3856_s23  ;;  %v3830_v18 = vpack.i.bf16 %v2913_v14, %v3850_v0  ;;  %v3835_v60 = vpack.i.bf16 %v4574_v15, %v2913_v14 }
 0x5e8   : > { %3831 = vrot.lane.b32.xlu2 %v3830_v18, %s3852_s19 }
 0x5ee   : > { %3039 = vrot.lane.b32.xlu0 %v4574_v15, %s3853_s20  ;;  %3206 = vrot.lane.b32.xlu1 %v2913_v14, %s3855_s22 }
 0x5f0   : > { %3037 = vrot.lane.b32.xlu2 %v2913_v14, %s3853_s20 }
 0x5f6   : > { %2927 = vrot.lane.b32.xlu0 %v4574_v15, %s3851_s14  ;;  %3381 = vrot.lane.b32.xlu1 %v2913_v14, %s3858_s25 }
 0x5f8   : > { %2925 = vrot.lane.b32.xlu2 %v2913_v14, %s3851_s14 }
 0x5fe   : > { %3098 = vrot.lane.b32.xlu0 %v4574_v15, %s3854_s21  ;;  %3836 = vrot.lane.b32.xlu1 %v3835_v60, %s3857_s24 }
 0x600   : > { %3096 = vrot.lane.b32.xlu2 %v2913_v14, %s3854_s21 }
 0x606   : > { %3210 = vrot.lane.b32.xlu0 %v3850_v0, %s3855_s22 }
 0x608   : > { %3267 = vrot.lane.b32.xlu2 %v4574_v15, %s3856_s23 }
 0x60e   : > { %3385 = vrot.lane.b32.xlu0 %v3850_v0, %s3858_s25 }
 0x610   : > { %3208 = vrot.lane.b32.xlu2 %v4574_v15, %s3855_s22 }
 0x616   : > { %3444 = vperm.xlu0 %3798, %v3754_v61  }
 0x618   : > { %3383 = vrot.lane.b32.xlu2 %v4574_v15, %s3858_s25 }
 0x620   : > { %3330 = vrot.lane.b32.xlu2 %v3850_v0, %s3857_s24  ;;  %v3723_v0 = vld [vmem:[%s4706_s1 + $0x178] sm:$0xff] }
 0x642   : > { %v3832_v20 = vpop.permute.xlu2 %3831 }
 0x643   : > { %v3834_v21 = vunpack.i.h.bf16 %v3832_v20  ;;  %v3833_v22 = vunpack.i.l.bf16 %v3832_v20 }
 0x645   : > { %v2945_v25 = vsel %vm250_vm4, %v3833_v22, %v3834_v21 }
 0x646   : > { %2967 = vmatpush.msra.mxu2 %v2945_v25 }
 0x647   : > { %3717 = vmatmul.msk.f32.vlgmr.msra.gmra.mxu2 %vm255_vm3, %v3716_v24 }
 0x64a   : > { %v3038_v27 = vpop.permute.xlu2 %3037 }
 0x64b   : > { %v3041_v28 = vsel %vm352_vm5, %v3036_v19, %v3038_v27 }
 0x64c   : > { %3724 = vmatpush.msk.msrb.mxu2 %vm3971_vm6, %v3041_v28 }
 0x64e   : > { %3173 = vmatpush.msra.mxu2 %v2913_v14 }
 0x64f   : > { %3725 = vmatmul.msk.f32.vlgmr.msrb.gmra.mxu2 %vm255_vm3, %v3723_v0 }
 0x652   : > { %v2926_v31 = vpop.permute.xlu2 %2925 }
 0x653   : > { %v2929_v34 = vsel %vm234_vm0, %v2924_v23, %v2926_v31 }
 0x654   : > { %3719 = vmatpush.msk.msrb.mxu0 %vm3952_vm1, %v2929_v34 }
 0x655   : > { %3720 = vmatmul.msk.f32.vlgmr.msrb.gmra.mxu0 %vm255_vm3, %v3715_v33 }
 0x657   : > { %3734 = vmatmul.msk.f32.vlgmr.msra.gmra.mxu2 %vm255_vm3, %v3733_v35 }
 0x658   : > { %v2944_v36 = vpop.permute.xlu0 %2943  ;;  %v3266_v37 = vpop.permute.xlu1 %3265 }
 0x659   : > { %v2946_v38 = vsel %vm250_vm4, %v3834_v21, %v2944_v36  ;;  %v3840_v36 = vld [vmem:[%s3898_s18] sm:$0xff] }
 0x65a   : > { %v3097_v39 = vpop.permute.xlu2 %3096  ;;  %2987 = vmatpush.msra.mxu3 %v2946_v38 }
 0x65b   : > { %v3100_v41 = vsel %vm412_vm8, %v3095_v30, %v3097_v39  ;;  %3718 = vmatmul.msk.f32.vlgmr.msra.gmra.mxu3 %vm255_vm3, %v3716_v24 }
 0x65c   : > { %3729 = vmatpush.msk.msra.mxu0 %vm3952_vm1, %v3100_v41 }
 0x65d   : > { %3730 = vmatmul.msk.f32.vlgmr.msra.gmra.mxu0 %vm255_vm3, %v3728_v40 }
 0x660   : > { %v3040_v43 = vpop.permute.xlu0 %3039  ;;  %v3207_v44 = vpop.permute.xlu1 %3206 }
 0x661   : > { %v3042_v46 = vsel %vm352_vm5, %v3038_v27, %v3040_v43 }
 0x662   : > { %v3268_v47 = vpop.permute.xlu2 %3267  ;;  %3726 = vmatpush.msk.msrb.mxu3 %vm3985_vm7, %v3042_v46 }
 0x663   : > { %v3271_v49 = vsel %vm585_vm11, %v3266_v37, %v3268_v47  ;;  %v3272_v50 = vsel %vm585_vm11, %v3268_v47, %v3270_v29  ;;  %3727 = vmatmul.msk.f32.vlgmr.msrb.gmra.mxu3 %vm255_vm3, %v3723_v0 }
 0x664   : > { %3193 = vmatpush.msra.mxu3 %v4574_v15  ;;  %3742 = vmatpush.msk.msrb.mxu2 %vm3952_vm1, %v3271_v49 }
 0x665   : > { %3743 = vmatmul.msk.f32.vlgmr.msrb.gmra.mxu2 %vm255_vm3, %v3741_v48 }
 0x666   : > { %3744 = vmatpush.msk.msrb.mxu3 %vm3956_vm2, %v3272_v50 }
 0x668   : > { %v2928_v51 = vpop.permute.xlu0 %2927  ;;  %v3382_v52 = vpop.permute.xlu1 %3381 }
 0x669   : > { %v2930_v53 = vsel %vm234_vm0, %v2926_v31, %v2928_v51 }
 0x66a   : > { %3721 = vmatpush.msk.msrb.mxu1 %vm3956_vm2, %v2930_v53  ;;  %v3209_v54 = vpop.permute.xlu2 %3208 }
 0x66b   : > { %v3212_v16 = vsel %vm525_vm9, %v3207_v44, %v3209_v54  ;;  %3722 = vmatmul.msk.f32.vlgmr.msrb.gmra.mxu1 %vm255_vm3, %v3715_v33  ;;  %3735 = vmatmul.msk.f32.vlgmr.msra.gmra.mxu3 %vm255_vm3, %v3733_v35 }
 0x66c   : > { %3737 = vmatpush.msk.msrb.mxu0 %vm3971_vm6, %v3212_v16 }
 0x66d   : > { %3738 = vmatmul.msk.f32.vlgmr.msrb.gmra.mxu0 %vm255_vm3, %v3736_v55 }
 0x670   : > { %v3099_v56 = vpop.permute.xlu0 %3098  ;;  %v3837_v57 = vpop.permute.xlu1 %3836 }
 0x671   : > { %v3101_v58 = vsel %vm412_vm8, %v3097_v39, %v3099_v56  ;;  %v3839_v59 = vunpack.i.h.bf16 %v3837_v57  ;;  %v3838_v62 = vunpack.i.l.bf16 %v3837_v57 }
 0x672   : > { %3731 = vmatpush.msk.msra.mxu1 %vm3956_vm2, %v3101_v58  ;;  %v3384_v63 = vpop.permute.xlu2 %3383 }
 0x673   : > { %v3387_v42 = vsel %vm703_vm12, %v3382_v52, %v3384_v63  ;;  %3732 = vmatmul.msk.f32.vlgmr.msra.gmra.mxu1 %vm255_vm3, %v3728_v40  ;;  %v3332_v45 = vsel %vm647_vm10, %v3838_v62, %v3839_v59  ;;  %3745 = vmatmul.msk.f32.vlgmr.msrb.gmra.mxu3 %vm255_vm3, %v3741_v48  ;;  %v3841_v48 = vld [vmem:[%s3898_s18 + $0x8] sm:$0xff] }
 0x674   : > { %3354 = vmatpush.msra.mxu0 %v3332_v45  ;;  %3750 = vmatpush.msk.msra.mxu2 %vm3971_vm6, %v3387_v42 }
 0x675   : > { %3751 = vmatmul.msk.f32.vlgmr.msra.gmra.mxu2 %vm255_vm3, %v3749_v1  ;;  %3747 = vmatmul.msk.f32.vlgmr.msra.gmra.mxu0 %vm255_vm3, %v3746_v2 }
 0x678   : > { %v3211_v17 = vpop.permute.xlu0 %3210 }
 0x679   : > { %v3213_v3 = vsel %vm525_vm9, %v3209_v54, %v3211_v17 }
 0x67a   : > { %3739 = vmatpush.msk.msrb.mxu1 %vm3985_vm7, %v3213_v3  ;;  %v3331_v4 = vpop.permute.xlu2 %3330 }
 0x67b   : > { %v3333_v5 = vsel %vm647_vm10, %v3839_v59, %v3331_v4  ;;  %3740 = vmatmul.msk.f32.vlgmr.msrb.gmra.mxu1 %vm255_vm3, %v3736_v55 }
 0x67c   : > { %3374 = vmatpush.msra.mxu1 %v3333_v5 }
 0x680   : > { %v3386_v26 = vpop.permute.xlu0 %3385 }
 0x681   : > { %v3388_v6 = vsel %vm703_vm12, %v3384_v63, %v3386_v26 }
 0x682   : > { %3752 = vmatpush.msk.msra.mxu3 %vm3985_vm7, %v3388_v6 }
 0x683   : > { %3748 = vmatmul.msk.f32.vlgmr.msra.gmra.mxu1 %vm255_vm3, %v3746_v2  ;;  %3753 = vmatmul.msk.f32.vlgmr.msra.gmra.mxu3 %vm255_vm3, %v3749_v1 }
 0x688   : > { %v3445_v33 = vpop.permute.xlu0 %3444 }
 0x6ca   : > { %v2969_v7 = vpop.f32.mrf.mxu2 }
 0x6d2   : > { %v3012_v8 = vpop.f32.mrf.mxu0  ;;  %v3069_v9 = vpop.f32.mrf.mxu2 }
 0x6d3   : > { %v3013_v10 = vadd.f32 %v3012_v8, %v2969_v7 }
 0x6d5   : > { %v3092_v13 = vadd.f32 %v3069_v9, %v3013_v10 }
 0x6da   : > { %v3128_v12 = vpop.f32.mrf.mxu0  ;;  %v3175_v14 = vpop.f32.mrf.mxu2 }
 0x6db   : > { %v3151_v15 = vadd.f32 %v3128_v12, %v3092_v13 }
 0x6dd   : > { %v3198_v19 = vadd.f32 %v3175_v14, %v3151_v15 }
 0x6de   : > { %v2989_v11 = vpop.f32.mrf.mxu3 }
 0x6e6   : > { %v3089_v60 = vpop.f32.mrf.mxu3 }
 0x6e8   : > { %v3032_v18 = vpop.f32.mrf.mxu1  ;;  %v3299_v32 = vpop.f32.mrf.mxu2 }
 0x6e9   : > { %v3033_v22 = vadd.f32 %v3032_v18, %v2989_v11 }
 0x6ea   : > { %v3240_v61 = vpop.f32.mrf.mxu0 }
 0x6eb   : > { %v3263_v20 = vadd.f32 %v3240_v61, %v3198_v19  ;;  %v3093_v27 = vadd.f32 %v3089_v60, %v3033_v22 }
 0x6ed   : > { %v3322_v23 = vadd.f32 %v3299_v32, %v3263_v20 }
 0x6ee   : > { %v3195_v24 = vpop.f32.mrf.mxu3 }
 0x6f0   : > { %v3148_v21 = vpop.f32.mrf.mxu1 }
 0x6f1   : > { %v3152_v30 = vadd.f32 %v3148_v21, %v3093_v27 }
 0x6f2   : > { %v3356_v25 = vpop.f32.mrf.mxu0 }
 0x6f3   : > { %v3379_v28 = vadd.f32 %v3356_v25, %v3322_v23  ;;  %v3199_v35 = vadd.f32 %v3195_v24, %v3152_v30 }
 0x6f6   : > { %v3319_v38 = vpop.f32.mrf.mxu3 }
 0x6f8   : > { %v3260_v0 = vpop.f32.mrf.mxu1  ;;  %v3415_v29 = vpop.f32.mrf.mxu2 }
 0x6f9   : > { %v3438_v31 = vadd.f32 %v3415_v29, %v3379_v28  ;;  %v3264_v39 = vadd.f32 %v3260_v0, %v3199_v35 }
 0x6fb   : > { %v3447_v34 = vadd.f32 %v3445_v33, %v3438_v31  ;;  %v3323_v41 = vadd.f32 %v3319_v38, %v3264_v39 }
 0x6fd   : > { %v3449_v37 = vadd.f32 %v3840_v36, %v3447_v34 }
 0x6ff   : > { %3451 = vst [vmem:[%s170_s8] sm:$0xff] %v3449_v37 }
 0x700   : > { %v3376_v40 = vpop.f32.mrf.mxu1 }
 0x701   : > { %v3380_v43 = vadd.f32 %v3376_v40, %v3323_v41 }
 0x706   : > { %v3435_v44 = vpop.f32.mrf.mxu3 }
 0x707   : > { %v3439_v46 = vadd.f32 %v3435_v44, %v3380_v43 }
 0x709   : > { %v3448_v47 = vadd.f32 %v3445_v33, %v3439_v46 }
 0x70b   : > { %v3450_v49 = vadd.f32 %v3841_v48, %v3448_v47 }
 0x70d   : > { %3452 = vst [vmem:[%s170_s8 + $0x8] sm:$0xff] %v3450_v49 }
 0x70e PF: > { %s13_s12 = sadd.s32 1, %s3848_s12  }
 0x70f   : > { %p10_p4 = scmp.ge.s32.totalorder %s13_s12, 4  }
 0x711   :  { %12 = sbr.rel (!%p10_p4) target bundleno = 1 (0x1), region = 120 }

</bundles_post_ra>
